<compile_context>
chip_gen: v7x
topology: tpu7x:2x2x1
jax: 0.10.0
libtpu: 0.0.40
codegen_flags: <defaults>
</compile_context>

<pallas_src>
import functools

import jax
import jax.numpy as jnp
from jax.experimental import pallas as pl
from jax.experimental.pallas import tpu as pltpu


def _round_up(x, m):
    return (x + m - 1) // m * m


def _pick_t_chunk(T, target):
    """Largest divisor of T that is <= target (no time padding) unless it is
    much smaller than the target, in which case pad T up to a target multiple."""
    target = max(1, min(target, T))
    best = 1
    for c in range(target, 0, -1):
        if T % c == 0:
            best = c
            break
    return best if best * 2 >= target else target


def _tpu_core_info():
    """(tensorcores_per_chip, physical_vmem_bytes) with safe fallbacks."""
    cores, vmem = 1, 64 * 1024 * 1024  # conservative defaults (v7x-sized VMEM)
    try:
        info = pltpu.get_tpu_info()
    except Exception:
        return cores, vmem
    for name in ("num_cores", "num_cores_per_chip", "tensorcores_per_chip",
                 "num_tensorcores", "core_count"):
        v = getattr(info, name, None)
        if isinstance(v, int) and v > 0:
            cores = v
            break
    for name in ("vmem_capacity_bytes", "vmem_bytes", "vmem_size_bytes"):
        v = getattr(info, name, None)
        if isinstance(v, int) and v > 0:
            vmem = v
            break
    return cores, vmem


def _pad_gate_rows(w, nh, nh_p):
    """(4*nh, d) -> (4*nh_p, d): pad each of the 4 gate row-blocks to nh_p rows."""
    d = w.shape[1]
    w4 = w.reshape(4, nh, d)
    w4 = jnp.pad(w4, ((0, 0), (0, nh_p - nh), (0, 0)))
    return w4.reshape(4 * nh_p, d)


def _lstm_recurrent_kernel(xp_ref, whh_ref, bias_ref, out_ref, h_ref, c_ref,
                           *, nh, t_chunk, unroll):
    """Runs t_chunk LSTM steps, carrying (h, c) in VMEM scratch across chunks.

    xp_ref   : (T_CHUNK, B_BLK, 4*nh) f32  precomputed x_t @ W_ih^T (no bias)
    whh_ref  : (nh, 4*nh)             bf16/f32 resident hidden->hidden weights
    bias_ref : (1, 4*nh)              f32  b_ih + b_hh (per-gate padded)
    out_ref  : (T_CHUNK, B_BLK, nh)   f32  hidden states for this chunk
    h_ref    : (B_BLK, nh)            f32  scratch carrying h_{t-1}
    c_ref    : (B_BLK, nh)            f32  scratch carrying c_{t-1}

    NOTE: correctness relies on the grid being (batch_blocks, time_chunks)
    with time INNERMOST and sequential ("arbitrary"); h/c are reset whenever
    the time index restarts at 0.
    """
    t_blk = pl.program_id(1)

    @pl.when(t_blk == 0)
    def _():
        h_ref[...] = jnp.zeros_like(h_ref)
        c_ref[...] = jnp.zeros_like(c_ref)

    bias = bias_ref[...]  # hoisted out of the time loop (broadcast over rows)

    def sigmoid(x):
        # tanh-form sigmoid: one EUP op instead of exp + reciprocal per gate.
        return 0.5 * jnp.tanh(0.5 * x) + 0.5

    def step(t, carry):
        del carry
        h = h_ref[...]
        c = c_ref[...]
        # TODO(synk): if bundle dumps show the per-step RHS stream of W_hh
        # dominating (small B_blk, latency-bound), drive the MXU explicitly:
        # pltpu.matmul_push_rhs once per chunk (tiled over the 4*nh gate dim),
        # then matmul_acc_lhs/matmul_pop per timestep.
        gates = xp_ref[t] + bias + jnp.dot(
            h.astype(whh_ref.dtype), whh_ref[...],
            preferred_element_type=jnp.float32)
        # PyTorch gate order: input, forget, cell(g), output.  nh is a multiple
        # of 128, so every gate slice is lane-aligned (free static view).
        i_g = sigmoid(gates[:, 0 * nh:1 * nh])
        f_g = sigmoid(gates[:, 1 * nh:2 * nh])
        g_g = jnp.tanh(gates[:, 2 * nh:3 * nh])
        o_g = sigmoid(gates[:, 3 * nh:4 * nh])
        # Padded hidden lanes stay exactly 0: gates there are 0 (zero-padded
        # weights/bias) -> i=f=o=0.5, g=0 -> c_new = 0.5*0 + 0.5*0 = 0.
        c_new = f_g * c + i_g * g_g
        h_new = o_g * jnp.tanh(c_new)
        c_ref[...] = c_new
        h_ref[...] = h_new
        out_ref[t] = h_new  # (B_BLK, nh) lane-dense, sublane-full store
        return 0

    # Partial unroll: keeps LLO scheduling visibility without the vreg
    # pressure / code bloat of fully unrolling a 64-step chunk.
    jax.lax.fori_loop(0, t_chunk, step, 0, unroll=unroll)


def lstm_block_1d(x_bct, w_ih, w_hh, b_ih, b_hh, *, t_chunk_target=64,
                  unroll=8, mxu_dtype=jnp.bfloat16, num_cores=None):
    """Pallas implementation of LSTMBlock1d.forward.

    x_bct : (B, ni, T) float32   -- same layout as the PyTorch module input
    w_ih  : (4*nh, ni), w_hh : (4*nh, nh), b_ih/b_hh : (4*nh,)
    returns (B, nh, T) float32

    mxu_dtype=jnp.float32 gives an f32-weight recurrent path for
    accuracy-sensitive configs / long sequences (bf16 rounding compounds
    through h over time).
    """
    B, ni, T = x_bct.shape
    nh = w_hh.shape[1]
    f32 = jnp.float32

    nh_p = _round_up(nh, 128)              # lane-dense hidden dim

    cores, vmem_phys = _tpu_core_info()
    if num_cores is not None:
        cores = int(num_cores)
    # ~81% of physical VMEM: headroom for compiler-internal scratch.
    # => ~52 MiB on v7x (64 MiB phys), ~104 MiB on v5e/v6e (128 MiB phys).
    vmem_cap = (vmem_phys * 13) // 16

    # --- Per-gate padding so gate k occupies the nh_p-aligned slice k. ------
    # Padded gate rows / bias entries are exactly 0; combined with zero h0/c0
    # this keeps the padded hidden lanes identically zero for every t.
    w_ih_p = _pad_gate_rows(w_ih.astype(f32), nh, nh_p)                  # (4*nh_p, ni)
    w_hh_p = _pad_gate_rows(w_hh.astype(f32), nh, nh_p)                  # (4*nh_p, nh)
    w_hh_p = jnp.pad(w_hh_p, ((0, 0), (0, nh_p - nh)))                   # (4*nh_p, nh_p)
    bias_p = jnp.pad((b_ih + b_hh).astype(f32).reshape(4, nh),
                     ((0, 0), (0, nh_p - nh))).reshape(1, 4 * nh_p)      # (1, 4*nh_p)
    whh_t = jnp.transpose(w_hh_p, (1, 0)).astype(mxu_dtype)              # (nh_p, 4*nh_p)

    # --- Core-count-gated batch split + VMEM-driven chunk sizing. -----------
    # Only split the batch across grid blocks when there is >1 TensorCore to
    # run them on; on single-TC v5e/v6e extra batch blocks just rerun the
    # serial recurrence back-to-back.
    n_b = cores if (cores > 1 and B > 8) else 1

    single_buffer_whh = hasattr(pl, "Buffered")
    whh_bufs = 1 if single_buffer_whh else 2
    itemsize = jnp.dtype(mxu_dtype).itemsize
    whh_bytes = nh_p * 4 * nh_p * itemsize

    target = max(1, min(t_chunk_target, T))
    while True:
        b_p = _round_up(B, 8 * n_b)
        b_blk = b_p // n_b
        t_chunk = _pick_t_chunk(T, target)
        t_p = _round_up(T, t_chunk)
        xp_blk_bytes = t_chunk * b_blk * 4 * nh_p * 4
        out_blk_bytes = t_chunk * b_blk * nh_p * 4
        bias_bytes = 4 * nh_p * 4
        scratch_bytes = 2 * b_blk * nh_p * 4
        need = (whh_bufs * whh_bytes
                + 2 * (xp_blk_bytes + out_blk_bytes + bias_bytes)
                + scratch_bytes)
        if need <= vmem_cap:
            break
        if target > 1:
            target = max(1, target // 2)          # shrink the time chunk first
        elif b_blk > 8:
            n_b *= 2                              # last resort: serial batch tiling
        else:
            # Fail loudly instead of handing Mosaic an under-provisioned limit.
            raise NotImplementedError(
                f"LSTM working set ({need} B) exceeds VMEM cap ({vmem_cap} B). "
                "TODO(synk): tile the 4*nh gate dimension of W_hh with an "
                "inner loop for very large nh.")
    n_t = t_p // t_chunk
    unroll_n = max(1, min(unroll, t_chunk))

    # --- Hoisted input projection: one tall MXU GEMM over all timesteps. ----
    # Pad the (B, ni, T) input (cheap) rather than the (T, B, 4*nh_p) output;
    # the bias is added inside the kernel, so no extra HBM pass over x_proj.
    x_p = x_bct.astype(mxu_dtype)
    if b_p != B or t_p != T:
        x_p = jnp.pad(x_p, ((0, b_p - B), (0, 0), (0, t_p - T)))
    x_proj = jnp.einsum("bit,gi->tbg", x_p, w_ih_p.astype(mxu_dtype),
                        preferred_element_type=f32)                      # (t_p, b_p, 4*nh_p)
    # TODO(synk): if profiling shows the x_proj DMA exposed (memory-bound case),
    # store x_proj in bf16 and upcast inside the kernel.

    vmem_limit = int(min(max(need + need // 4, 32 * 1024 * 1024), vmem_cap))

    # Batch axis core-sharded only when the chip actually has >1 TensorCore;
    # the time axis is a sequential recurrence -> must stay "arbitrary".
    if cores > 1 and n_b % cores == 0 and hasattr(pltpu, "CORE_PARALLEL"):
        dim_sem = (pltpu.CORE_PARALLEL, pltpu.ARBITRARY)
    else:
        dim_sem = ("arbitrary", "arbitrary")

    cost = pl.CostEstimate(
        flops=int(2 * t_p * b_p * 4 * nh_p * nh_p + 10 * t_p * b_p * nh_p),
        transcendentals=int(5 * t_p * b_p * nh_p),
        bytes_accessed=int(x_proj.size * 4 + t_p * b_p * nh_p * 4
                           + whh_bytes + bias_p.size * 4),
    )

    kernel = functools.partial(_lstm_recurrent_kernel, nh=nh_p,
                               t_chunk=t_chunk, unroll=unroll_n)

    def _build_call(use_single_buffer):
        whh_kwargs = {}
        if use_single_buffer and hasattr(pl, "Buffered"):
            # Resident block (constant index_map): never re-DMA'd, so a single
            # buffer suffices -> halves its VMEM footprint (matters on v7x).
            whh_kwargs["pipeline_mode"] = pl.Buffered(1)
        whh_spec = pl.BlockSpec((nh_p, 4 * nh_p), lambda b, t: (0, 0),
                                **whh_kwargs)
        return pl.pallas_call(
            kernel,
            out_shape=jax.ShapeDtypeStruct((t_p, b_p, nh_p), f32),
            grid_spec=pltpu.PrefetchScalarGridSpec(
                num_scalar_prefetch=0,
                grid=(n_b, n_t),   # time innermost & sequential: do not reorder
                in_specs=[
                    # x_proj chunk for this (batch block, time chunk)
                    pl.BlockSpec((t_chunk, b_blk, 4 * nh_p),
                                 lambda b, t: (t, b, 0)),
                    # resident W_hh^T
                    whh_spec,
                    # tiny bias block, added in-kernel
                    pl.BlockSpec((1, 4 * nh_p), lambda b, t: (0, 0)),
                ],
                out_specs=pl.BlockSpec((t_chunk, b_blk, nh_p),
                                       lambda b, t: (t, b, 0)),
                scratch_shapes=[
                    pltpu.VMEM((b_blk, nh_p), f32),   # h carry
                    pltpu.VMEM((b_blk, nh_p), f32),   # c carry
                ],
            ),
            compiler_params=pltpu.CompilerParams(
                dimension_semantics=dim_sem,
                vmem_limit_bytes=vmem_limit,
            ),
            cost_estimate=cost,
        )

    try:
        out_tbh = _build_call(single_buffer_whh)(x_proj, whh_t, bias_p)
    except Exception:
        # pl.Buffered(1) unsupported on this jax version -> default buffering.
        out_tbh = _build_call(False)(x_proj, whh_t, bias_p)

    # Drop padding, then a single wrapper-side permute back to (B, nh, T),
    # matching `x.transpose(1, 2)` in the PyTorch module.
    return jnp.transpose(out_tbh[:T, :B, :nh], (1, 2, 0))


def _lstm_reference(x_bct, w_ih, w_hh, b_ih, b_hh):
    """Pure-JAX f32 reference (lax.scan) matching PyTorch nn.LSTM semantics."""
    B, ni, T = x_bct.shape
    nh = w_hh.shape[1]
    x_tbi = jnp.transpose(x_bct, (2, 0, 1))
    bias = b_ih + b_hh

    def step(carry, x_t):
        h, c = carry
        gates = x_t @ w_ih.T + h @ w_hh.T + bias
        i_g = jax.nn.sigmoid(gates[:, 0 * nh:1 * nh])
        f_g = jax.nn.sigmoid(gates[:, 1 * nh:2 * nh])
        g_g = jnp.tanh(gates[:, 2 * nh:3 * nh])
        o_g = jax.nn.sigmoid(gates[:, 3 * nh:4 * nh])
        c_new = f_g * c + i_g * g_g
        h_new = o_g * jnp.tanh(c_new)
        return (h_new, c_new), h_new

    init = (jnp.zeros((B, nh), jnp.float32), jnp.zeros((B, nh), jnp.float32))
    _, hs = jax.lax.scan(step, init, x_tbi)          # (T, B, nh)
    return jnp.transpose(hs, (1, 2, 0))              # (B, nh, T)


if __name__ == "__main__":
    # Small shapes consistent with the module's forward: x is (B, ni, T).
    B, ni, T, nh = 2, 4, 8, 32

    key = jax.random.PRNGKey(0)
    kx, k1, k2, k3, k4 = jax.random.split(key, 5)

    # PyTorch LSTM init: U(-1/sqrt(nh), 1/sqrt(nh)).
    bound = 1.0 / jnp.sqrt(jnp.float32(nh))
    w_ih = jax.random.uniform(k1, (4 * nh, ni), jnp.float32, -bound, bound)
    w_hh = jax.random.uniform(k2, (4 * nh, nh), jnp.float32, -bound, bound)
    b_ih = jax.random.uniform(k3, (4 * nh,), jnp.float32, -bound, bound)
    b_hh = jax.random.uniform(k4, (4 * nh,), jnp.float32, -bound, bound)

    x = jax.random.normal(kx, (B, ni, T), jnp.float32)

    ref = _lstm_reference(x, w_ih, w_hh, b_ih, b_hh)

    # f32 MXU path: must match the f32 reference tightly (structural check).
    out_f32 = jax.block_until_ready(
        lstm_block_1d(x, w_ih, w_hh, b_ih, b_hh, mxu_dtype=jnp.float32))
    assert out_f32.shape == (B, nh, T), out_f32.shape
    assert jnp.allclose(out_f32, ref, atol=1e-4, rtol=1e-4), \
        float(jnp.max(jnp.abs(out_f32 - ref)))

    # Default perf config (bf16 weights on the MXU, f32 accumulation/state).
    out = jax.block_until_ready(lstm_block_1d(x, w_ih, w_hh, b_ih, b_hh))
    assert out.shape == (B, nh, T), out.shape
    assert jnp.allclose(out, ref, atol=5e-2, rtol=5e-2), \
        float(jnp.max(jnp.abs(out - ref)))

    print("KERNEL_OK")
</pallas_src>

<mosaic_0001>
module attributes {stable_mosaic.version = 11 : i64} {
  func.func @_lstm_recurrent_kernel(%arg0: i32, %arg1: i32, %arg2: memref<8x8x512xf32, #tpu.memory_space<vmem>>, %arg3: memref<128x512xf32, #tpu.memory_space<vmem>>, %arg4: memref<1x512xf32, #tpu.memory_space<vmem>>, %arg5: memref<8x8x128xf32, #tpu.memory_space<vmem>>, %arg6: memref<8x128xf32, #tpu.memory_space<vmem>>, %arg7: memref<8x128xf32, #tpu.memory_space<vmem>>) attributes {dimension_semantics = [#tpu.dimension_semantics<arbitrary>, #tpu.dimension_semantics<arbitrary>], iteration_bounds = array<i64: 1, 1>, scalar_prefetch = 0 : i64, scratch_operands = 2 : i64, tpu.core_type = #tpu.core_type<tc>, window_params = [{transform_indices = @transform_0, window_bounds = array<i64: 8, 8, 512>}, {pipeline_mode = #tpu.pipeline_mode<synchronous>, transform_indices = @transform_1, window_bounds = array<i64: 128, 512>}, {pipeline_mode = #tpu.pipeline_mode<synchronous>, transform_indices = @transform_2, window_bounds = array<i64: 1, 512>}, {transform_indices = @transform_3, window_bounds = array<i64: 8, 8, 128>}]} {
    %c0_i32 = arith.constant 0 : i32
    %0 = arith.cmpi eq, %arg1, %c0_i32 : i32
    %1 = arith.extui %0 : i1 to i32
    %c0_i32_0 = arith.constant 0 : i32
    %2 = arith.cmpi ne, %1, %c0_i32_0 : i32
    scf.if %2 {
      %cst_194 = arith.constant 0.000000e+00 : f32
      %380 = vector.broadcast %cst_194 : f32 to vector<8x128xf32>
      %c0_195 = arith.constant 0 : index
      %c0_196 = arith.constant 0 : index
      %381 = vector.load %arg6[%c0_195, %c0_196] : memref<8x128xf32, #tpu.memory_space<vmem>>, vector<8x128xf32>
      tpu.vector_store %arg6[%c0_195, %c0_196], %380 {strides = array<i32>} : memref<8x128xf32, #tpu.memory_space<vmem>>, vector<8x128xf32>,
      %cst_197 = arith.constant 0.000000e+00 : f32
      %382 = vector.broadcast %cst_197 : f32 to vector<8x128xf32>
      %c0_198 = arith.constant 0 : index
      %c0_199 = arith.constant 0 : index
      %383 = vector.load %arg7[%c0_198, %c0_199] : memref<8x128xf32, #tpu.memory_space<vmem>>, vector<8x128xf32>
      tpu.vector_store %arg7[%c0_198, %c0_199], %382 {strides = array<i32>} : memref<8x128xf32, #tpu.memory_space<vmem>>, vector<8x128xf32>,
    } else {
    }
    %c0 = arith.constant 0 : index
    %c0_1 = arith.constant 0 : index
    %3 = vector.load %arg4[%c0, %c0_1] : memref<1x512xf32, #tpu.memory_space<vmem>>, vector<1x512xf32>
    %c0_i32_2 = arith.constant 0 : i32
    %c0_3 = arith.constant 0 : index
    %c0_4 = arith.constant 0 : index
    %4 = vector.load %arg6[%c0_3, %c0_4] : memref<8x128xf32, #tpu.memory_space<vmem>>, vector<8x128xf32>
    %c0_5 = arith.constant 0 : index
    %c0_6 = arith.constant 0 : index
    %5 = vector.load %arg7[%c0_5, %c0_6] : memref<8x128xf32, #tpu.memory_space<vmem>>, vector<8x128xf32>
    %6 = arith.index_cast %c0_i32_2 : i32 to index
    %c0_7 = arith.constant 0 : index
    %c0_8 = arith.constant 0 : index
    %7 = vector.load %arg2[%6, %c0_7, %c0_8] : memref<8x8x512xf32, #tpu.memory_space<vmem>>, vector<1x8x512xf32>
    %8 = vector.shape_cast %7 : vector<1x8x512xf32> to vector<8x512xf32>
    %9 = vector.broadcast %3 : vector<1x512xf32> to vector<8x512xf32>
    %10 = arith.addf %8, %9 : vector<8x512xf32>
    %c0_9 = arith.constant 0 : index
    %c0_10 = arith.constant 0 : index
    %11 = vector.load %arg3[%c0_9, %c0_10] : memref<128x512xf32, #tpu.memory_space<vmem>>, vector<128x512xf32>
    %cst = arith.constant dense<0.000000e+00> : vector<8x512xf32>
    %12 = tpu.matmul %4, %11, %cst {dimension_numbers = #tpu.dot_dimension_numbers<[1], [0], [0], [1], [0, 0, 1, 1], [], []>} : vector<8x128xf32>, vector<128x512xf32>, vector<8x512xf32> -> vector<8x512xf32>
    %13 = arith.addf %10, %12 : vector<8x512xf32>
    %14 = vector.extract_strided_slice %13 {offsets = [0, 0], sizes = [8, 128], strides = [1, 1]} : vector<8x512xf32> to vector<8x128xf32>
    %cst_11 = arith.constant 5.000000e-01 : f32
    %15 = vector.broadcast %cst_11 : f32 to vector<8x128xf32>
    %16 = arith.mulf %15, %14 : vector<8x128xf32>
    %17 = math.tanh %16 : vector<8x128xf32>
    %cst_12 = arith.constant 5.000000e-01 : f32
    %18 = vector.broadcast %cst_12 : f32 to vector<8x128xf32>
    %19 = arith.mulf %18, %17 : vector<8x128xf32>
    %cst_13 = arith.constant 5.000000e-01 : f32
    %20 = vector.broadcast %cst_13 : f32 to vector<8x128xf32>
    %21 = arith.addf %19, %20 : vector<8x128xf32>
    %22 = vector.extract_strided_slice %13 {offsets = [0, 128], sizes = [8, 128], strides = [1, 1]} : vector<8x512xf32> to vector<8x128xf32>
    %cst_14 = arith.constant 5.000000e-01 : f32
    %23 = vector.broadcast %cst_14 : f32 to vector<8x128xf32>
    %24 = arith.mulf %23, %22 : vector<8x128xf32>
    %25 = math.tanh %24 : vector<8x128xf32>
    %cst_15 = arith.constant 5.000000e-01 : f32
    %26 = vector.broadcast %cst_15 : f32 to vector<8x128xf32>
    %27 = arith.mulf %26, %25 : vector<8x128xf32>
    %cst_16 = arith.constant 5.000000e-01 : f32
    %28 = vector.broadcast %cst_16 : f32 to vector<8x128xf32>
    %29 = arith.addf %27, %28 : vector<8x128xf32>
    %30 = vector.extract_strided_slice %13 {offsets = [0, 256], sizes = [8, 128], strides = [1, 1]} : vector<8x512xf32> to vector<8x128xf32>
    %31 = math.tanh %30 : vector<8x128xf32>
    %32 = vector.extract_strided_slice %13 {offsets = [0, 384], sizes = [8, 128], strides = [1, 1]} : vector<8x512xf32> to vector<8x128xf32>
    %cst_17 = arith.constant 5.000000e-01 : f32
    %33 = vector.broadcast %cst_17 : f32 to vector<8x128xf32>
    %34 = arith.mulf %33, %32 : vector<8x128xf32>
    %35 = math.tanh %34 : vector<8x128xf32>
    %cst_18 = arith.constant 5.000000e-01 : f32
    %36 = vector.broadcast %cst_18 : f32 to vector<8x128xf32>
    %37 = arith.mulf %36, %35 : vector<8x128xf32>
    %cst_19 = arith.constant 5.000000e-01 : f32
    %38 = vector.broadcast %cst_19 : f32 to vector<8x128xf32>
    %39 = arith.addf %37, %38 : vector<8x128xf32>
    %40 = arith.mulf %29, %5 : vector<8x128xf32>
    %41 = arith.mulf %21, %31 : vector<8x128xf32>
    %42 = arith.addf %40, %41 : vector<8x128xf32>
    %43 = math.tanh %42 : vector<8x128xf32>
    %44 = arith.mulf %39, %43 : vector<8x128xf32>
    %c0_20 = arith.constant 0 : index
    %c0_21 = arith.constant 0 : index
    %45 = vector.load %arg7[%c0_20, %c0_21] : memref<8x128xf32, #tpu.memory_space<vmem>>, vector<8x128xf32>
    tpu.vector_store %arg7[%c0_20, %c0_21], %42 {strides = array<i32>} : memref<8x128xf32, #tpu.memory_space<vmem>>, vector<8x128xf32>,
    %c0_22 = arith.constant 0 : index
    %c0_23 = arith.constant 0 : index
    %46 = vector.load %arg6[%c0_22, %c0_23] : memref<8x128xf32, #tpu.memory_space<vmem>>, vector<8x128xf32>
    tpu.vector_store %arg6[%c0_22, %c0_23], %44 {strides = array<i32>} : memref<8x128xf32, #tpu.memory_space<vmem>>, vector<8x128xf32>,
    %47 = arith.index_cast %c0_i32_2 : i32 to index
    %c0_24 = arith.constant 0 : index
    %c0_25 = arith.constant 0 : index
    %48 = vector.load %arg5[%47, %c0_24, %c0_25] : memref<8x8x128xf32, #tpu.memory_space<vmem>>, vector<1x8x128xf32>
    %49 = vector.shape_cast %48 : vector<1x8x128xf32> to vector<8x128xf32>
    %50 = vector.shape_cast %44 : vector<8x128xf32> to vector<1x8x128xf32>
    tpu.vector_store %arg5[%47, %c0_24, %c0_25], %50 {strides = array<i32>} : memref<8x8x128xf32, #tpu.memory_space<vmem>>, vector<1x8x128xf32>,
    %c1_i32 = arith.constant 1 : i32
    %c0_26 = arith.constant 0 : index
    %c0_27 = arith.constant 0 : index
    %51 = vector.load %arg6[%c0_26, %c0_27] : memref<8x128xf32, #tpu.memory_space<vmem>>, vector<8x128xf32>
    %c0_28 = arith.constant 0 : index
    %c0_29 = arith.constant 0 : index
    %52 = vector.load %arg7[%c0_28, %c0_29] : memref<8x128xf32, #tpu.memory_space<vmem>>, vector<8x128xf32>
    %53 = arith.index_cast %c1_i32 : i32 to index
    %c0_30 = arith.constant 0 : index
    %c0_31 = arith.constant 0 : index
    %54 = vector.load %arg2[%53, %c0_30, %c0_31] : memref<8x8x512xf32, #tpu.memory_space<vmem>>, vector<1x8x512xf32>
    %55 = vector.shape_cast %54 : vector<1x8x512xf32> to vector<8x512xf32>
    %56 = vector.broadcast %3 : vector<1x512xf32> to vector<8x512xf32>
    %57 = arith.addf %55, %56 : vector<8x512xf32>
    %c0_32 = arith.constant 0 : index
    %c0_33 = arith.constant 0 : index
    %58 = vector.load %arg3[%c0_32, %c0_33] : memref<128x512xf32, #tpu.memory_space<vmem>>, vector<128x512xf32>
    %cst_34 = arith.constant dense<0.000000e+00> : vector<8x512xf32>
    %59 = tpu.matmul %51, %58, %cst_34 {dimension_numbers = #tpu.dot_dimension_numbers<[1], [0], [0], [1], [0, 0, 1, 1], [], []>} : vector<8x128xf32>, vector<128x512xf32>, vector<8x512xf32> -> vector<8x512xf32>
    %60 = arith.addf %57, %59 : vector<8x512xf32>
    %61 = vector.extract_strided_slice %60 {offsets = [0, 0], sizes = [8, 128], strides = [1, 1]} : vector<8x512xf32> to vector<8x128xf32>
    %cst_35 = arith.constant 5.000000e-01 : f32
    %62 = vector.broadcast %cst_35 : f32 to vector<8x128xf32>
    %63 = arith.mulf %62, %61 : vector<8x128xf32>
    %64 = math.tanh %63 : vector<8x128xf32>
    %cst_36 = arith.constant 5.000000e-01 : f32
    %65 = vector.broadcast %cst_36 : f32 to vector<8x128xf32>
    %66 = arith.mulf %65, %64 : vector<8x128xf32>
    %cst_37 = arith.constant 5.000000e-01 : f32
    %67 = vector.broadcast %cst_37 : f32 to vector<8x128xf32>
    %68 = arith.addf %66, %67 : vector<8x128xf32>
    %69 = vector.extract_strided_slice %60 {offsets = [0, 128], sizes = [8, 128], strides = [1, 1]} : vector<8x512xf32> to vector<8x128xf32>
    %cst_38 = arith.constant 5.000000e-01 : f32
    %70 = vector.broadcast %cst_38 : f32 to vector<8x128xf32>
    %71 = arith.mulf %70, %69 : vector<8x128xf32>
    %72 = math.tanh %71 : vector<8x128xf32>
    %cst_39 = arith.constant 5.000000e-01 : f32
    %73 = vector.broadcast %cst_39 : f32 to vector<8x128xf32>
    %74 = arith.mulf %73, %72 : vector<8x128xf32>
    %cst_40 = arith.constant 5.000000e-01 : f32
    %75 = vector.broadcast %cst_40 : f32 to vector<8x128xf32>
    %76 = arith.addf %74, %75 : vector<8x128xf32>
    %77 = vector.extract_strided_slice %60 {offsets = [0, 256], sizes = [8, 128], strides = [1, 1]} : vector<8x512xf32> to vector<8x128xf32>
    %78 = math.tanh %77 : vector<8x128xf32>
    %79 = vector.extract_strided_slice %60 {offsets = [0, 384], sizes = [8, 128], strides = [1, 1]} : vector<8x512xf32> to vector<8x128xf32>
    %cst_41 = arith.constant 5.000000e-01 : f32
    %80 = vector.broadcast %cst_41 : f32 to vector<8x128xf32>
    %81 = arith.mulf %80, %79 : vector<8x128xf32>
    %82 = math.tanh %81 : vector<8x128xf32>
    %cst_42 = arith.constant 5.000000e-01 : f32
    %83 = vector.broadcast %cst_42 : f32 to vector<8x128xf32>
    %84 = arith.mulf %83, %82 : vector<8x128xf32>
    %cst_43 = arith.constant 5.000000e-01 : f32
    %85 = vector.broadcast %cst_43 : f32 to vector<8x128xf32>
    %86 = arith.addf %84, %85 : vector<8x128xf32>
    %87 = arith.mulf %76, %52 : vector<8x128xf32>
    %88 = arith.mulf %68, %78 : vector<8x128xf32>
    %89 = arith.addf %87, %88 : vector<8x128xf32>
    %90 = math.tanh %89 : vector<8x128xf32>
    %91 = arith.mulf %86, %90 : vector<8x128xf32>
    %c0_44 = arith.constant 0 : index
    %c0_45 = arith.constant 0 : index
    %92 = vector.load %arg7[%c0_44, %c0_45] : memref<8x128xf32, #tpu.memory_space<vmem>>, vector<8x128xf32>
    tpu.vector_store %arg7[%c0_44, %c0_45], %89 {strides = array<i32>} : memref<8x128xf32, #tpu.memory_space<vmem>>, vector<8x128xf32>,
    %c0_46 = arith.constant 0 : index
    %c0_47 = arith.constant 0 : index
    %93 = vector.load %arg6[%c0_46, %c0_47] : memref<8x128xf32, #tpu.memory_space<vmem>>, vector<8x128xf32>
    tpu.vector_store %arg6[%c0_46, %c0_47], %91 {strides = array<i32>} : memref<8x128xf32, #tpu.memory_space<vmem>>, vector<8x128xf32>,
    %94 = arith.index_cast %c1_i32 : i32 to index
    %c0_48 = arith.constant 0 : index
    %c0_49 = arith.constant 0 : index
    %95 = vector.load %arg5[%94, %c0_48, %c0_49] : memref<8x8x128xf32, #tpu.memory_space<vmem>>, vector<1x8x128xf32>
    %96 = vector.shape_cast %95 : vector<1x8x128xf32> to vector<8x128xf32>
    %97 = vector.shape_cast %91 : vector<8x128xf32> to vector<1x8x128xf32>
    tpu.vector_store %arg5[%94, %c0_48, %c0_49], %97 {strides = array<i32>} : memref<8x8x128xf32, #tpu.memory_space<vmem>>, vector<1x8x128xf32>,
    %c2_i32 = arith.constant 2 : i32
    %c0_50 = arith.constant 0 : index
    %c0_51 = arith.constant 0 : index
    %98 = vector.load %arg6[%c0_50, %c0_51] : memref<8x128xf32, #tpu.memory_space<vmem>>, vector<8x128xf32>
    %c0_52 = arith.constant 0 : index
    %c0_53 = arith.constant 0 : index
    %99 = vector.load %arg7[%c0_52, %c0_53] : memref<8x128xf32, #tpu.memory_space<vmem>>, vector<8x128xf32>
    %100 = arith.index_cast %c2_i32 : i32 to index
    %c0_54 = arith.constant 0 : index
    %c0_55 = arith.constant 0 : index
    %101 = vector.load %arg2[%100, %c0_54, %c0_55] : memref<8x8x512xf32, #tpu.memory_space<vmem>>, vector<1x8x512xf32>
    %102 = vector.shape_cast %101 : vector<1x8x512xf32> to vector<8x512xf32>
    %103 = vector.broadcast %3 : vector<1x512xf32> to vector<8x512xf32>
    %104 = arith.addf %102, %103 : vector<8x512xf32>
    %c0_56 = arith.constant 0 : index
    %c0_57 = arith.constant 0 : index
    %105 = vector.load %arg3[%c0_56, %c0_57] : memref<128x512xf32, #tpu.memory_space<vmem>>, vector<128x512xf32>
    %cst_58 = arith.constant dense<0.000000e+00> : vector<8x512xf32>
    %106 = tpu.matmul %98, %105, %cst_58 {dimension_numbers = #tpu.dot_dimension_numbers<[1], [0], [0], [1], [0, 0, 1, 1], [], []>} : vector<8x128xf32>, vector<128x512xf32>, vector<8x512xf32> -> vector<8x512xf32>
    %107 = arith.addf %104, %106 : vector<8x512xf32>
    %108 = vector.extract_strided_slice %107 {offsets = [0, 0], sizes = [8, 128], strides = [1, 1]} : vector<8x512xf32> to vector<8x128xf32>
    %cst_59 = arith.constant 5.000000e-01 : f32
    %109 = vector.broadcast %cst_59 : f32 to vector<8x128xf32>
    %110 = arith.mulf %109, %108 : vector<8x128xf32>
    %111 = math.tanh %110 : vector<8x128xf32>
    %cst_60 = arith.constant 5.000000e-01 : f32
    %112 = vector.broadcast %cst_60 : f32 to vector<8x128xf32>
    %113 = arith.mulf %112, %111 : vector<8x128xf32>
    %cst_61 = arith.constant 5.000000e-01 : f32
    %114 = vector.broadcast %cst_61 : f32 to vector<8x128xf32>
    %115 = arith.addf %113, %114 : vector<8x128xf32>
    %116 = vector.extract_strided_slice %107 {offsets = [0, 128], sizes = [8, 128], strides = [1, 1]} : vector<8x512xf32> to vector<8x128xf32>
    %cst_62 = arith.constant 5.000000e-01 : f32
    %117 = vector.broadcast %cst_62 : f32 to vector<8x128xf32>
    %118 = arith.mulf %117, %116 : vector<8x128xf32>
    %119 = math.tanh %118 : vector<8x128xf32>
    %cst_63 = arith.constant 5.000000e-01 : f32
    %120 = vector.broadcast %cst_63 : f32 to vector<8x128xf32>
    %121 = arith.mulf %120, %119 : vector<8x128xf32>
    %cst_64 = arith.constant 5.000000e-01 : f32
    %122 = vector.broadcast %cst_64 : f32 to vector<8x128xf32>
    %123 = arith.addf %121, %122 : vector<8x128xf32>
    %124 = vector.extract_strided_slice %107 {offsets = [0, 256], sizes = [8, 128], strides = [1, 1]} : vector<8x512xf32> to vector<8x128xf32>
    %125 = math.tanh %124 : vector<8x128xf32>
    %126 = vector.extract_strided_slice %107 {offsets = [0, 384], sizes = [8, 128], strides = [1, 1]} : vector<8x512xf32> to vector<8x128xf32>
    %cst_65 = arith.constant 5.000000e-01 : f32
    %127 = vector.broadcast %cst_65 : f32 to vector<8x128xf32>
    %128 = arith.mulf %127, %126 : vector<8x128xf32>
    %129 = math.tanh %128 : vector<8x128xf32>
    %cst_66 = arith.constant 5.000000e-01 : f32
    %130 = vector.broadcast %cst_66 : f32 to vector<8x128xf32>
    %131 = arith.mulf %130, %129 : vector<8x128xf32>
    %cst_67 = arith.constant 5.000000e-01 : f32
    %132 = vector.broadcast %cst_67 : f32 to vector<8x128xf32>
    %133 = arith.addf %131, %132 : vector<8x128xf32>
    %134 = arith.mulf %123, %99 : vector<8x128xf32>
    %135 = arith.mulf %115, %125 : vector<8x128xf32>
    %136 = arith.addf %134, %135 : vector<8x128xf32>
    %137 = math.tanh %136 : vector<8x128xf32>
    %138 = arith.mulf %133, %137 : vector<8x128xf32>
    %c0_68 = arith.constant 0 : index
    %c0_69 = arith.constant 0 : index
    %139 = vector.load %arg7[%c0_68, %c0_69] : memref<8x128xf32, #tpu.memory_space<vmem>>, vector<8x128xf32>
    tpu.vector_store %arg7[%c0_68, %c0_69], %136 {strides = array<i32>} : memref<8x128xf32, #tpu.memory_space<vmem>>, vector<8x128xf32>,
    %c0_70 = arith.constant 0 : index
    %c0_71 = arith.constant 0 : index
    %140 = vector.load %arg6[%c0_70, %c0_71] : memref<8x128xf32, #tpu.memory_space<vmem>>, vector<8x128xf32>
    tpu.vector_store %arg6[%c0_70, %c0_71], %138 {strides = array<i32>} : memref<8x128xf32, #tpu.memory_space<vmem>>, vector<8x128xf32>,
    %141 = arith.index_cast %c2_i32 : i32 to index
    %c0_72 = arith.constant 0 : index
    %c0_73 = arith.constant 0 : index
    %142 = vector.load %arg5[%141, %c0_72, %c0_73] : memref<8x8x128xf32, #tpu.memory_space<vmem>>, vector<1x8x128xf32>
    %143 = vector.shape_cast %142 : vector<1x8x128xf32> to vector<8x128xf32>
    %144 = vector.shape_cast %138 : vector<8x128xf32> to vector<1x8x128xf32>
    tpu.vector_store %arg5[%141, %c0_72, %c0_73], %144 {strides = array<i32>} : memref<8x8x128xf32, #tpu.memory_space<vmem>>, vector<1x8x128xf32>,
    %c3_i32 = arith.constant 3 : i32
    %c0_74 = arith.constant 0 : index
    %c0_75 = arith.constant 0 : index
    %145 = vector.load %arg6[%c0_74, %c0_75] : memref<8x128xf32, #tpu.memory_space<vmem>>, vector<8x128xf32>
    %c0_76 = arith.constant 0 : index
    %c0_77 = arith.constant 0 : index
    %146 = vector.load %arg7[%c0_76, %c0_77] : memref<8x128xf32, #tpu.memory_space<vmem>>, vector<8x128xf32>
    %147 = arith.index_cast %c3_i32 : i32 to index
    %c0_78 = arith.constant 0 : index
    %c0_79 = arith.constant 0 : index
    %148 = vector.load %arg2[%147, %c0_78, %c0_79] : memref<8x8x512xf32, #tpu.memory_space<vmem>>, vector<1x8x512xf32>
    %149 = vector.shape_cast %148 : vector<1x8x512xf32> to vector<8x512xf32>
    %150 = vector.broadcast %3 : vector<1x512xf32> to vector<8x512xf32>
    %151 = arith.addf %149, %150 : vector<8x512xf32>
    %c0_80 = arith.constant 0 : index
    %c0_81 = arith.constant 0 : index
    %152 = vector.load %arg3[%c0_80, %c0_81] : memref<128x512xf32, #tpu.memory_space<vmem>>, vector<128x512xf32>
    %cst_82 = arith.constant dense<0.000000e+00> : vector<8x512xf32>
    %153 = tpu.matmul %145, %152, %cst_82 {dimension_numbers = #tpu.dot_dimension_numbers<[1], [0], [0], [1], [0, 0, 1, 1], [], []>} : vector<8x128xf32>, vector<128x512xf32>, vector<8x512xf32> -> vector<8x512xf32>
    %154 = arith.addf %151, %153 : vector<8x512xf32>
    %155 = vector.extract_strided_slice %154 {offsets = [0, 0], sizes = [8, 128], strides = [1, 1]} : vector<8x512xf32> to vector<8x128xf32>
    %cst_83 = arith.constant 5.000000e-01 : f32
    %156 = vector.broadcast %cst_83 : f32 to vector<8x128xf32>
    %157 = arith.mulf %156, %155 : vector<8x128xf32>
    %158 = math.tanh %157 : vector<8x128xf32>
    %cst_84 = arith.constant 5.000000e-01 : f32
    %159 = vector.broadcast %cst_84 : f32 to vector<8x128xf32>
    %160 = arith.mulf %159, %158 : vector<8x128xf32>
    %cst_85 = arith.constant 5.000000e-01 : f32
    %161 = vector.broadcast %cst_85 : f32 to vector<8x128xf32>
    %162 = arith.addf %160, %161 : vector<8x128xf32>
    %163 = vector.extract_strided_slice %154 {offsets = [0, 128], sizes = [8, 128], strides = [1, 1]} : vector<8x512xf32> to vector<8x128xf32>
    %cst_86 = arith.constant 5.000000e-01 : f32
    %164 = vector.broadcast %cst_86 : f32 to vector<8x128xf32>
    %165 = arith.mulf %164, %163 : vector<8x128xf32>
    %166 = math.tanh %165 : vector<8x128xf32>
    %cst_87 = arith.constant 5.000000e-01 : f32
    %167 = vector.broadcast %cst_87 : f32 to vector<8x128xf32>
    %168 = arith.mulf %167, %166 : vector<8x128xf32>
    %cst_88 = arith.constant 5.000000e-01 : f32
    %169 = vector.broadcast %cst_88 : f32 to vector<8x128xf32>
    %170 = arith.addf %168, %169 : vector<8x128xf32>
    %171 = vector.extract_strided_slice %154 {offsets = [0, 256], sizes = [8, 128], strides = [1, 1]} : vector<8x512xf32> to vector<8x128xf32>
    %172 = math.tanh %171 : vector<8x128xf32>
    %173 = vector.extract_strided_slice %154 {offsets = [0, 384], sizes = [8, 128], strides = [1, 1]} : vector<8x512xf32> to vector<8x128xf32>
    %cst_89 = arith.constant 5.000000e-01 : f32
    %174 = vector.broadcast %cst_89 : f32 to vector<8x128xf32>
    %175 = arith.mulf %174, %173 : vector<8x128xf32>
    %176 = math.tanh %175 : vector<8x128xf32>
    %cst_90 = arith.constant 5.000000e-01 : f32
    %177 = vector.broadcast %cst_90 : f32 to vector<8x128xf32>
    %178 = arith.mulf %177, %176 : vector<8x128xf32>
    %cst_91 = arith.constant 5.000000e-01 : f32
    %179 = vector.broadcast %cst_91 : f32 to vector<8x128xf32>
    %180 = arith.addf %178, %179 : vector<8x128xf32>
    %181 = arith.mulf %170, %146 : vector<8x128xf32>
    %182 = arith.mulf %162, %172 : vector<8x128xf32>
    %183 = arith.addf %181, %182 : vector<8x128xf32>
    %184 = math.tanh %183 : vector<8x128xf32>
    %185 = arith.mulf %180, %184 : vector<8x128xf32>
    %c0_92 = arith.constant 0 : index
    %c0_93 = arith.constant 0 : index
    %186 = vector.load %arg7[%c0_92, %c0_93] : memref<8x128xf32, #tpu.memory_space<vmem>>, vector<8x128xf32>
    tpu.vector_store %arg7[%c0_92, %c0_93], %183 {strides = array<i32>} : memref<8x128xf32, #tpu.memory_space<vmem>>, vector<8x128xf32>,
    %c0_94 = arith.constant 0 : index
    %c0_95 = arith.constant 0 : index
    %187 = vector.load %arg6[%c0_94, %c0_95] : memref<8x128xf32, #tpu.memory_space<vmem>>, vector<8x128xf32>
    tpu.vector_store %arg6[%c0_94, %c0_95], %185 {strides = array<i32>} : memref<8x128xf32, #tpu.memory_space<vmem>>, vector<8x128xf32>,
    %188 = arith.index_cast %c3_i32 : i32 to index
    %c0_96 = arith.constant 0 : index
    %c0_97 = arith.constant 0 : index
    %189 = vector.load %arg5[%188, %c0_96, %c0_97] : memref<8x8x128xf32, #tpu.memory_space<vmem>>, vector<1x8x128xf32>
    %190 = vector.shape_cast %189 : vector<1x8x128xf32> to vector<8x128xf32>
    %191 = vector.shape_cast %185 : vector<8x128xf32> to vector<1x8x128xf32>
    tpu.vector_store %arg5[%188, %c0_96, %c0_97], %191 {strides = array<i32>} : memref<8x8x128xf32, #tpu.memory_space<vmem>>, vector<1x8x128xf32>,
    %c4_i32 = arith.constant 4 : i32
    %c0_98 = arith.constant 0 : index
    %c0_99 = arith.constant 0 : index
    %192 = vector.load %arg6[%c0_98, %c0_99] : memref<8x128xf32, #tpu.memory_space<vmem>>, vector<8x128xf32>
    %c0_100 = arith.constant 0 : index
    %c0_101 = arith.constant 0 : index
    %193 = vector.load %arg7[%c0_100, %c0_101] : memref<8x128xf32, #tpu.memory_space<vmem>>, vector<8x128xf32>
    %194 = arith.index_cast %c4_i32 : i32 to index
    %c0_102 = arith.constant 0 : index
    %c0_103 = arith.constant 0 : index
    %195 = vector.load %arg2[%194, %c0_102, %c0_103] : memref<8x8x512xf32, #tpu.memory_space<vmem>>, vector<1x8x512xf32>
    %196 = vector.shape_cast %195 : vector<1x8x512xf32> to vector<8x512xf32>
    %197 = vector.broadcast %3 : vector<1x512xf32> to vector<8x512xf32>
    %198 = arith.addf %196, %197 : vector<8x512xf32>
    %c0_104 = arith.constant 0 : index
    %c0_105 = arith.constant 0 : index
    %199 = vector.load %arg3[%c0_104, %c0_105] : memref<128x512xf32, #tpu.memory_space<vmem>>, vector<128x512xf32>
    %cst_106 = arith.constant dense<0.000000e+00> : vector<8x512xf32>
    %200 = tpu.matmul %192, %199, %cst_106 {dimension_numbers = #tpu.dot_dimension_numbers<[1], [0], [0], [1], [0, 0, 1, 1], [], []>} : vector<8x128xf32>, vector<128x512xf32>, vector<8x512xf32> -> vector<8x512xf32>
    %201 = arith.addf %198, %200 : vector<8x512xf32>
    %202 = vector.extract_strided_slice %201 {offsets = [0, 0], sizes = [8, 128], strides = [1, 1]} : vector<8x512xf32> to vector<8x128xf32>
    %cst_107 = arith.constant 5.000000e-01 : f32
    %203 = vector.broadcast %cst_107 : f32 to vector<8x128xf32>
    %204 = arith.mulf %203, %202 : vector<8x128xf32>
    %205 = math.tanh %204 : vector<8x128xf32>
    %cst_108 = arith.constant 5.000000e-01 : f32
    %206 = vector.broadcast %cst_108 : f32 to vector<8x128xf32>
    %207 = arith.mulf %206, %205 : vector<8x128xf32>
    %cst_109 = arith.constant 5.000000e-01 : f32
    %208 = vector.broadcast %cst_109 : f32 to vector<8x128xf32>
    %209 = arith.addf %207, %208 : vector<8x128xf32>
    %210 = vector.extract_strided_slice %201 {offsets = [0, 128], sizes = [8, 128], strides = [1, 1]} : vector<8x512xf32> to vector<8x128xf32>
    %cst_110 = arith.constant 5.000000e-01 : f32
    %211 = vector.broadcast %cst_110 : f32 to vector<8x128xf32>
    %212 = arith.mulf %211, %210 : vector<8x128xf32>
    %213 = math.tanh %212 : vector<8x128xf32>
    %cst_111 = arith.constant 5.000000e-01 : f32
    %214 = vector.broadcast %cst_111 : f32 to vector<8x128xf32>
    %215 = arith.mulf %214, %213 : vector<8x128xf32>
    %cst_112 = arith.constant 5.000000e-01 : f32
    %216 = vector.broadcast %cst_112 : f32 to vector<8x128xf32>
    %217 = arith.addf %215, %216 : vector<8x128xf32>
    %218 = vector.extract_strided_slice %201 {offsets = [0, 256], sizes = [8, 128], strides = [1, 1]} : vector<8x512xf32> to vector<8x128xf32>
    %219 = math.tanh %218 : vector<8x128xf32>
    %220 = vector.extract_strided_slice %201 {offsets = [0, 384], sizes = [8, 128], strides = [1, 1]} : vector<8x512xf32> to vector<8x128xf32>
    %cst_113 = arith.constant 5.000000e-01 : f32
    %221 = vector.broadcast %cst_113 : f32 to vector<8x128xf32>
    %222 = arith.mulf %221, %220 : vector<8x128xf32>
    %223 = math.tanh %222 : vector<8x128xf32>
    %cst_114 = arith.constant 5.000000e-01 : f32
    %224 = vector.broadcast %cst_114 : f32 to vector<8x128xf32>
    %225 = arith.mulf %224, %223 : vector<8x128xf32>
    %cst_115 = arith.constant 5.000000e-01 : f32
    %226 = vector.broadcast %cst_115 : f32 to vector<8x128xf32>
    %227 = arith.addf %225, %226 : vector<8x128xf32>
    %228 = arith.mulf %217, %193 : vector<8x128xf32>
    %229 = arith.mulf %209, %219 : vector<8x128xf32>
    %230 = arith.addf %228, %229 : vector<8x128xf32>
    %231 = math.tanh %230 : vector<8x128xf32>
    %232 = arith.mulf %227, %231 : vector<8x128xf32>
    %c0_116 = arith.constant 0 : index
    %c0_117 = arith.constant 0 : index
    %233 = vector.load %arg7[%c0_116, %c0_117] : memref<8x128xf32, #tpu.memory_space<vmem>>, vector<8x128xf32>
    tpu.vector_store %arg7[%c0_116, %c0_117], %230 {strides = array<i32>} : memref<8x128xf32, #tpu.memory_space<vmem>>, vector<8x128xf32>,
    %c0_118 = arith.constant 0 : index
    %c0_119 = arith.constant 0 : index
    %234 = vector.load %arg6[%c0_118, %c0_119] : memref<8x128xf32, #tpu.memory_space<vmem>>, vector<8x128xf32>
    tpu.vector_store %arg6[%c0_118, %c0_119], %232 {strides = array<i32>} : memref<8x128xf32, #tpu.memory_space<vmem>>, vector<8x128xf32>,
    %235 = arith.index_cast %c4_i32 : i32 to index
    %c0_120 = arith.constant 0 : index
    %c0_121 = arith.constant 0 : index
    %236 = vector.load %arg5[%235, %c0_120, %c0_121] : memref<8x8x128xf32, #tpu.memory_space<vmem>>, vector<1x8x128xf32>
    %237 = vector.shape_cast %236 : vector<1x8x128xf32> to vector<8x128xf32>
    %238 = vector.shape_cast %232 : vector<8x128xf32> to vector<1x8x128xf32>
    tpu.vector_store %arg5[%235, %c0_120, %c0_121], %238 {strides = array<i32>} : memref<8x8x128xf32, #tpu.memory_space<vmem>>, vector<1x8x128xf32>,
    %c5_i32 = arith.constant 5 : i32
    %c0_122 = arith.constant 0 : index
    %c0_123 = arith.constant 0 : index
    %239 = vector.load %arg6[%c0_122, %c0_123] : memref<8x128xf32, #tpu.memory_space<vmem>>, vector<8x128xf32>
    %c0_124 = arith.constant 0 : index
    %c0_125 = arith.constant 0 : index
    %240 = vector.load %arg7[%c0_124, %c0_125] : memref<8x128xf32, #tpu.memory_space<vmem>>, vector<8x128xf32>
    %241 = arith.index_cast %c5_i32 : i32 to index
    %c0_126 = arith.constant 0 : index
    %c0_127 = arith.constant 0 : index
    %242 = vector.load %arg2[%241, %c0_126, %c0_127] : memref<8x8x512xf32, #tpu.memory_space<vmem>>, vector<1x8x512xf32>
    %243 = vector.shape_cast %242 : vector<1x8x512xf32> to vector<8x512xf32>
    %244 = vector.broadcast %3 : vector<1x512xf32> to vector<8x512xf32>
    %245 = arith.addf %243, %244 : vector<8x512xf32>
    %c0_128 = arith.constant 0 : index
    %c0_129 = arith.constant 0 : index
    %246 = vector.load %arg3[%c0_128, %c0_129] : memref<128x512xf32, #tpu.memory_space<vmem>>, vector<128x512xf32>
    %cst_130 = arith.constant dense<0.000000e+00> : vector<8x512xf32>
    %247 = tpu.matmul %239, %246, %cst_130 {dimension_numbers = #tpu.dot_dimension_numbers<[1], [0], [0], [1], [0, 0, 1, 1], [], []>} : vector<8x128xf32>, vector<128x512xf32>, vector<8x512xf32> -> vector<8x512xf32>
    %248 = arith.addf %245, %247 : vector<8x512xf32>
    %249 = vector.extract_strided_slice %248 {offsets = [0, 0], sizes = [8, 128], strides = [1, 1]} : vector<8x512xf32> to vector<8x128xf32>
    %cst_131 = arith.constant 5.000000e-01 : f32
    %250 = vector.broadcast %cst_131 : f32 to vector<8x128xf32>
    %251 = arith.mulf %250, %249 : vector<8x128xf32>
    %252 = math.tanh %251 : vector<8x128xf32>
    %cst_132 = arith.constant 5.000000e-01 : f32
    %253 = vector.broadcast %cst_132 : f32 to vector<8x128xf32>
    %254 = arith.mulf %253, %252 : vector<8x128xf32>
    %cst_133 = arith.constant 5.000000e-01 : f32
    %255 = vector.broadcast %cst_133 : f32 to vector<8x128xf32>
    %256 = arith.addf %254, %255 : vector<8x128xf32>
    %257 = vector.extract_strided_slice %248 {offsets = [0, 128], sizes = [8, 128], strides = [1, 1]} : vector<8x512xf32> to vector<8x128xf32>
    %cst_134 = arith.constant 5.000000e-01 : f32
    %258 = vector.broadcast %cst_134 : f32 to vector<8x128xf32>
    %259 = arith.mulf %258, %257 : vector<8x128xf32>
    %260 = math.tanh %259 : vector<8x128xf32>
    %cst_135 = arith.constant 5.000000e-01 : f32
    %261 = vector.broadcast %cst_135 : f32 to vector<8x128xf32>
    %262 = arith.mulf %261, %260 : vector<8x128xf32>
    %cst_136 = arith.constant 5.000000e-01 : f32
    %263 = vector.broadcast %cst_136 : f32 to vector<8x128xf32>
    %264 = arith.addf %262, %263 : vector<8x128xf32>
    %265 = vector.extract_strided_slice %248 {offsets = [0, 256], sizes = [8, 128], strides = [1, 1]} : vector<8x512xf32> to vector<8x128xf32>
    %266 = math.tanh %265 : vector<8x128xf32>
    %267 = vector.extract_strided_slice %248 {offsets = [0, 384], sizes = [8, 128], strides = [1, 1]} : vector<8x512xf32> to vector<8x128xf32>
    %cst_137 = arith.constant 5.000000e-01 : f32
    %268 = vector.broadcast %cst_137 : f32 to vector<8x128xf32>
    %269 = arith.mulf %268, %267 : vector<8x128xf32>
    %270 = math.tanh %269 : vector<8x128xf32>
    %cst_138 = arith.constant 5.000000e-01 : f32
    %271 = vector.broadcast %cst_138 : f32 to vector<8x128xf32>
    %272 = arith.mulf %271, %270 : vector<8x128xf32>
    %cst_139 = arith.constant 5.000000e-01 : f32
    %273 = vector.broadcast %cst_139 : f32 to vector<8x128xf32>
    %274 = arith.addf %272, %273 : vector<8x128xf32>
    %275 = arith.mulf %264, %240 : vector<8x128xf32>
    %276 = arith.mulf %256, %266 : vector<8x128xf32>
    %277 = arith.addf %275, %276 : vector<8x128xf32>
    %278 = math.tanh %277 : vector<8x128xf32>
    %279 = arith.mulf %274, %278 : vector<8x128xf32>
    %c0_140 = arith.constant 0 : index
    %c0_141 = arith.constant 0 : index
    %280 = vector.load %arg7[%c0_140, %c0_141] : memref<8x128xf32, #tpu.memory_space<vmem>>, vector<8x128xf32>
    tpu.vector_store %arg7[%c0_140, %c0_141], %277 {strides = array<i32>} : memref<8x128xf32, #tpu.memory_space<vmem>>, vector<8x128xf32>,
    %c0_142 = arith.constant 0 : index
    %c0_143 = arith.constant 0 : index
    %281 = vector.load %arg6[%c0_142, %c0_143] : memref<8x128xf32, #tpu.memory_space<vmem>>, vector<8x128xf32>
    tpu.vector_store %arg6[%c0_142, %c0_143], %279 {strides = array<i32>} : memref<8x128xf32, #tpu.memory_space<vmem>>, vector<8x128xf32>,
    %282 = arith.index_cast %c5_i32 : i32 to index
    %c0_144 = arith.constant 0 : index
    %c0_145 = arith.constant 0 : index
    %283 = vector.load %arg5[%282, %c0_144, %c0_145] : memref<8x8x128xf32, #tpu.memory_space<vmem>>, vector<1x8x128xf32>
    %284 = vector.shape_cast %283 : vector<1x8x128xf32> to vector<8x128xf32>
    %285 = vector.shape_cast %279 : vector<8x128xf32> to vector<1x8x128xf32>
    tpu.vector_store %arg5[%282, %c0_144, %c0_145], %285 {strides = array<i32>} : memref<8x8x128xf32, #tpu.memory_space<vmem>>, vector<1x8x128xf32>,
    %c6_i32 = arith.constant 6 : i32
    %c0_146 = arith.constant 0 : index
    %c0_147 = arith.constant 0 : index
    %286 = vector.load %arg6[%c0_146, %c0_147] : memref<8x128xf32, #tpu.memory_space<vmem>>, vector<8x128xf32>
    %c0_148 = arith.constant 0 : index
    %c0_149 = arith.constant 0 : index
    %287 = vector.load %arg7[%c0_148, %c0_149] : memref<8x128xf32, #tpu.memory_space<vmem>>, vector<8x128xf32>
    %288 = arith.index_cast %c6_i32 : i32 to index
    %c0_150 = arith.constant 0 : index
    %c0_151 = arith.constant 0 : index
    %289 = vector.load %arg2[%288, %c0_150, %c0_151] : memref<8x8x512xf32, #tpu.memory_space<vmem>>, vector<1x8x512xf32>
    %290 = vector.shape_cast %289 : vector<1x8x512xf32> to vector<8x512xf32>
    %291 = vector.broadcast %3 : vector<1x512xf32> to vector<8x512xf32>
    %292 = arith.addf %290, %291 : vector<8x512xf32>
    %c0_152 = arith.constant 0 : index
    %c0_153 = arith.constant 0 : index
    %293 = vector.load %arg3[%c0_152, %c0_153] : memref<128x512xf32, #tpu.memory_space<vmem>>, vector<128x512xf32>
    %cst_154 = arith.constant dense<0.000000e+00> : vector<8x512xf32>
    %294 = tpu.matmul %286, %293, %cst_154 {dimension_numbers = #tpu.dot_dimension_numbers<[1], [0], [0], [1], [0, 0, 1, 1], [], []>} : vector<8x128xf32>, vector<128x512xf32>, vector<8x512xf32> -> vector<8x512xf32>
    %295 = arith.addf %292, %294 : vector<8x512xf32>
    %296 = vector.extract_strided_slice %295 {offsets = [0, 0], sizes = [8, 128], strides = [1, 1]} : vector<8x512xf32> to vector<8x128xf32>
    %cst_155 = arith.constant 5.000000e-01 : f32
    %297 = vector.broadcast %cst_155 : f32 to vector<8x128xf32>
    %298 = arith.mulf %297, %296 : vector<8x128xf32>
    %299 = math.tanh %298 : vector<8x128xf32>
    %cst_156 = arith.constant 5.000000e-01 : f32
    %300 = vector.broadcast %cst_156 : f32 to vector<8x128xf32>
    %301 = arith.mulf %300, %299 : vector<8x128xf32>
    %cst_157 = arith.constant 5.000000e-01 : f32
    %302 = vector.broadcast %cst_157 : f32 to vector<8x128xf32>
    %303 = arith.addf %301, %302 : vector<8x128xf32>
    %304 = vector.extract_strided_slice %295 {offsets = [0, 128], sizes = [8, 128], strides = [1, 1]} : vector<8x512xf32> to vector<8x128xf32>
    %cst_158 = arith.constant 5.000000e-01 : f32
    %305 = vector.broadcast %cst_158 : f32 to vector<8x128xf32>
    %306 = arith.mulf %305, %304 : vector<8x128xf32>
    %307 = math.tanh %306 : vector<8x128xf32>
    %cst_159 = arith.constant 5.000000e-01 : f32
    %308 = vector.broadcast %cst_159 : f32 to vector<8x128xf32>
    %309 = arith.mulf %308, %307 : vector<8x128xf32>
    %cst_160 = arith.constant 5.000000e-01 : f32
    %310 = vector.broadcast %cst_160 : f32 to vector<8x128xf32>
    %311 = arith.addf %309, %310 : vector<8x128xf32>
    %312 = vector.extract_strided_slice %295 {offsets = [0, 256], sizes = [8, 128], strides = [1, 1]} : vector<8x512xf32> to vector<8x128xf32>
    %313 = math.tanh %312 : vector<8x128xf32>
    %314 = vector.extract_strided_slice %295 {offsets = [0, 384], sizes = [8, 128], strides = [1, 1]} : vector<8x512xf32> to vector<8x128xf32>
    %cst_161 = arith.constant 5.000000e-01 : f32
    %315 = vector.broadcast %cst_161 : f32 to vector<8x128xf32>
    %316 = arith.mulf %315, %314 : vector<8x128xf32>
    %317 = math.tanh %316 : vector<8x128xf32>
    %cst_162 = arith.constant 5.000000e-01 : f32
    %318 = vector.broadcast %cst_162 : f32 to vector<8x128xf32>
    %319 = arith.mulf %318, %317 : vector<8x128xf32>
    %cst_163 = arith.constant 5.000000e-01 : f32
    %320 = vector.broadcast %cst_163 : f32 to vector<8x128xf32>
    %321 = arith.addf %319, %320 : vector<8x128xf32>
    %322 = arith.mulf %311, %287 : vector<8x128xf32>
    %323 = arith.mulf %303, %313 : vector<8x128xf32>
    %324 = arith.addf %322, %323 : vector<8x128xf32>
    %325 = math.tanh %324 : vector<8x128xf32>
    %326 = arith.mulf %321, %325 : vector<8x128xf32>
    %c0_164 = arith.constant 0 : index
    %c0_165 = arith.constant 0 : index
    %327 = vector.load %arg7[%c0_164, %c0_165] : memref<8x128xf32, #tpu.memory_space<vmem>>, vector<8x128xf32>
    tpu.vector_store %arg7[%c0_164, %c0_165], %324 {strides = array<i32>} : memref<8x128xf32, #tpu.memory_space<vmem>>, vector<8x128xf32>,
    %c0_166 = arith.constant 0 : index
    %c0_167 = arith.constant 0 : index
    %328 = vector.load %arg6[%c0_166, %c0_167] : memref<8x128xf32, #tpu.memory_space<vmem>>, vector<8x128xf32>
    tpu.vector_store %arg6[%c0_166, %c0_167], %326 {strides = array<i32>} : memref<8x128xf32, #tpu.memory_space<vmem>>, vector<8x128xf32>,
    %329 = arith.index_cast %c6_i32 : i32 to index
    %c0_168 = arith.constant 0 : index
    %c0_169 = arith.constant 0 : index
    %330 = vector.load %arg5[%329, %c0_168, %c0_169] : memref<8x8x128xf32, #tpu.memory_space<vmem>>, vector<1x8x128xf32>
    %331 = vector.shape_cast %330 : vector<1x8x128xf32> to vector<8x128xf32>
    %332 = vector.shape_cast %326 : vector<8x128xf32> to vector<1x8x128xf32>
    tpu.vector_store %arg5[%329, %c0_168, %c0_169], %332 {strides = array<i32>} : memref<8x8x128xf32, #tpu.memory_space<vmem>>, vector<1x8x128xf32>,
    %c7_i32 = arith.constant 7 : i32
    %c0_170 = arith.constant 0 : index
    %c0_171 = arith.constant 0 : index
    %333 = vector.load %arg6[%c0_170, %c0_171] : memref<8x128xf32, #tpu.memory_space<vmem>>, vector<8x128xf32>
    %c0_172 = arith.constant 0 : index
    %c0_173 = arith.constant 0 : index
    %334 = vector.load %arg7[%c0_172, %c0_173] : memref<8x128xf32, #tpu.memory_space<vmem>>, vector<8x128xf32>
    %335 = arith.index_cast %c7_i32 : i32 to index
    %c0_174 = arith.constant 0 : index
    %c0_175 = arith.constant 0 : index
    %336 = vector.load %arg2[%335, %c0_174, %c0_175] : memref<8x8x512xf32, #tpu.memory_space<vmem>>, vector<1x8x512xf32>
    %337 = vector.shape_cast %336 : vector<1x8x512xf32> to vector<8x512xf32>
    %338 = vector.broadcast %3 : vector<1x512xf32> to vector<8x512xf32>
    %339 = arith.addf %337, %338 : vector<8x512xf32>
    %c0_176 = arith.constant 0 : index
    %c0_177 = arith.constant 0 : index
    %340 = vector.load %arg3[%c0_176, %c0_177] : memref<128x512xf32, #tpu.memory_space<vmem>>, vector<128x512xf32>
    %cst_178 = arith.constant dense<0.000000e+00> : vector<8x512xf32>
    %341 = tpu.matmul %333, %340, %cst_178 {dimension_numbers = #tpu.dot_dimension_numbers<[1], [0], [0], [1], [0, 0, 1, 1], [], []>} : vector<8x128xf32>, vector<128x512xf32>, vector<8x512xf32> -> vector<8x512xf32>
    %342 = arith.addf %339, %341 : vector<8x512xf32>
    %343 = vector.extract_strided_slice %342 {offsets = [0, 0], sizes = [8, 128], strides = [1, 1]} : vector<8x512xf32> to vector<8x128xf32>
    %cst_179 = arith.constant 5.000000e-01 : f32
    %344 = vector.broadcast %cst_179 : f32 to vector<8x128xf32>
    %345 = arith.mulf %344, %343 : vector<8x128xf32>
    %346 = math.tanh %345 : vector<8x128xf32>
    %cst_180 = arith.constant 5.000000e-01 : f32
    %347 = vector.broadcast %cst_180 : f32 to vector<8x128xf32>
    %348 = arith.mulf %347, %346 : vector<8x128xf32>
    %cst_181 = arith.constant 5.000000e-01 : f32
    %349 = vector.broadcast %cst_181 : f32 to vector<8x128xf32>
    %350 = arith.addf %348, %349 : vector<8x128xf32>
    %351 = vector.extract_strided_slice %342 {offsets = [0, 128], sizes = [8, 128], strides = [1, 1]} : vector<8x512xf32> to vector<8x128xf32>
    %cst_182 = arith.constant 5.000000e-01 : f32
    %352 = vector.broadcast %cst_182 : f32 to vector<8x128xf32>
    %353 = arith.mulf %352, %351 : vector<8x128xf32>
    %354 = math.tanh %353 : vector<8x128xf32>
    %cst_183 = arith.constant 5.000000e-01 : f32
    %355 = vector.broadcast %cst_183 : f32 to vector<8x128xf32>
    %356 = arith.mulf %355, %354 : vector<8x128xf32>
    %cst_184 = arith.constant 5.000000e-01 : f32
    %357 = vector.broadcast %cst_184 : f32 to vector<8x128xf32>
    %358 = arith.addf %356, %357 : vector<8x128xf32>
    %359 = vector.extract_strided_slice %342 {offsets = [0, 256], sizes = [8, 128], strides = [1, 1]} : vector<8x512xf32> to vector<8x128xf32>
    %360 = math.tanh %359 : vector<8x128xf32>
    %361 = vector.extract_strided_slice %342 {offsets = [0, 384], sizes = [8, 128], strides = [1, 1]} : vector<8x512xf32> to vector<8x128xf32>
    %cst_185 = arith.constant 5.000000e-01 : f32
    %362 = vector.broadcast %cst_185 : f32 to vector<8x128xf32>
    %363 = arith.mulf %362, %361 : vector<8x128xf32>
    %364 = math.tanh %363 : vector<8x128xf32>
    %cst_186 = arith.constant 5.000000e-01 : f32
    %365 = vector.broadcast %cst_186 : f32 to vector<8x128xf32>
    %366 = arith.mulf %365, %364 : vector<8x128xf32>
    %cst_187 = arith.constant 5.000000e-01 : f32
    %367 = vector.broadcast %cst_187 : f32 to vector<8x128xf32>
    %368 = arith.addf %366, %367 : vector<8x128xf32>
    %369 = arith.mulf %358, %334 : vector<8x128xf32>
    %370 = arith.mulf %350, %360 : vector<8x128xf32>
    %371 = arith.addf %369, %370 : vector<8x128xf32>
    %372 = math.tanh %371 : vector<8x128xf32>
    %373 = arith.mulf %368, %372 : vector<8x128xf32>
    %c0_188 = arith.constant 0 : index
    %c0_189 = arith.constant 0 : index
    %374 = vector.load %arg7[%c0_188, %c0_189] : memref<8x128xf32, #tpu.memory_space<vmem>>, vector<8x128xf32>
    tpu.vector_store %arg7[%c0_188, %c0_189], %371 {strides = array<i32>} : memref<8x128xf32, #tpu.memory_space<vmem>>, vector<8x128xf32>,
    %c0_190 = arith.constant 0 : index
    %c0_191 = arith.constant 0 : index
    %375 = vector.load %arg6[%c0_190, %c0_191] : memref<8x128xf32, #tpu.memory_space<vmem>>, vector<8x128xf32>
    tpu.vector_store %arg6[%c0_190, %c0_191], %373 {strides = array<i32>} : memref<8x128xf32, #tpu.memory_space<vmem>>, vector<8x128xf32>,
    %376 = arith.index_cast %c7_i32 : i32 to index
    %c0_192 = arith.constant 0 : index
    %c0_193 = arith.constant 0 : index
    %377 = vector.load %arg5[%376, %c0_192, %c0_193] : memref<8x8x128xf32, #tpu.memory_space<vmem>>, vector<1x8x128xf32>
    %378 = vector.shape_cast %377 : vector<1x8x128xf32> to vector<8x128xf32>
    %379 = vector.shape_cast %373 : vector<8x128xf32> to vector<1x8x128xf32>
    tpu.vector_store %arg5[%376, %c0_192, %c0_193], %379 {strides = array<i32>} : memref<8x8x128xf32, #tpu.memory_space<vmem>>, vector<1x8x128xf32>,
    %c8_i32 = arith.constant 8 : i32
    return
  }
  func.func @transform_0(%arg0: i32, %arg1: i32) -> (i32, i32, i32) {
    %c0_i32 = arith.constant 0 : i32
    %c0_i32_0 = arith.constant 0 : i32
    return %arg1, %arg0, %c0_i32 : i32, i32, i32
  }
  func.func @transform_1(%arg0: i32, %arg1: i32) -> (i32, i32) {
    %c0_i32 = arith.constant 0 : i32
    %c0_i32_0 = arith.constant 0 : i32
    %c0_i32_1 = arith.constant 0 : i32
    return %c0_i32, %c0_i32_0 : i32, i32
  }
  func.func @transform_2(%arg0: i32, %arg1: i32) -> (i32, i32) {
    %c0_i32 = arith.constant 0 : i32
    %c0_i32_0 = arith.constant 0 : i32
    %c0_i32_1 = arith.constant 0 : i32
    return %c0_i32, %c0_i32_0 : i32, i32
  }
  func.func @transform_3(%arg0: i32, %arg1: i32) -> (i32, i32, i32) {
    %c0_i32 = arith.constant 0 : i32
    %c0_i32_0 = arith.constant 0 : i32
    return %arg1, %arg0, %c0_i32 : i32, i32, i32
  }
}

module attributes {stable_mosaic.version = 11 : i64} {
  func.func @_lstm_recurrent_kernel(%arg0: i32, %arg1: i32, %arg2: memref<8x8x512xf32, #tpu.memory_space<vmem>>, %arg3: memref<128x512xf32, #tpu.memory_space<vmem>>, %arg4: memref<1x512xf32, #tpu.memory_space<vmem>>, %arg5: memref<8x8x128xf32, #tpu.memory_space<vmem>>, %arg6: memref<8x128xf32, #tpu.memory_space<vmem>>, %arg7: memref<8x128xf32, #tpu.memory_space<vmem>>) attributes {dimension_semantics = [#tpu.dimension_semantics<arbitrary>, #tpu.dimension_semantics<arbitrary>], iteration_bounds = array<i64: 1, 1>, scalar_prefetch = 0 : i64, scratch_operands = 2 : i64, tpu.core_type = #tpu.core_type<tc>, window_params = [{transform_indices = @transform_0, window_bounds = array<i64: 8, 8, 512>}, {pipeline_mode = #tpu.pipeline_mode<synchronous>, transform_indices = @transform_1, window_bounds = array<i64: 128, 512>}, {pipeline_mode = #tpu.pipeline_mode<synchronous>, transform_indices = @transform_2, window_bounds = array<i64: 1, 512>}, {transform_indices = @transform_3, window_bounds = array<i64: 8, 8, 128>}]} {
    %c0_i32 = arith.constant 0 : i32
    %0 = arith.cmpi eq, %arg1, %c0_i32 : i32
    %1 = arith.extui %0 : i1 to i32
    %c0_i32_0 = arith.constant 0 : i32
    %2 = arith.cmpi ne, %1, %c0_i32_0 : i32
    scf.if %2 {
      %cst_194 = arith.constant 0.000000e+00 : f32
      %380 = vector.broadcast %cst_194 : f32 to vector<8x128xf32>
      %c0_195 = arith.constant 0 : index
      %c0_196 = arith.constant 0 : index
      %381 = vector.load %arg6[%c0_195, %c0_196] : memref<8x128xf32, #tpu.memory_space<vmem>>, vector<8x128xf32>
      tpu.vector_store %arg6[%c0_195, %c0_196], %380 {strides = array<i32>} : memref<8x128xf32, #tpu.memory_space<vmem>>, vector<8x128xf32>,
      %cst_197 = arith.constant 0.000000e+00 : f32
      %382 = vector.broadcast %cst_197 : f32 to vector<8x128xf32>
      %c0_198 = arith.constant 0 : index
      %c0_199 = arith.constant 0 : index
      %383 = vector.load %arg7[%c0_198, %c0_199] : memref<8x128xf32, #tpu.memory_space<vmem>>, vector<8x128xf32>
      tpu.vector_store %arg7[%c0_198, %c0_199], %382 {strides = array<i32>} : memref<8x128xf32, #tpu.memory_space<vmem>>, vector<8x128xf32>,
    } else {
    }
    %c0 = arith.constant 0 : index
    %c0_1 = arith.constant 0 : index
    %3 = vector.load %arg4[%c0, %c0_1] : memref<1x512xf32, #tpu.memory_space<vmem>>, vector<1x512xf32>
    %c0_i32_2 = arith.constant 0 : i32
    %c0_3 = arith.constant 0 : index
    %c0_4 = arith.constant 0 : index
    %4 = vector.load %arg6[%c0_3, %c0_4] : memref<8x128xf32, #tpu.memory_space<vmem>>, vector<8x128xf32>
    %c0_5 = arith.constant 0 : index
    %c0_6 = arith.constant 0 : index
    %5 = vector.load %arg7[%c0_5, %c0_6] : memref<8x128xf32, #tpu.memory_space<vmem>>, vector<8x128xf32>
    %6 = arith.index_cast %c0_i32_2 : i32 to index
    %c0_7 = arith.constant 0 : index
    %c0_8 = arith.constant 0 : index
    %7 = vector.load %arg2[%6, %c0_7, %c0_8] : memref<8x8x512xf32, #tpu.memory_space<vmem>>, vector<1x8x512xf32>
    %8 = vector.shape_cast %7 : vector<1x8x512xf32> to vector<8x512xf32>
    %9 = vector.broadcast %3 : vector<1x512xf32> to vector<8x512xf32>
    %10 = arith.addf %8, %9 : vector<8x512xf32>
    %c0_9 = arith.constant 0 : index
    %c0_10 = arith.constant 0 : index
    %11 = vector.load %arg3[%c0_9, %c0_10] : memref<128x512xf32, #tpu.memory_space<vmem>>, vector<128x512xf32>
    %cst = arith.constant dense<0.000000e+00> : vector<8x512xf32>
    %12 = tpu.matmul %4, %11, %cst {dimension_numbers = #tpu.dot_dimension_numbers<[1], [0], [0], [1], [0, 0, 1, 1], [], []>} : vector<8x128xf32>, vector<128x512xf32>, vector<8x512xf32> -> vector<8x512xf32>
    %13 = arith.addf %10, %12 : vector<8x512xf32>
    %14 = vector.extract_strided_slice %13 {offsets = [0, 0], sizes = [8, 128], strides = [1, 1]} : vector<8x512xf32> to vector<8x128xf32>
    %cst_11 = arith.constant 5.000000e-01 : f32
    %15 = vector.broadcast %cst_11 : f32 to vector<8x128xf32>
    %16 = arith.mulf %15, %14 : vector<8x128xf32>
    %17 = math.tanh %16 : vector<8x128xf32>
    %cst_12 = arith.constant 5.000000e-01 : f32
    %18 = vector.broadcast %cst_12 : f32 to vector<8x128xf32>
    %19 = arith.mulf %18, %17 : vector<8x128xf32>
    %cst_13 = arith.constant 5.000000e-01 : f32
    %20 = vector.broadcast %cst_13 : f32 to vector<8x128xf32>
    %21 = arith.addf %19, %20 : vector<8x128xf32>
    %22 = vector.extract_strided_slice %13 {offsets = [0, 128], sizes = [8, 128], strides = [1, 1]} : vector<8x512xf32> to vector<8x128xf32>
    %cst_14 = arith.constant 5.000000e-01 : f32
    %23 = vector.broadcast %cst_14 : f32 to vector<8x128xf32>
    %24 = arith.mulf %23, %22 : vector<8x128xf32>
    %25 = math.tanh %24 : vector<8x128xf32>
    %cst_15 = arith.constant 5.000000e-01 : f32
    %26 = vector.broadcast %cst_15 : f32 to vector<8x128xf32>
    %27 = arith.mulf %26, %25 : vector<8x128xf32>
    %cst_16 = arith.constant 5.000000e-01 : f32
    %28 = vector.broadcast %cst_16 : f32 to vector<8x128xf32>
    %29 = arith.addf %27, %28 : vector<8x128xf32>
    %30 = vector.extract_strided_slice %13 {offsets = [0, 256], sizes = [8, 128], strides = [1, 1]} : vector<8x512xf32> to vector<8x128xf32>
    %31 = math.tanh %30 : vector<8x128xf32>
    %32 = vector.extract_strided_slice %13 {offsets = [0, 384], sizes = [8, 128], strides = [1, 1]} : vector<8x512xf32> to vector<8x128xf32>
    %cst_17 = arith.constant 5.000000e-01 : f32
    %33 = vector.broadcast %cst_17 : f32 to vector<8x128xf32>
    %34 = arith.mulf %33, %32 : vector<8x128xf32>
    %35 = math.tanh %34 : vector<8x128xf32>
    %cst_18 = arith.constant 5.000000e-01 : f32
    %36 = vector.broadcast %cst_18 : f32 to vector<8x128xf32>
    %37 = arith.mulf %36, %35 : vector<8x128xf32>
    %cst_19 = arith.constant 5.000000e-01 : f32
    %38 = vector.broadcast %cst_19 : f32 to vector<8x128xf32>
    %39 = arith.addf %37, %38 : vector<8x128xf32>
    %40 = arith.mulf %29, %5 : vector<8x128xf32>
    %41 = arith.mulf %21, %31 : vector<8x128xf32>
    %42 = arith.addf %40, %41 : vector<8x128xf32>
    %43 = math.tanh %42 : vector<8x128xf32>
    %44 = arith.mulf %39, %43 : vector<8x128xf32>
    %c0_20 = arith.constant 0 : index
    %c0_21 = arith.constant 0 : index
    %45 = vector.load %arg7[%c0_20, %c0_21] : memref<8x128xf32, #tpu.memory_space<vmem>>, vector<8x128xf32>
    tpu.vector_store %arg7[%c0_20, %c0_21], %42 {strides = array<i32>} : memref<8x128xf32, #tpu.memory_space<vmem>>, vector<8x128xf32>,
    %c0_22 = arith.constant 0 : index
    %c0_23 = arith.constant 0 : index
    %46 = vector.load %arg6[%c0_22, %c0_23] : memref<8x128xf32, #tpu.memory_space<vmem>>, vector<8x128xf32>
    tpu.vector_store %arg6[%c0_22, %c0_23], %44 {strides = array<i32>} : memref<8x128xf32, #tpu.memory_space<vmem>>, vector<8x128xf32>,
    %47 = arith.index_cast %c0_i32_2 : i32 to index
    %c0_24 = arith.constant 0 : index
    %c0_25 = arith.constant 0 : index
    %48 = vector.load %arg5[%47, %c0_24, %c0_25] : memref<8x8x128xf32, #tpu.memory_space<vmem>>, vector<1x8x128xf32>
    %49 = vector.shape_cast %48 : vector<1x8x128xf32> to vector<8x128xf32>
    %50 = vector.shape_cast %44 : vector<8x128xf32> to vector<1x8x128xf32>
    tpu.vector_store %arg5[%47, %c0_24, %c0_25], %50 {strides = array<i32>} : memref<8x8x128xf32, #tpu.memory_space<vmem>>, vector<1x8x128xf32>,
    %c1_i32 = arith.constant 1 : i32
    %c0_26 = arith.constant 0 : index
    %c0_27 = arith.constant 0 : index
    %51 = vector.load %arg6[%c0_26, %c0_27] : memref<8x128xf32, #tpu.memory_space<vmem>>, vector<8x128xf32>
    %c0_28 = arith.constant 0 : index
    %c0_29 = arith.constant 0 : index
    %52 = vector.load %arg7[%c0_28, %c0_29] : memref<8x128xf32, #tpu.memory_space<vmem>>, vector<8x128xf32>
    %53 = arith.index_cast %c1_i32 : i32 to index
    %c0_30 = arith.constant 0 : index
    %c0_31 = arith.constant 0 : index
    %54 = vector.load %arg2[%53, %c0_30, %c0_31] : memref<8x8x512xf32, #tpu.memory_space<vmem>>, vector<1x8x512xf32>
    %55 = vector.shape_cast %54 : vector<1x8x512xf32> to vector<8x512xf32>
    %56 = vector.broadcast %3 : vector<1x512xf32> to vector<8x512xf32>
    %57 = arith.addf %55, %56 : vector<8x512xf32>
    %c0_32 = arith.constant 0 : index
    %c0_33 = arith.constant 0 : index
    %58 = vector.load %arg3[%c0_32, %c0_33] : memref<128x512xf32, #tpu.memory_space<vmem>>, vector<128x512xf32>
    %cst_34 = arith.constant dense<0.000000e+00> : vector<8x512xf32>
    %59 = tpu.matmul %51, %58, %cst_34 {dimension_numbers = #tpu.dot_dimension_numbers<[1], [0], [0], [1], [0, 0, 1, 1], [], []>} : vector<8x128xf32>, vector<128x512xf32>, vector<8x512xf32> -> vector<8x512xf32>
    %60 = arith.addf %57, %59 : vector<8x512xf32>
    %61 = vector.extract_strided_slice %60 {offsets = [0, 0], sizes = [8, 128], strides = [1, 1]} : vector<8x512xf32> to vector<8x128xf32>
    %cst_35 = arith.constant 5.000000e-01 : f32
    %62 = vector.broadcast %cst_35 : f32 to vector<8x128xf32>
    %63 = arith.mulf %62, %61 : vector<8x128xf32>
    %64 = math.tanh %63 : vector<8x128xf32>
    %cst_36 = arith.constant 5.000000e-01 : f32
    %65 = vector.broadcast %cst_36 : f32 to vector<8x128xf32>
    %66 = arith.mulf %65, %64 : vector<8x128xf32>
    %cst_37 = arith.constant 5.000000e-01 : f32
    %67 = vector.broadcast %cst_37 : f32 to vector<8x128xf32>
    %68 = arith.addf %66, %67 : vector<8x128xf32>
    %69 = vector.extract_strided_slice %60 {offsets = [0, 128], sizes = [8, 128], strides = [1, 1]} : vector<8x512xf32> to vector<8x128xf32>
    %cst_38 = arith.constant 5.000000e-01 : f32
    %70 = vector.broadcast %cst_38 : f32 to vector<8x128xf32>
    %71 = arith.mulf %70, %69 : vector<8x128xf32>
    %72 = math.tanh %71 : vector<8x128xf32>
    %cst_39 = arith.constant 5.000000e-01 : f32
    %73 = vector.broadcast %cst_39 : f32 to vector<8x128xf32>
    %74 = arith.mulf %73, %72 : vector<8x128xf32>
    %cst_40 = arith.constant 5.000000e-01 : f32
    %75 = vector.broadcast %cst_40 : f32 to vector<8x128xf32>
    %76 = arith.addf %74, %75 : vector<8x128xf32>
    %77 = vector.extract_strided_slice %60 {offsets = [0, 256], sizes = [8, 128], strides = [1, 1]} : vector<8x512xf32> to vector<8x128xf32>
    %78 = math.tanh %77 : vector<8x128xf32>
    %79 = vector.extract_strided_slice %60 {offsets = [0, 384], sizes = [8, 128], strides = [1, 1]} : vector<8x512xf32> to vector<8x128xf32>
    %cst_41 = arith.constant 5.000000e-01 : f32
    %80 = vector.broadcast %cst_41 : f32 to vector<8x128xf32>
    %81 = arith.mulf %80, %79 : vector<8x128xf32>
    %82 = math.tanh %81 : vector<8x128xf32>
    %cst_42 = arith.constant 5.000000e-01 : f32
    %83 = vector.broadcast %cst_42 : f32 to vector<8x128xf32>
    %84 = arith.mulf %83, %82 : vector<8x128xf32>
    %cst_43 = arith.constant 5.000000e-01 : f32
    %85 = vector.broadcast %cst_43 : f32 to vector<8x128xf32>
    %86 = arith.addf %84, %85 : vector<8x128xf32>
    %87 = arith.mulf %76, %52 : vector<8x128xf32>
    %88 = arith.mulf %68, %78 : vector<8x128xf32>
    %89 = arith.addf %87, %88 : vector<8x128xf32>
    %90 = math.tanh %89 : vector<8x128xf32>
    %91 = arith.mulf %86, %90 : vector<8x128xf32>
    %c0_44 = arith.constant 0 : index
    %c0_45 = arith.constant 0 : index
    %92 = vector.load %arg7[%c0_44, %c0_45] : memref<8x128xf32, #tpu.memory_space<vmem>>, vector<8x128xf32>
    tpu.vector_store %arg7[%c0_44, %c0_45], %89 {strides = array<i32>} : memref<8x128xf32, #tpu.memory_space<vmem>>, vector<8x128xf32>,
    %c0_46 = arith.constant 0 : index
    %c0_47 = arith.constant 0 : index
    %93 = vector.load %arg6[%c0_46, %c0_47] : memref<8x128xf32, #tpu.memory_space<vmem>>, vector<8x128xf32>
    tpu.vector_store %arg6[%c0_46, %c0_47], %91 {strides = array<i32>} : memref<8x128xf32, #tpu.memory_space<vmem>>, vector<8x128xf32>,
    %94 = arith.index_cast %c1_i32 : i32 to index
    %c0_48 = arith.constant 0 : index
    %c0_49 = arith.constant 0 : index
    %95 = vector.load %arg5[%94, %c0_48, %c0_49] : memref<8x8x128xf32, #tpu.memory_space<vmem>>, vector<1x8x128xf32>
    %96 = vector.shape_cast %95 : vector<1x8x128xf32> to vector<8x128xf32>
    %97 = vector.shape_cast %91 : vector<8x128xf32> to vector<1x8x128xf32>
    tpu.vector_store %arg5[%94, %c0_48, %c0_49], %97 {strides = array<i32>} : memref<8x8x128xf32, #tpu.memory_space<vmem>>, vector<1x8x128xf32>,
    %c2_i32 = arith.constant 2 : i32
    %c0_50 = arith.constant 0 : index
    %c0_51 = arith.constant 0 : index
    %98 = vector.load %arg6[%c0_50, %c0_51] : memref<8x128xf32, #tpu.memory_space<vmem>>, vector<8x128xf32>
    %c0_52 = arith.constant 0 : index
    %c0_53 = arith.constant 0 : index
    %99 = vector.load %arg7[%c0_52, %c0_53] : memref<8x128xf32, #tpu.memory_space<vmem>>, vector<8x128xf32>
    %100 = arith.index_cast %c2_i32 : i32 to index
    %c0_54 = arith.constant 0 : index
    %c0_55 = arith.constant 0 : index
    %101 = vector.load %arg2[%100, %c0_54, %c0_55] : memref<8x8x512xf32, #tpu.memory_space<vmem>>, vector<1x8x512xf32>
    %102 = vector.shape_cast %101 : vector<1x8x512xf32> to vector<8x512xf32>
    %103 = vector.broadcast %3 : vector<1x512xf32> to vector<8x512xf32>
    %104 = arith.addf %102, %103 : vector<8x512xf32>
    %c0_56 = arith.constant 0 : index
    %c0_57 = arith.constant 0 : index
    %105 = vector.load %arg3[%c0_56, %c0_57] : memref<128x512xf32, #tpu.memory_space<vmem>>, vector<128x512xf32>
    %cst_58 = arith.constant dense<0.000000e+00> : vector<8x512xf32>
    %106 = tpu.matmul %98, %105, %cst_58 {dimension_numbers = #tpu.dot_dimension_numbers<[1], [0], [0], [1], [0, 0, 1, 1], [], []>} : vector<8x128xf32>, vector<128x512xf32>, vector<8x512xf32> -> vector<8x512xf32>
    %107 = arith.addf %104, %106 : vector<8x512xf32>
    %108 = vector.extract_strided_slice %107 {offsets = [0, 0], sizes = [8, 128], strides = [1, 1]} : vector<8x512xf32> to vector<8x128xf32>
    %cst_59 = arith.constant 5.000000e-01 : f32
    %109 = vector.broadcast %cst_59 : f32 to vector<8x128xf32>
    %110 = arith.mulf %109, %108 : vector<8x128xf32>
    %111 = math.tanh %110 : vector<8x128xf32>
    %cst_60 = arith.constant 5.000000e-01 : f32
    %112 = vector.broadcast %cst_60 : f32 to vector<8x128xf32>
    %113 = arith.mulf %112, %111 : vector<8x128xf32>
    %cst_61 = arith.constant 5.000000e-01 : f32
    %114 = vector.broadcast %cst_61 : f32 to vector<8x128xf32>
    %115 = arith.addf %113, %114 : vector<8x128xf32>
    %116 = vector.extract_strided_slice %107 {offsets = [0, 128], sizes = [8, 128], strides = [1, 1]} : vector<8x512xf32> to vector<8x128xf32>
    %cst_62 = arith.constant 5.000000e-01 : f32
    %117 = vector.broadcast %cst_62 : f32 to vector<8x128xf32>
    %118 = arith.mulf %117, %116 : vector<8x128xf32>
    %119 = math.tanh %118 : vector<8x128xf32>
    %cst_63 = arith.constant 5.000000e-01 : f32
    %120 = vector.broadcast %cst_63 : f32 to vector<8x128xf32>
    %121 = arith.mulf %120, %119 : vector<8x128xf32>
    %cst_64 = arith.constant 5.000000e-01 : f32
    %122 = vector.broadcast %cst_64 : f32 to vector<8x128xf32>
    %123 = arith.addf %121, %122 : vector<8x128xf32>
    %124 = vector.extract_strided_slice %107 {offsets = [0, 256], sizes = [8, 128], strides = [1, 1]} : vector<8x512xf32> to vector<8x128xf32>
    %125 = math.tanh %124 : vector<8x128xf32>
    %126 = vector.extract_strided_slice %107 {offsets = [0, 384], sizes = [8, 128], strides = [1, 1]} : vector<8x512xf32> to vector<8x128xf32>
    %cst_65 = arith.constant 5.000000e-01 : f32
    %127 = vector.broadcast %cst_65 : f32 to vector<8x128xf32>
    %128 = arith.mulf %127, %126 : vector<8x128xf32>
    %129 = math.tanh %128 : vector<8x128xf32>
    %cst_66 = arith.constant 5.000000e-01 : f32
    %130 = vector.broadcast %cst_66 : f32 to vector<8x128xf32>
    %131 = arith.mulf %130, %129 : vector<8x128xf32>
    %cst_67 = arith.constant 5.000000e-01 : f32
    %132 = vector.broadcast %cst_67 : f32 to vector<8x128xf32>
    %133 = arith.addf %131, %132 : vector<8x128xf32>
    %134 = arith.mulf %123, %99 : vector<8x128xf32>
    %135 = arith.mulf %115, %125 : vector<8x128xf32>
    %136 = arith.addf %134, %135 : vector<8x128xf32>
    %137 = math.tanh %136 : vector<8x128xf32>
    %138 = arith.mulf %133, %137 : vector<8x128xf32>
    %c0_68 = arith.constant 0 : index
    %c0_69 = arith.constant 0 : index
    %139 = vector.load %arg7[%c0_68, %c0_69] : memref<8x128xf32, #tpu.memory_space<vmem>>, vector<8x128xf32>
    tpu.vector_store %arg7[%c0_68, %c0_69], %136 {strides = array<i32>} : memref<8x128xf32, #tpu.memory_space<vmem>>, vector<8x128xf32>,
    %c0_70 = arith.constant 0 : index
    %c0_71 = arith.constant 0 : index
    %140 = vector.load %arg6[%c0_70, %c0_71] : memref<8x128xf32, #tpu.memory_space<vmem>>, vector<8x128xf32>
    tpu.vector_store %arg6[%c0_70, %c0_71], %138 {strides = array<i32>} : memref<8x128xf32, #tpu.memory_space<vmem>>, vector<8x128xf32>,
    %141 = arith.index_cast %c2_i32 : i32 to index
    %c0_72 = arith.constant 0 : index
    %c0_73 = arith.constant 0 : index
    %142 = vector.load %arg5[%141, %c0_72, %c0_73] : memref<8x8x128xf32, #tpu.memory_space<vmem>>, vector<1x8x128xf32>
    %143 = vector.shape_cast %142 : vector<1x8x128xf32> to vector<8x128xf32>
    %144 = vector.shape_cast %138 : vector<8x128xf32> to vector<1x8x128xf32>
    tpu.vector_store %arg5[%141, %c0_72, %c0_73], %144 {strides = array<i32>} : memref<8x8x128xf32, #tpu.memory_space<vmem>>, vector<1x8x128xf32>,
    %c3_i32 = arith.constant 3 : i32
    %c0_74 = arith.constant 0 : index
    %c0_75 = arith.constant 0 : index
    %145 = vector.load %arg6[%c0_74, %c0_75] : memref<8x128xf32, #tpu.memory_space<vmem>>, vector<8x128xf32>
    %c0_76 = arith.constant 0 : index
    %c0_77 = arith.constant 0 : index
    %146 = vector.load %arg7[%c0_76, %c0_77] : memref<8x128xf32, #tpu.memory_space<vmem>>, vector<8x128xf32>
    %147 = arith.index_cast %c3_i32 : i32 to index
    %c0_78 = arith.constant 0 : index
    %c0_79 = arith.constant 0 : index
    %148 = vector.load %arg2[%147, %c0_78, %c0_79] : memref<8x8x512xf32, #tpu.memory_space<vmem>>, vector<1x8x512xf32>
    %149 = vector.shape_cast %148 : vector<1x8x512xf32> to vector<8x512xf32>
    %150 = vector.broadcast %3 : vector<1x512xf32> to vector<8x512xf32>
    %151 = arith.addf %149, %150 : vector<8x512xf32>
    %c0_80 = arith.constant 0 : index
    %c0_81 = arith.constant 0 : index
    %152 = vector.load %arg3[%c0_80, %c0_81] : memref<128x512xf32, #tpu.memory_space<vmem>>, vector<128x512xf32>
    %cst_82 = arith.constant dense<0.000000e+00> : vector<8x512xf32>
    %153 = tpu.matmul %145, %152, %cst_82 {dimension_numbers = #tpu.dot_dimension_numbers<[1], [0], [0], [1], [0, 0, 1, 1], [], []>} : vector<8x128xf32>, vector<128x512xf32>, vector<8x512xf32> -> vector<8x512xf32>
    %154 = arith.addf %151, %153 : vector<8x512xf32>
    %155 = vector.extract_strided_slice %154 {offsets = [0, 0], sizes = [8, 128], strides = [1, 1]} : vector<8x512xf32> to vector<8x128xf32>
    %cst_83 = arith.constant 5.000000e-01 : f32
    %156 = vector.broadcast %cst_83 : f32 to vector<8x128xf32>
    %157 = arith.mulf %156, %155 : vector<8x128xf32>
    %158 = math.tanh %157 : vector<8x128xf32>
    %cst_84 = arith.constant 5.000000e-01 : f32
    %159 = vector.broadcast %cst_84 : f32 to vector<8x128xf32>
    %160 = arith.mulf %159, %158 : vector<8x128xf32>
    %cst_85 = arith.constant 5.000000e-01 : f32
    %161 = vector.broadcast %cst_85 : f32 to vector<8x128xf32>
    %162 = arith.addf %160, %161 : vector<8x128xf32>
    %163 = vector.extract_strided_slice %154 {offsets = [0, 128], sizes = [8, 128], strides = [1, 1]} : vector<8x512xf32> to vector<8x128xf32>
    %cst_86 = arith.constant 5.000000e-01 : f32
    %164 = vector.broadcast %cst_86 : f32 to vector<8x128xf32>
    %165 = arith.mulf %164, %163 : vector<8x128xf32>
    %166 = math.tanh %165 : vector<8x128xf32>
    %cst_87 = arith.constant 5.000000e-01 : f32
    %167 = vector.broadcast %cst_87 : f32 to vector<8x128xf32>
    %168 = arith.mulf %167, %166 : vector<8x128xf32>
    %cst_88 = arith.constant 5.000000e-01 : f32
    %169 = vector.broadcast %cst_88 : f32 to vector<8x128xf32>
    %170 = arith.addf %168, %169 : vector<8x128xf32>
    %171 = vector.extract_strided_slice %154 {offsets = [0, 256], sizes = [8, 128], strides = [1, 1]} : vector<8x512xf32> to vector<8x128xf32>
    %172 = math.tanh %171 : vector<8x128xf32>
    %173 = vector.extract_strided_slice %154 {offsets = [0, 384], sizes = [8, 128], strides = [1, 1]} : vector<8x512xf32> to vector<8x128xf32>
    %cst_89 = arith.constant 5.000000e-01 : f32
    %174 = vector.broadcast %cst_89 : f32 to vector<8x128xf32>
    %175 = arith.mulf %174, %173 : vector<8x128xf32>
    %176 = math.tanh %175 : vector<8x128xf32>
    %cst_90 = arith.constant 5.000000e-01 : f32
    %177 = vector.broadcast %cst_90 : f32 to vector<8x128xf32>
    %178 = arith.mulf %177, %176 : vector<8x128xf32>
    %cst_91 = arith.constant 5.000000e-01 : f32
    %179 = vector.broadcast %cst_91 : f32 to vector<8x128xf32>
    %180 = arith.addf %178, %179 : vector<8x128xf32>
    %181 = arith.mulf %170, %146 : vector<8x128xf32>
    %182 = arith.mulf %162, %172 : vector<8x128xf32>
    %183 = arith.addf %181, %182 : vector<8x128xf32>
    %184 = math.tanh %183 : vector<8x128xf32>
    %185 = arith.mulf %180, %184 : vector<8x128xf32>
    %c0_92 = arith.constant 0 : index
    %c0_93 = arith.constant 0 : index
    %186 = vector.load %arg7[%c0_92, %c0_93] : memref<8x128xf32, #tpu.memory_space<vmem>>, vector<8x128xf32>
    tpu.vector_store %arg7[%c0_92, %c0_93], %183 {strides = array<i32>} : memref<8x128xf32, #tpu.memory_space<vmem>>, vector<8x128xf32>,
    %c0_94 = arith.constant 0 : index
    %c0_95 = arith.constant 0 : index
    %187 = vector.load %arg6[%c0_94, %c0_95] : memref<8x128xf32, #tpu.memory_space<vmem>>, vector<8x128xf32>
    tpu.vector_store %arg6[%c0_94, %c0_95], %185 {strides = array<i32>} : memref<8x128xf32, #tpu.memory_space<vmem>>, vector<8x128xf32>,
    %188 = arith.index_cast %c3_i32 : i32 to index
    %c0_96 = arith.constant 0 : index
    %c0_97 = arith.constant 0 : index
    %189 = vector.load %arg5[%188, %c0_96, %c0_97] : memref<8x8x128xf32, #tpu.memory_space<vmem>>, vector<1x8x128xf32>
    %190 = vector.shape_cast %189 : vector<1x8x128xf32> to vector<8x128xf32>
    %191 = vector.shape_cast %185 : vector<8x128xf32> to vector<1x8x128xf32>
    tpu.vector_store %arg5[%188, %c0_96, %c0_97], %191 {strides = array<i32>} : memref<8x8x128xf32, #tpu.memory_space<vmem>>, vector<1x8x128xf32>,
    %c4_i32 = arith.constant 4 : i32
    %c0_98 = arith.constant 0 : index
    %c0_99 = arith.constant 0 : index
    %192 = vector.load %arg6[%c0_98, %c0_99] : memref<8x128xf32, #tpu.memory_space<vmem>>, vector<8x128xf32>
    %c0_100 = arith.constant 0 : index
    %c0_101 = arith.constant 0 : index
    %193 = vector.load %arg7[%c0_100, %c0_101] : memref<8x128xf32, #tpu.memory_space<vmem>>, vector<8x128xf32>
    %194 = arith.index_cast %c4_i32 : i32 to index
    %c0_102 = arith.constant 0 : index
    %c0_103 = arith.constant 0 : index
    %195 = vector.load %arg2[%194, %c0_102, %c0_103] : memref<8x8x512xf32, #tpu.memory_space<vmem>>, vector<1x8x512xf32>
    %196 = vector.shape_cast %195 : vector<1x8x512xf32> to vector<8x512xf32>
    %197 = vector.broadcast %3 : vector<1x512xf32> to vector<8x512xf32>
    %198 = arith.addf %196, %197 : vector<8x512xf32>
    %c0_104 = arith.constant 0 : index
    %c0_105 = arith.constant 0 : index
    %199 = vector.load %arg3[%c0_104, %c0_105] : memref<128x512xf32, #tpu.memory_space<vmem>>, vector<128x512xf32>
    %cst_106 = arith.constant dense<0.000000e+00> : vector<8x512xf32>
    %200 = tpu.matmul %192, %199, %cst_106 {dimension_numbers = #tpu.dot_dimension_numbers<[1], [0], [0], [1], [0, 0, 1, 1], [], []>} : vector<8x128xf32>, vector<128x512xf32>, vector<8x512xf32> -> vector<8x512xf32>
    %201 = arith.addf %198, %200 : vector<8x512xf32>
    %202 = vector.extract_strided_slice %201 {offsets = [0, 0], sizes = [8, 128], strides = [1, 1]} : vector<8x512xf32> to vector<8x128xf32>
    %cst_107 = arith.constant 5.000000e-01 : f32
    %203 = vector.broadcast %cst_107 : f32 to vector<8x128xf32>
    %204 = arith.mulf %203, %202 : vector<8x128xf32>
    %205 = math.tanh %204 : vector<8x128xf32>
    %cst_108 = arith.constant 5.000000e-01 : f32
    %206 = vector.broadcast %cst_108 : f32 to vector<8x128xf32>
    %207 = arith.mulf %206, %205 : vector<8x128xf32>
    %cst_109 = arith.constant 5.000000e-01 : f32
    %208 = vector.broadcast %cst_109 : f32 to vector<8x128xf32>
    %209 = arith.addf %207, %208 : vector<8x128xf32>
    %210 = vector.extract_strided_slice %201 {offsets = [0, 128], sizes = [8, 128], strides = [1, 1]} : vector<8x512xf32> to vector<8x128xf32>
    %cst_110 = arith.constant 5.000000e-01 : f32
    %211 = vector.broadcast %cst_110 : f32 to vector<8x128xf32>
    %212 = arith.mulf %211, %210 : vector<8x128xf32>
    %213 = math.tanh %212 : vector<8x128xf32>
    %cst_111 = arith.constant 5.000000e-01 : f32
    %214 = vector.broadcast %cst_111 : f32 to vector<8x128xf32>
    %215 = arith.mulf %214, %213 : vector<8x128xf32>
    %cst_112 = arith.constant 5.000000e-01 : f32
    %216 = vector.broadcast %cst_112 : f32 to vector<8x128xf32>
    %217 = arith.addf %215, %216 : vector<8x128xf32>
    %218 = vector.extract_strided_slice %201 {offsets = [0, 256], sizes = [8, 128], strides = [1, 1]} : vector<8x512xf32> to vector<8x128xf32>
    %219 = math.tanh %218 : vector<8x128xf32>
    %220 = vector.extract_strided_slice %201 {offsets = [0, 384], sizes = [8, 128], strides = [1, 1]} : vector<8x512xf32> to vector<8x128xf32>
    %cst_113 = arith.constant 5.000000e-01 : f32
    %221 = vector.broadcast %cst_113 : f32 to vector<8x128xf32>
    %222 = arith.mulf %221, %220 : vector<8x128xf32>
    %223 = math.tanh %222 : vector<8x128xf32>
    %cst_114 = arith.constant 5.000000e-01 : f32
    %224 = vector.broadcast %cst_114 : f32 to vector<8x128xf32>
    %225 = arith.mulf %224, %223 : vector<8x128xf32>
    %cst_115 = arith.constant 5.000000e-01 : f32
    %226 = vector.broadcast %cst_115 : f32 to vector<8x128xf32>
    %227 = arith.addf %225, %226 : vector<8x128xf32>
    %228 = arith.mulf %217, %193 : vector<8x128xf32>
    %229 = arith.mulf %209, %219 : vector<8x128xf32>
    %230 = arith.addf %228, %229 : vector<8x128xf32>
    %231 = math.tanh %230 : vector<8x128xf32>
    %232 = arith.mulf %227, %231 : vector<8x128xf32>
    %c0_116 = arith.constant 0 : index
    %c0_117 = arith.constant 0 : index
    %233 = vector.load %arg7[%c0_116, %c0_117] : memref<8x128xf32, #tpu.memory_space<vmem>>, vector<8x128xf32>
    tpu.vector_store %arg7[%c0_116, %c0_117], %230 {strides = array<i32>} : memref<8x128xf32, #tpu.memory_space<vmem>>, vector<8x128xf32>,
    %c0_118 = arith.constant 0 : index
    %c0_119 = arith.constant 0 : index
    %234 = vector.load %arg6[%c0_118, %c0_119] : memref<8x128xf32, #tpu.memory_space<vmem>>, vector<8x128xf32>
    tpu.vector_store %arg6[%c0_118, %c0_119], %232 {strides = array<i32>} : memref<8x128xf32, #tpu.memory_space<vmem>>, vector<8x128xf32>,
    %235 = arith.index_cast %c4_i32 : i32 to index
    %c0_120 = arith.constant 0 : index
    %c0_121 = arith.constant 0 : index
    %236 = vector.load %arg5[%235, %c0_120, %c0_121] : memref<8x8x128xf32, #tpu.memory_space<vmem>>, vector<1x8x128xf32>
    %237 = vector.shape_cast %236 : vector<1x8x128xf32> to vector<8x128xf32>
    %238 = vector.shape_cast %232 : vector<8x128xf32> to vector<1x8x128xf32>
    tpu.vector_store %arg5[%235, %c0_120, %c0_121], %238 {strides = array<i32>} : memref<8x8x128xf32, #tpu.memory_space<vmem>>, vector<1x8x128xf32>,
    %c5_i32 = arith.constant 5 : i32
    %c0_122 = arith.constant 0 : index
    %c0_123 = arith.constant 0 : index
    %239 = vector.load %arg6[%c0_122, %c0_123] : memref<8x128xf32, #tpu.memory_space<vmem>>, vector<8x128xf32>
    %c0_124 = arith.constant 0 : index
    %c0_125 = arith.constant 0 : index
    %240 = vector.load %arg7[%c0_124, %c0_125] : memref<8x128xf32, #tpu.memory_space<vmem>>, vector<8x128xf32>
    %241 = arith.index_cast %c5_i32 : i32 to index
    %c0_126 = arith.constant 0 : index
    %c0_127 = arith.constant 0 : index
    %242 = vector.load %arg2[%241, %c0_126, %c0_127] : memref<8x8x512xf32, #tpu.memory_space<vmem>>, vector<1x8x512xf32>
    %243 = vector.shape_cast %242 : vector<1x8x512xf32> to vector<8x512xf32>
    %244 = vector.broadcast %3 : vector<1x512xf32> to vector<8x512xf32>
    %245 = arith.addf %243, %244 : vector<8x512xf32>
    %c0_128 = arith.constant 0 : index
    %c0_129 = arith.constant 0 : index
    %246 = vector.load %arg3[%c0_128, %c0_129] : memref<128x512xf32, #tpu.memory_space<vmem>>, vector<128x512xf32>
    %cst_130 = arith.constant dense<0.000000e+00> : vector<8x512xf32>
    %247 = tpu.matmul %239, %246, %cst_130 {dimension_numbers = #tpu.dot_dimension_numbers<[1], [0], [0], [1], [0, 0, 1, 1], [], []>} : vector<8x128xf32>, vector<128x512xf32>, vector<8x512xf32> -> vector<8x512xf32>
    %248 = arith.addf %245, %247 : vector<8x512xf32>
    %249 = vector.extract_strided_slice %248 {offsets = [0, 0], sizes = [8, 128], strides = [1, 1]} : vector<8x512xf32> to vector<8x128xf32>
    %cst_131 = arith.constant 5.000000e-01 : f32
    %250 = vector.broadcast %cst_131 : f32 to vector<8x128xf32>
    %251 = arith.mulf %250, %249 : vector<8x128xf32>
    %252 = math.tanh %251 : vector<8x128xf32>
    %cst_132 = arith.constant 5.000000e-01 : f32
    %253 = vector.broadcast %cst_132 : f32 to vector<8x128xf32>
    %254 = arith.mulf %253, %252 : vector<8x128xf32>
    %cst_133 = arith.constant 5.000000e-01 : f32
    %255 = vector.broadcast %cst_133 : f32 to vector<8x128xf32>
    %256 = arith.addf %254, %255 : vector<8x128xf32>
    %257 = vector.extract_strided_slice %248 {offsets = [0, 128], sizes = [8, 128], strides = [1, 1]} : vector<8x512xf32> to vector<8x128xf32>
    %cst_134 = arith.constant 5.000000e-01 : f32
    %258 = vector.broadcast %cst_134 : f32 to vector<8x128xf32>
    %259 = arith.mulf %258, %257 : vector<8x128xf32>
    %260 = math.tanh %259 : vector<8x128xf32>
    %cst_135 = arith.constant 5.000000e-01 : f32
    %261 = vector.broadcast %cst_135 : f32 to vector<8x128xf32>
    %262 = arith.mulf %261, %260 : vector<8x128xf32>
    %cst_136 = arith.constant 5.000000e-01 : f32
    %263 = vector.broadcast %cst_136 : f32 to vector<8x128xf32>
    %264 = arith.addf %262, %263 : vector<8x128xf32>
    %265 = vector.extract_strided_slice %248 {offsets = [0, 256], sizes = [8, 128], strides = [1, 1]} : vector<8x512xf32> to vector<8x128xf32>
    %266 = math.tanh %265 : vector<8x128xf32>
    %267 = vector.extract_strided_slice %248 {offsets = [0, 384], sizes = [8, 128], strides = [1, 1]} : vector<8x512xf32> to vector<8x128xf32>
    %cst_137 = arith.constant 5.000000e-01 : f32
    %268 = vector.broadcast %cst_137 : f32 to vector<8x128xf32>
    %269 = arith.mulf %268, %267 : vector<8x128xf32>
    %270 = math.tanh %269 : vector<8x128xf32>
    %cst_138 = arith.constant 5.000000e-01 : f32
    %271 = vector.broadcast %cst_138 : f32 to vector<8x128xf32>
    %272 = arith.mulf %271, %270 : vector<8x128xf32>
    %cst_139 = arith.constant 5.000000e-01 : f32
    %273 = vector.broadcast %cst_139 : f32 to vector<8x128xf32>
    %274 = arith.addf %272, %273 : vector<8x128xf32>
    %275 = arith.mulf %264, %240 : vector<8x128xf32>
    %276 = arith.mulf %256, %266 : vector<8x128xf32>
    %277 = arith.addf %275, %276 : vector<8x128xf32>
    %278 = math.tanh %277 : vector<8x128xf32>
    %279 = arith.mulf %274, %278 : vector<8x128xf32>
    %c0_140 = arith.constant 0 : index
    %c0_141 = arith.constant 0 : index
    %280 = vector.load %arg7[%c0_140, %c0_141] : memref<8x128xf32, #tpu.memory_space<vmem>>, vector<8x128xf32>
    tpu.vector_store %arg7[%c0_140, %c0_141], %277 {strides = array<i32>} : memref<8x128xf32, #tpu.memory_space<vmem>>, vector<8x128xf32>,
    %c0_142 = arith.constant 0 : index
    %c0_143 = arith.constant 0 : index
    %281 = vector.load %arg6[%c0_142, %c0_143] : memref<8x128xf32, #tpu.memory_space<vmem>>, vector<8x128xf32>
    tpu.vector_store %arg6[%c0_142, %c0_143], %279 {strides = array<i32>} : memref<8x128xf32, #tpu.memory_space<vmem>>, vector<8x128xf32>,
    %282 = arith.index_cast %c5_i32 : i32 to index
    %c0_144 = arith.constant 0 : index
    %c0_145 = arith.constant 0 : index
    %283 = vector.load %arg5[%282, %c0_144, %c0_145] : memref<8x8x128xf32, #tpu.memory_space<vmem>>, vector<1x8x128xf32>
    %284 = vector.shape_cast %283 : vector<1x8x128xf32> to vector<8x128xf32>
    %285 = vector.shape_cast %279 : vector<8x128xf32> to vector<1x8x128xf32>
    tpu.vector_store %arg5[%282, %c0_144, %c0_145], %285 {strides = array<i32>} : memref<8x8x128xf32, #tpu.memory_space<vmem>>, vector<1x8x128xf32>,
    %c6_i32 = arith.constant 6 : i32
    %c0_146 = arith.constant 0 : index
    %c0_147 = arith.constant 0 : index
    %286 = vector.load %arg6[%c0_146, %c0_147] : memref<8x128xf32, #tpu.memory_space<vmem>>, vector<8x128xf32>
    %c0_148 = arith.constant 0 : index
    %c0_149 = arith.constant 0 : index
    %287 = vector.load %arg7[%c0_148, %c0_149] : memref<8x128xf32, #tpu.memory_space<vmem>>, vector<8x128xf32>
    %288 = arith.index_cast %c6_i32 : i32 to index
    %c0_150 = arith.constant 0 : index
    %c0_151 = arith.constant 0 : index
    %289 = vector.load %arg2[%288, %c0_150, %c0_151] : memref<8x8x512xf32, #tpu.memory_space<vmem>>, vector<1x8x512xf32>
    %290 = vector.shape_cast %289 : vector<1x8x512xf32> to vector<8x512xf32>
    %291 = vector.broadcast %3 : vector<1x512xf32> to vector<8x512xf32>
    %292 = arith.addf %290, %291 : vector<8x512xf32>
    %c0_152 = arith.constant 0 : index
    %c0_153 = arith.constant 0 : index
    %293 = vector.load %arg3[%c0_152, %c0_153] : memref<128x512xf32, #tpu.memory_space<vmem>>, vector<128x512xf32>
    %cst_154 = arith.constant dense<0.000000e+00> : vector<8x512xf32>
    %294 = tpu.matmul %286, %293, %cst_154 {dimension_numbers = #tpu.dot_dimension_numbers<[1], [0], [0], [1], [0, 0, 1, 1], [], []>} : vector<8x128xf32>, vector<128x512xf32>, vector<8x512xf32> -> vector<8x512xf32>
    %295 = arith.addf %292, %294 : vector<8x512xf32>
    %296 = vector.extract_strided_slice %295 {offsets = [0, 0], sizes = [8, 128], strides = [1, 1]} : vector<8x512xf32> to vector<8x128xf32>
    %cst_155 = arith.constant 5.000000e-01 : f32
    %297 = vector.broadcast %cst_155 : f32 to vector<8x128xf32>
    %298 = arith.mulf %297, %296 : vector<8x128xf32>
    %299 = math.tanh %298 : vector<8x128xf32>
    %cst_156 = arith.constant 5.000000e-01 : f32
    %300 = vector.broadcast %cst_156 : f32 to vector<8x128xf32>
    %301 = arith.mulf %300, %299 : vector<8x128xf32>
    %cst_157 = arith.constant 5.000000e-01 : f32
    %302 = vector.broadcast %cst_157 : f32 to vector<8x128xf32>
    %303 = arith.addf %301, %302 : vector<8x128xf32>
    %304 = vector.extract_strided_slice %295 {offsets = [0, 128], sizes = [8, 128], strides = [1, 1]} : vector<8x512xf32> to vector<8x128xf32>
    %cst_158 = arith.constant 5.000000e-01 : f32
    %305 = vector.broadcast %cst_158 : f32 to vector<8x128xf32>
    %306 = arith.mulf %305, %304 : vector<8x128xf32>
    %307 = math.tanh %306 : vector<8x128xf32>
    %cst_159 = arith.constant 5.000000e-01 : f32
    %308 = vector.broadcast %cst_159 : f32 to vector<8x128xf32>
    %309 = arith.mulf %308, %307 : vector<8x128xf32>
    %cst_160 = arith.constant 5.000000e-01 : f32
    %310 = vector.broadcast %cst_160 : f32 to vector<8x128xf32>
    %311 = arith.addf %309, %310 : vector<8x128xf32>
    %312 = vector.extract_strided_slice %295 {offsets = [0, 256], sizes = [8, 128], strides = [1, 1]} : vector<8x512xf32> to vector<8x128xf32>
    %313 = math.tanh %312 : vector<8x128xf32>
    %314 = vector.extract_strided_slice %295 {offsets = [0, 384], sizes = [8, 128], strides = [1, 1]} : vector<8x512xf32> to vector<8x128xf32>
    %cst_161 = arith.constant 5.000000e-01 : f32
    %315 = vector.broadcast %cst_161 : f32 to vector<8x128xf32>
    %316 = arith.mulf %315, %314 : vector<8x128xf32>
    %317 = math.tanh %316 : vector<8x128xf32>
    %cst_162 = arith.constant 5.000000e-01 : f32
    %318 = vector.broadcast %cst_162 : f32 to vector<8x128xf32>
    %319 = arith.mulf %318, %317 : vector<8x128xf32>
    %cst_163 = arith.constant 5.000000e-01 : f32
    %320 = vector.broadcast %cst_163 : f32 to vector<8x128xf32>
    %321 = arith.addf %319, %320 : vector<8x128xf32>
    %322 = arith.mulf %311, %287 : vector<8x128xf32>
    %323 = arith.mulf %303, %313 : vector<8x128xf32>
    %324 = arith.addf %322, %323 : vector<8x128xf32>
    %325 = math.tanh %324 : vector<8x128xf32>
    %326 = arith.mulf %321, %325 : vector<8x128xf32>
    %c0_164 = arith.constant 0 : index
    %c0_165 = arith.constant 0 : index
    %327 = vector.load %arg7[%c0_164, %c0_165] : memref<8x128xf32, #tpu.memory_space<vmem>>, vector<8x128xf32>
    tpu.vector_store %arg7[%c0_164, %c0_165], %324 {strides = array<i32>} : memref<8x128xf32, #tpu.memory_space<vmem>>, vector<8x128xf32>,
    %c0_166 = arith.constant 0 : index
    %c0_167 = arith.constant 0 : index
    %328 = vector.load %arg6[%c0_166, %c0_167] : memref<8x128xf32, #tpu.memory_space<vmem>>, vector<8x128xf32>
    tpu.vector_store %arg6[%c0_166, %c0_167], %326 {strides = array<i32>} : memref<8x128xf32, #tpu.memory_space<vmem>>, vector<8x128xf32>,
    %329 = arith.index_cast %c6_i32 : i32 to index
    %c0_168 = arith.constant 0 : index
    %c0_169 = arith.constant 0 : index
    %330 = vector.load %arg5[%329, %c0_168, %c0_169] : memref<8x8x128xf32, #tpu.memory_space<vmem>>, vector<1x8x128xf32>
    %331 = vector.shape_cast %330 : vector<1x8x128xf32> to vector<8x128xf32>
    %332 = vector.shape_cast %326 : vector<8x128xf32> to vector<1x8x128xf32>
    tpu.vector_store %arg5[%329, %c0_168, %c0_169], %332 {strides = array<i32>} : memref<8x8x128xf32, #tpu.memory_space<vmem>>, vector<1x8x128xf32>,
    %c7_i32 = arith.constant 7 : i32
    %c0_170 = arith.constant 0 : index
    %c0_171 = arith.constant 0 : index
    %333 = vector.load %arg6[%c0_170, %c0_171] : memref<8x128xf32, #tpu.memory_space<vmem>>, vector<8x128xf32>
    %c0_172 = arith.constant 0 : index
    %c0_173 = arith.constant 0 : index
    %334 = vector.load %arg7[%c0_172, %c0_173] : memref<8x128xf32, #tpu.memory_space<vmem>>, vector<8x128xf32>
    %335 = arith.index_cast %c7_i32 : i32 to index
    %c0_174 = arith.constant 0 : index
    %c0_175 = arith.constant 0 : index
    %336 = vector.load %arg2[%335, %c0_174, %c0_175] : memref<8x8x512xf32, #tpu.memory_space<vmem>>, vector<1x8x512xf32>
    %337 = vector.shape_cast %336 : vector<1x8x512xf32> to vector<8x512xf32>
    %338 = vector.broadcast %3 : vector<1x512xf32> to vector<8x512xf32>
    %339 = arith.addf %337, %338 : vector<8x512xf32>
    %c0_176 = arith.constant 0 : index
    %c0_177 = arith.constant 0 : index
    %340 = vector.load %arg3[%c0_176, %c0_177] : memref<128x512xf32, #tpu.memory_space<vmem>>, vector<128x512xf32>
    %cst_178 = arith.constant dense<0.000000e+00> : vector<8x512xf32>
    %341 = tpu.matmul %333, %340, %cst_178 {dimension_numbers = #tpu.dot_dimension_numbers<[1], [0], [0], [1], [0, 0, 1, 1], [], []>} : vector<8x128xf32>, vector<128x512xf32>, vector<8x512xf32> -> vector<8x512xf32>
    %342 = arith.addf %339, %341 : vector<8x512xf32>
    %343 = vector.extract_strided_slice %342 {offsets = [0, 0], sizes = [8, 128], strides = [1, 1]} : vector<8x512xf32> to vector<8x128xf32>
    %cst_179 = arith.constant 5.000000e-01 : f32
    %344 = vector.broadcast %cst_179 : f32 to vector<8x128xf32>
    %345 = arith.mulf %344, %343 : vector<8x128xf32>
    %346 = math.tanh %345 : vector<8x128xf32>
    %cst_180 = arith.constant 5.000000e-01 : f32
    %347 = vector.broadcast %cst_180 : f32 to vector<8x128xf32>
    %348 = arith.mulf %347, %346 : vector<8x128xf32>
    %cst_181 = arith.constant 5.000000e-01 : f32
    %349 = vector.broadcast %cst_181 : f32 to vector<8x128xf32>
    %350 = arith.addf %348, %349 : vector<8x128xf32>
    %351 = vector.extract_strided_slice %342 {offsets = [0, 128], sizes = [8, 128], strides = [1, 1]} : vector<8x512xf32> to vector<8x128xf32>
    %cst_182 = arith.constant 5.000000e-01 : f32
    %352 = vector.broadcast %cst_182 : f32 to vector<8x128xf32>
    %353 = arith.mulf %352, %351 : vector<8x128xf32>
    %354 = math.tanh %353 : vector<8x128xf32>
    %cst_183 = arith.constant 5.000000e-01 : f32
    %355 = vector.broadcast %cst_183 : f32 to vector<8x128xf32>
    %356 = arith.mulf %355, %354 : vector<8x128xf32>
    %cst_184 = arith.constant 5.000000e-01 : f32
    %357 = vector.broadcast %cst_184 : f32 to vector<8x128xf32>
    %358 = arith.addf %356, %357 : vector<8x128xf32>
    %359 = vector.extract_strided_slice %342 {offsets = [0, 256], sizes = [8, 128], strides = [1, 1]} : vector<8x512xf32> to vector<8x128xf32>
    %360 = math.tanh %359 : vector<8x128xf32>
    %361 = vector.extract_strided_slice %342 {offsets = [0, 384], sizes = [8, 128], strides = [1, 1]} : vector<8x512xf32> to vector<8x128xf32>
    %cst_185 = arith.constant 5.000000e-01 : f32
    %362 = vector.broadcast %cst_185 : f32 to vector<8x128xf32>
    %363 = arith.mulf %362, %361 : vector<8x128xf32>
    %364 = math.tanh %363 : vector<8x128xf32>
    %cst_186 = arith.constant 5.000000e-01 : f32
    %365 = vector.broadcast %cst_186 : f32 to vector<8x128xf32>
    %366 = arith.mulf %365, %364 : vector<8x128xf32>
    %cst_187 = arith.constant 5.000000e-01 : f32
    %367 = vector.broadcast %cst_187 : f32 to vector<8x128xf32>
    %368 = arith.addf %366, %367 : vector<8x128xf32>
    %369 = arith.mulf %358, %334 : vector<8x128xf32>
    %370 = arith.mulf %350, %360 : vector<8x128xf32>
    %371 = arith.addf %369, %370 : vector<8x128xf32>
    %372 = math.tanh %371 : vector<8x128xf32>
    %373 = arith.mulf %368, %372 : vector<8x128xf32>
    %c0_188 = arith.constant 0 : index
    %c0_189 = arith.constant 0 : index
    %374 = vector.load %arg7[%c0_188, %c0_189] : memref<8x128xf32, #tpu.memory_space<vmem>>, vector<8x128xf32>
    tpu.vector_store %arg7[%c0_188, %c0_189], %371 {strides = array<i32>} : memref<8x128xf32, #tpu.memory_space<vmem>>, vector<8x128xf32>,
    %c0_190 = arith.constant 0 : index
    %c0_191 = arith.constant 0 : index
    %375 = vector.load %arg6[%c0_190, %c0_191] : memref<8x128xf32, #tpu.memory_space<vmem>>, vector<8x128xf32>
    tpu.vector_store %arg6[%c0_190, %c0_191], %373 {strides = array<i32>} : memref<8x128xf32, #tpu.memory_space<vmem>>, vector<8x128xf32>,
    %376 = arith.index_cast %c7_i32 : i32 to index
    %c0_192 = arith.constant 0 : index
    %c0_193 = arith.constant 0 : index
    %377 = vector.load %arg5[%376, %c0_192, %c0_193] : memref<8x8x128xf32, #tpu.memory_space<vmem>>, vector<1x8x128xf32>
    %378 = vector.shape_cast %377 : vector<1x8x128xf32> to vector<8x128xf32>
    %379 = vector.shape_cast %373 : vector<8x128xf32> to vector<1x8x128xf32>
    tpu.vector_store %arg5[%376, %c0_192, %c0_193], %379 {strides = array<i32>} : memref<8x8x128xf32, #tpu.memory_space<vmem>>, vector<1x8x128xf32>,
    %c8_i32 = arith.constant 8 : i32
    return
  }
  func.func @transform_0(%arg0: i32, %arg1: i32) -> (i32, i32, i32) {
    %c0_i32 = arith.constant 0 : i32
    %c0_i32_0 = arith.constant 0 : i32
    return %arg1, %arg0, %c0_i32 : i32, i32, i32
  }
  func.func @transform_1(%arg0: i32, %arg1: i32) -> (i32, i32) {
    %c0_i32 = arith.constant 0 : i32
    %c0_i32_0 = arith.constant 0 : i32
    %c0_i32_1 = arith.constant 0 : i32
    return %c0_i32, %c0_i32_0 : i32, i32
  }
  func.func @transform_2(%arg0: i32, %arg1: i32) -> (i32, i32) {
    %c0_i32 = arith.constant 0 : i32
    %c0_i32_0 = arith.constant 0 : i32
    %c0_i32_1 = arith.constant 0 : i32
    return %c0_i32, %c0_i32_0 : i32, i32
  }
  func.func @transform_3(%arg0: i32, %arg1: i32) -> (i32, i32, i32) {
    %c0_i32 = arith.constant 0 : i32
    %c0_i32_0 = arith.constant 0 : i32
    return %arg1, %arg0, %c0_i32 : i32, i32, i32
  }
}

</mosaic_0001>

<bundles_post_ra>
// kernel: tpu_custom_call.1
= control target key start
LH: loop header
LB: loop body
LE: loop exit
PB: predicated region body
PF: predicated region fallthrough
CT: control target
= control target key end

     0   :  { %8 = vsyncpa [#allocation5], 0  ;;  %s3220_s0 = inlined_call_operand.hbm [shape: f32[8,8,512], index: 0, kind: input, shape index: {}]   ;;  %s3221_s1 = inlined_call_operand.hbm [shape: f32[128,512], index: 1, kind: input, shape index: {}]   ;;  %s3222_s2 = inlined_call_operand.vmem [shape: f32[1,512], index: 2, kind: input, shape index: {}]   ;;  %s3223_s3 = inlined_call_operand.hbm [shape: f32[8,8,128], index: 3, kind: output, shape index: {}]  }
   0x1   :  { %9 = vsyncpa [#allocation8], 0 }
   0x2   :  { %10 = vsyncpa [#allocation6], 0  ;;  %s2703_s12 = smov [#allocation4]   ;;  %s2631_s16 = scalar_lea.hbm %s3220_s0, 4096 }
   0x3   :  { %s16_s13 = sshll.u32 %s2703_s12, 4  ;;  %p2632_p0 = scmp.ne.s32.totalorder %s3220_s0, %s2631_s16  ;;  %s17_s13 = int_to_ptr.vmem [resolvable:$true] %s16_s13 }
   0x4   :  { %p2635_p1 = scmp.lt.u32.totalorder %s2631_s16, %s3220_s0 }
   0x6   :  { %p2637_p2 = pnand %p2635_p1, %p2632_p0 }
   0x8   :  { %2640 = shalt.err (!%p2637_p2)
}
   0x9   :  { %s2641_s21 = scalar_lea.vmem %s17_s13, 4096  ;;  %p2646_p4 = scmp.lt.s32.totalorder %s17_s13, %s17_s13 }
   0xa   :  { %p2642_p3 = scmp.ne.s32.totalorder %s17_s13, %s2641_s21  ;;  %p2647_p5 = scmp.lt.s32.totalorder %s2641_s21, %s2641_s21 }
   0xc   :  { %p2648_p6 = por %p2647_p5, %p2646_p4 }
   0xe   :  { %p2649_p7 = pnand %p2648_p6, %p2642_p3 }
  0x10   :  { %2652 = shalt.err (!%p2649_p7)
}
  0x11   :  { %s2704_s22 = smov 512   ;;  %s2705_s23 = smov 32  }
  0x12   :  { %22 = dma.hbm_to_vmem [thread:$0]  %s3220_s0, 4096, %s17_s13, [#allocation5], %s2704_s22, %s2704_s22, %s2705_s23  }
  0x13   :  { %s2706_s26 = smov [#allocation7]   ;;  %s2653_s30 = scalar_lea.hbm %s3221_s1, 8192 }
  0x14   :  { %s28_s27 = sshll.u32 %s2706_s26, 4  ;;  %p2654_p8 = scmp.ne.s32.totalorder %s3221_s1, %s2653_s30  ;;  %s29_s27 = int_to_ptr.vmem [resolvable:$true] %s28_s27 }
  0x15   :  { %p2657_p9 = scmp.lt.u32.totalorder %s2653_s30, %s3221_s1 }
  0x17   :  { %p2659_p10 = pnand %p2657_p9, %p2654_p8 }
  0x19   :  { %2662 = shalt.err (!%p2659_p10)
}
  0x1a   :  { %s2663_s8 = scalar_lea.vmem %s29_s27, 8192  ;;  %p2668_p12 = scmp.lt.s32.totalorder %s29_s27, %s29_s27 }
  0x1b   :  { %p2664_p11 = scmp.ne.s32.totalorder %s29_s27, %s2663_s8  ;;  %p2669_p13 = scmp.lt.s32.totalorder %s2663_s8, %s2663_s8 }
  0x1d   :  { %p2670_p0 = por %p2669_p13, %p2668_p12 }
  0x1f   :  { %p2671_p1 = pnand %p2670_p0, %p2664_p11 }
  0x21   :  { %2674 = shalt.err (!%p2671_p1)
}
  0x22   :  { %34 = dma.hbm_to_vmem [thread:$0]  %s3221_s1, 8192, %s29_s27, [#allocation8], %s2704_s22, %s2704_s22, %s2705_s23  }
  0x23   :  { %2697 = dma.done.wait [#allocation5], 4096  }
  0x24   :  { %2698 = vsyncadd [#allocation5], 4294963200 }
  0x25   :  { %2699 = dma.done.wait [#allocation8], 8192  }
  0x26   :  { %2700 = vsyncadd [#allocation8], 4294959104  ;;  %v2707_v0 = vmov 0.0   ;;  %v82_v1 = vld [vmem:[#allocation7 + $0x8] sm:$0xff]  ;;  %v81_v3 = vld [vmem:[#allocation7] sm:$0xff] }
  0x27   :  { %209 = vmatprep.mubr.f32.mxu0 %v2707_v0  ;;  %280 = vmatprep.mubr.f32.mxu1 %v2707_v0  ;;  %v86_v2 = vld [vmem:[#allocation7 + $0x28] sm:$0xff]  ;;  %v85_v5 = vld [vmem:[#allocation7 + $0x20] sm:$0xff]  ;;  %v84_v12 = vld [vmem:[#allocation7 + $0x18] sm:$0xff] }
  0x28   :  { %v2757_v4 = vpack.c.bf16 %v86_v2, %v82_v1  ;;  %v90_v6 = vld [vmem:[#allocation7 + $0x48] sm:$0xff]  ;;  %v2759_v8 = vpack.c.bf16 %v85_v5, %v81_v3  ;;  %v89_v10 = vld [vmem:[#allocation7 + $0x40] sm:$0xff]  ;;  %v88_v13 = vld [vmem:[#allocation7 + $0x38] sm:$0xff] }
  0x29   :  { %v94_v7 = vld [vmem:[#allocation7 + $0x68] sm:$0xff]  ;;  %v93_v11 = vld [vmem:[#allocation7 + $0x60] sm:$0xff]  ;;  %v83_v14 = vld [vmem:[#allocation7 + $0x10] sm:$0xff]  ;;  %v2767_v17 = vpack.c.bf16 %v88_v13, %v84_v12 }
  0x2a   :  { %v2761_v9 = vpack.c.bf16 %v94_v7, %v90_v6  ;;  %2032 = vmatprep.subr.bf16.mxu0 %v2757_v4  ;;  %v87_v15 = vld [vmem:[#allocation7 + $0x30] sm:$0xff]  ;;  %v2765_v16 = vpack.c.bf16 %v93_v11, %v89_v10  ;;  %v98_v19 = vld [vmem:[#allocation7 + $0x88] sm:$0xff]  ;;  %v97_v21 = vld [vmem:[#allocation7 + $0x80] sm:$0xff] }
  0x2b   :  { %2034 = vmatpush1.bf16.msra.mxu0 %v2759_v8  ;;  %v2769_v18 = vpack.c.bf16 %v87_v15, %v83_v14  ;;  %v102_v20 = vld [vmem:[#allocation7 + $0xa8] sm:$0xff]  ;;  %v101_v23 = vld [vmem:[#allocation7 + $0xa0] sm:$0xff]  ;;  %v92_v24 = vld [vmem:[#allocation7 + $0x58] sm:$0xff]  ;;  %2064 = vmatprep.subr.bf16.mxu1 %v2767_v17 }
  0x2c   :  { %2036 = vmatprep.subr.bf16.mxu0 %v2761_v9  ;;  %v2772_v22 = vpack.c.bf16 %v102_v20, %v98_v19  ;;  %v96_v25 = vld [vmem:[#allocation7 + $0x78] sm:$0xff]  ;;  %v91_v27 = vld [vmem:[#allocation7 + $0x50] sm:$0xff]  ;;  %v106_v29 = vld [vmem:[#allocation7 + $0xc8] sm:$0xff]  ;;  %v2781_v32 = vpack.c.bf16 %v101_v23, %v97_v21 }
  0x2d   :  { %v2775_v26 = vpack.c.bf16 %v96_v25, %v92_v24  ;;  %v95_v28 = vld [vmem:[#allocation7 + $0x70] sm:$0xff]  ;;  %2066 = vmatpush1.bf16.msra.mxu1 %v2769_v18  ;;  %v110_v31 = vld [vmem:[#allocation7 + $0xe8] sm:$0xff]  ;;  %v100_v33 = vld [vmem:[#allocation7 + $0x98] sm:$0xff] }
  0x2e   :  { %v2778_v30 = vpack.c.bf16 %v95_v28, %v91_v27  ;;  %v104_v34 = vld [vmem:[#allocation7 + $0xb8] sm:$0xff]  ;;  %v99_v35 = vld [vmem:[#allocation7 + $0x90] sm:$0xff]  ;;  %v2785_v36 = vpack.c.bf16 %v110_v31, %v106_v29  ;;  %v105_v37 = vld [vmem:[#allocation7 + $0xc0] sm:$0xff] }
  0x2f   :  { %2038 = vmatpush1.bf16.msra.mxu0 %v2765_v16  ;;  %2068 = vmatprep.subr.bf16.mxu1 %v2775_v26  ;;  %v109_v38 = vld [vmem:[#allocation7 + $0xe0] sm:$0xff]  ;;  %v2787_v39 = vpack.c.bf16 %v104_v34, %v100_v33  ;;  %v103_v40 = vld [vmem:[#allocation7 + $0xb0] sm:$0xff]  ;;  %v114_v41 = vld [vmem:[#allocation7 + $0x108] sm:$0xff] }
  0x30   :  { %2040 = vmatprep.subr.bf16.mxu0 %v2772_v22  ;;  %v118_v42 = vld [vmem:[#allocation7 + $0x128] sm:$0xff]  ;;  %v108_v43 = vld [vmem:[#allocation7 + $0xd8] sm:$0xff]  ;;  %v2790_v44 = vpack.c.bf16 %v103_v40, %v99_v35  ;;  %v2793_v46 = vpack.c.bf16 %v109_v38, %v105_v37  ;;  %v113_v47 = vld [vmem:[#allocation7 + $0x100] sm:$0xff] }
  0x31   :  { %2070 = vmatpush1.bf16.msra.mxu1 %v2778_v30  ;;  %v112_v45 = vld [vmem:[#allocation7 + $0xf8] sm:$0xff]  ;;  %v107_v49 = vld [vmem:[#allocation7 + $0xd0] sm:$0xff]  ;;  %v2799_v51 = vpack.c.bf16 %v118_v42, %v114_v41  ;;  %v117_v52 = vld [vmem:[#allocation7 + $0x120] sm:$0xff] }
  0x32   :  { %2072 = vmatprep.subr.bf16.mxu1 %v2787_v39  ;;  %v2796_v48 = vpack.c.bf16 %v112_v45, %v108_v43  ;;  %v111_v50 = vld [vmem:[#allocation7 + $0xf0] sm:$0xff]  ;;  %v116_v53 = vld [vmem:[#allocation7 + $0x118] sm:$0xff]  ;;  %v122_v55 = vld [vmem:[#allocation7 + $0x148] sm:$0xff]  ;;  %v2805_v58 = vpack.c.bf16 %v117_v52, %v113_v47 }
  0x33   :  { %2042 = vmatpush1.bf16.msra.mxu0 %v2781_v32  ;;  %v120_v54 = vld [vmem:[#allocation7 + $0x138] sm:$0xff]  ;;  %v126_v56 = vld [vmem:[#allocation7 + $0x168] sm:$0xff]  ;;  %v2802_v57 = vpack.c.bf16 %v111_v50, %v107_v49  ;;  %v121_v59 = vld [vmem:[#allocation7 + $0x140] sm:$0xff]  ;;  %v57_v49 = vlaneseq }
  0x34   :  { %2044 = vmatprep.subr.bf16.mxu0 %v2785_v36  ;;  %v2808_v60 = vpack.c.bf16 %v120_v54, %v116_v53  ;;  %v115_v61 = vld [vmem:[#allocation7 + $0x110] sm:$0xff]  ;;  %v2811_v63 = vpack.c.bf16 %v126_v56, %v122_v55  ;;  %v125_v1 = vld [vmem:[#allocation7 + $0x160] sm:$0xff]  ;;  %v124_v2 = vld [vmem:[#allocation7 + $0x158] sm:$0xff] }
  0x35   :  { %2074 = vmatpush1.bf16.msra.mxu1 %v2790_v44  ;;  %v119_v62 = vld [vmem:[#allocation7 + $0x130] sm:$0xff]  ;;  %v128_v3 = vld [vmem:[#allocation7 + $0x178] sm:$0xff]  ;;  %v130_v5 = vld [vmem:[#allocation7 + $0x188] sm:$0xff]  ;;  %v2817_v10 = vpack.c.bf16 %v125_v1, %v121_v59  ;;  %v58_v50 = vshrl.u32 %v57_v49, 7 }
  0x36   :  { %2076 = vmatprep.subr.bf16.mxu1 %v2796_v48  ;;  %v134_v6 = vld [vmem:[#allocation7 + $0x1a8] sm:$0xff]  ;;  %v2814_v7 = vpack.c.bf16 %v119_v62, %v115_v61  ;;  %v129_v11 = vld [vmem:[#allocation7 + $0x180] sm:$0xff]  ;;  %v2820_v12 = vpack.c.bf16 %v128_v3, %v124_v2  ;;  %v123_v13 = vld [vmem:[#allocation7 + $0x150] sm:$0xff] }
  0x37   :  { %2046 = vmatpush1.bf16.msra.mxu0 %v2793_v46  ;;  %v127_v14 = vld [vmem:[#allocation7 + $0x170] sm:$0xff]  ;;  %v2823_v15 = vpack.c.bf16 %v134_v6, %v130_v5  ;;  %v133_v19 = vld [vmem:[#allocation7 + $0x1a0] sm:$0xff]  ;;  %v132_v20 = vld [vmem:[#allocation7 + $0x198] sm:$0xff]  ;;  %v59_v52 = vsub.s32 0, %v58_v50  ;;  %v63_v54 = vsub.s32 1, %v58_v50  ;;  %v67_v55 = vsub.s32 2, %v58_v50 }
  0x38   :  { %2048 = vmatprep.subr.bf16.mxu0 %v2799_v51  ;;  %v136_v21 = vld [vmem:[#allocation7 + $0x1b8] sm:$0xff]  ;;  %v138_v23 = vld [vmem:[#allocation7 + $0x1c8] sm:$0xff]  ;;  %v2826_v25 = vpack.c.bf16 %v127_v14, %v123_v13  ;;  %v2829_v27 = vpack.c.bf16 %v133_v19, %v129_v11  ;;  %v137_v28 = vld [vmem:[#allocation7 + $0x1c0] sm:$0xff]  ;;  %v71_v3 = vsub.s32 3, %v58_v50 }
  0x39   :  { %2078 = vmatpush1.bf16.msra.mxu1 %v2802_v57  ;;  %v142_v24 = vld [vmem:[#allocation7 + $0x1e8] sm:$0xff]  ;;  %v2832_v29 = vpack.c.bf16 %v136_v21, %v132_v20  ;;  %v131_v31 = vld [vmem:[#allocation7 + $0x190] sm:$0xff]  ;;  %v141_v35 = vld [vmem:[#allocation7 + $0x1e0] sm:$0xff] }
  0x3a   :  { %2080 = vmatprep.subr.bf16.mxu1 %v2808_v60  ;;  %v135_v33 = vld [vmem:[#allocation7 + $0x1b0] sm:$0xff]  ;;  %v2835_v34 = vpack.c.bf16 %v142_v24, %v138_v23  ;;  %v140_v37 = vld [vmem:[#allocation7 + $0x1d8] sm:$0xff]  ;;  %v2841_v41 = vpack.c.bf16 %v141_v35, %v137_v28  ;;  %v49_v53 = vld [vmem:[%s3222_s2] sm:$0xf]  ;;  %s2708_s2 = smov [#allocation9]  }
  0x3b   :  { %2050 = vmatpush1.bf16.msra.mxu0 %v2805_v58  ;;  %v144_v38 = vld [vmem:[#allocation7 + $0x1f8] sm:$0xff]  ;;  %v2838_v40 = vpack.c.bf16 %v135_v33, %v131_v31  ;;  %v139_v43 = vld [vmem:[#allocation7 + $0x1d0] sm:$0xff]  ;;  %v2894_v56 = vrot.slane %v49_v53, %v59_v52  ;;  %v52_v59 = vld [vmem:[#allocation4] sm:$0xff]  ;;  %v2896_v61 = vrot.slane %v49_v53, %v63_v54  ;;  %v2903_v19 = vrot.slane %v49_v53, %v71_v3  ;;  %s2018_s11 = sshll.u32 %s2708_s2, 4  ;;  %s2019_s11 = int_to_ptr.vmem [resolvable:$true] %s2018_s11 }
  0x3c   :  { %2052 = vmatprep.subr.bf16.mxu0 %v2811_v63  ;;  %v2844_v42 = vpack.c.bf16 %v144_v38, %v140_v37  ;;  %v143_v45 = vld [vmem:[#allocation7 + $0x1f0] sm:$0xff]  ;;  %v53_v62 = vld [vmem:[#allocation4 + $0x8] sm:$0xff]  ;;  %v55_v21 = vld [vmem:[#allocation4 + $0x18] sm:$0xff]  ;;  %s2675_s12 = scalar_lea.vmem %s2019_s11, 1024  ;;  %p2680_p3 = scmp.lt.s32.totalorder %s2019_s11, %s2019_s11 }
  0x3d   :  { %2082 = vmatpush1.bf16.msra.mxu1 %v2814_v7  ;;  %v2848_v47 = vpack.c.bf16 %v143_v45, %v139_v43  ;;  %v77_v1 = vadd.f32 %v2894_v56, %v52_v59  ;;  %v54_v2 = vld [vmem:[#allocation4 + $0x10] sm:$0xff]  ;;  %v78_v5 = vadd.f32 %v2896_v61, %v53_v62  ;;  %v80_v35 = vadd.f32 %v2903_v19, %v55_v21  ;;  %p2676_p2 = scmp.ne.s32.totalorder %s2019_s11, %s2675_s12  ;;  %p2681_p4 = scmp.lt.s32.totalorder %s2675_s12, %s2675_s12 }
  0x3e   :  { %2084 = vmatprep.subr.bf16.mxu1 %v2820_v12 }
  0x3f   :  { %2054 = vmatpush1.bf16.msra.mxu0 %v2817_v10  ;;  %p2682_p5 = por %p2681_p4, %p2680_p3 }
  0x40   :  { %2056 = vmatprep.subr.bf16.mxu0 %v2823_v15 }
  0x41   :  { %2086 = vmatpush1.bf16.msra.mxu1 %v2826_v25  ;;  %p2683_p6 = pnand %p2682_p5, %p2676_p2 }
  0x42   :  { %2088 = vmatprep.subr.bf16.mxu1 %v2832_v29 }
  0x43   :  { %2058 = vmatpush1.bf16.msra.mxu0 %v2829_v27 }
  0x44   :  { %2060 = vmatprep.subr.bf16.mxu0 %v2835_v34 }
  0x45   :  { %2090 = vmatpush1.bf16.msra.mxu1 %v2838_v40 }
  0x46   :  { %2092 = vmatprep.subr.bf16.mxu1 %v2844_v42 }
  0x47   :  { %2062 = vmatpush1.bf16.msra.mxu0 %v2841_v41 }
  0x48   :  { %2096 = vmatprep.subr.bf16.mxu0 %v2757_v4 }
  0x49   :  { %2094 = vmatpush1.bf16.msra.mxu1 %v2848_v47 }
  0x4a   :  { %210 = vmatmul.mubr.f32.vlgmr.msra.gmra.mrb[0].mxu0 %v2707_v0  ;;  %2128 = vmatprep.subr.bf16.mxu1 %v2767_v17 }
  0x4b   :  { %2098 = vmatpush1.bf16.msra.mxu0 %v2759_v8  ;;  %451 = vmatprep.mubr.f32.mxu0 %v2707_v0 }
  0x4c   :  { %2100 = vmatprep.subr.bf16.mxu0 %v2761_v9  ;;  %281 = vmatmul.mubr.f32.vlgmr.msra.gmra.mrb[0].mxu1 %v2707_v0 }
  0x4d   :  { %2130 = vmatpush1.bf16.msra.mxu1 %v2769_v18  ;;  %522 = vmatprep.mubr.f32.mxu1 %v2707_v0 }
  0x4e   :  { %2132 = vmatprep.subr.bf16.mxu1 %v2775_v26 }
  0x4f   :  { %2102 = vmatpush1.bf16.msra.mxu0 %v2765_v16 }
  0x50   :  { %2104 = vmatprep.subr.bf16.mxu0 %v2772_v22 }
  0x51   :  { %2134 = vmatpush1.bf16.msra.mxu1 %v2778_v30 }
  0x52   :  { %2136 = vmatprep.subr.bf16.mxu1 %v2787_v39 }
  0x53   :  { %2106 = vmatpush1.bf16.msra.mxu0 %v2781_v32 }
  0x54   :  { %2108 = vmatprep.subr.bf16.mxu0 %v2785_v36 }
  0x55   :  { %2138 = vmatpush1.bf16.msra.mxu1 %v2790_v44 }
  0x56   :  { %2140 = vmatprep.subr.bf16.mxu1 %v2796_v48 }
  0x57   :  { %2110 = vmatpush1.bf16.msra.mxu0 %v2793_v46 }
  0x58   :  { %2112 = vmatprep.subr.bf16.mxu0 %v2799_v51 }
  0x59   :  { %2142 = vmatpush1.bf16.msra.mxu1 %v2802_v57 }
  0x5a   :  { %2144 = vmatprep.subr.bf16.mxu1 %v2808_v60 }
  0x5b   :  { %2114 = vmatpush1.bf16.msra.mxu0 %v2805_v58 }
  0x5c   :  { %2116 = vmatprep.subr.bf16.mxu0 %v2811_v63 }
  0x5d   :  { %2146 = vmatpush1.bf16.msra.mxu1 %v2814_v7 }
  0x5e   :  { %2148 = vmatprep.subr.bf16.mxu1 %v2820_v12 }
  0x5f   :  { %2118 = vmatpush1.bf16.msra.mxu0 %v2817_v10 }
  0x60   :  { %2120 = vmatprep.subr.bf16.mxu0 %v2823_v15 }
  0x61   :  { %2150 = vmatpush1.bf16.msra.mxu1 %v2826_v25 }
  0x62   :  { %2152 = vmatprep.subr.bf16.mxu1 %v2832_v29 }
  0x63   :  { %2122 = vmatpush1.bf16.msra.mxu0 %v2829_v27 }
  0x64   :  { %2124 = vmatprep.subr.bf16.mxu0 %v2835_v34 }
  0x65   :  { %2154 = vmatpush1.bf16.msra.mxu1 %v2838_v40 }
  0x66   :  { %2156 = vmatprep.subr.bf16.mxu1 %v2844_v42 }
  0x67   :  { %2126 = vmatpush1.bf16.msra.mxu0 %v2841_v41 }
  0x68   :  { %2160 = vmatprep.subr.bf16.mxu0 %v2757_v4  ;;  %v2898_v4 = vrot.slane %v49_v53, %v67_v55 }
  0x69   :  { %2158 = vmatpush1.bf16.msra.mxu1 %v2848_v47 }
  0x6a   :  { %2192 = vmatprep.subr.bf16.mxu1 %v2767_v17  ;;  %v79_v11 = vadd.f32 %v2898_v4, %v54_v2 }
 0x11d   :  { %v211_v6 = vpop.f32.mrb[0].mxu0 }
 0x11e   :  { %v287_v13 = vadd.f32 %v211_v6, %v77_v1  ;;  %v213_v14 = vpop.f32.mrb[1].mxu0 }
 0x11f   :  { %v288_v20 = vadd.f32 %v213_v14, %v78_v5  ;;  %v282_v24 = vpop.f32.mrb[0].mxu1 }
 0x120   :  { %v291_v23 = vmul.f32 0.5, %v287_v13  ;;  %v289_v31 = vadd.f32 %v282_v24, %v79_v11  ;;  %v284_v33 = vpop.f32.mrb[1].mxu1 }
 0x121   :  { %v295_v28 = vmul.f32 0.5, %v288_v20  ;;  %v290_v37 = vadd.f32 %v284_v33, %v80_v35 }
 0x122   :  { %2551 = vtanh.f32 %v291_v23 }
 0x123   :  { %2553 = vtanh.f32 %v295_v28  ;;  %v300_v38 = vmul.f32 0.5, %v290_v37 }
 0x124   :  { %2555 = vtanh.f32 %v289_v31 }
 0x125   :  { %2557 = vtanh.f32 %v300_v38 }
 0x12c   :  { %v2552_v43 = vpop.eup %2551 }
 0x12d   :  { %v2554_v45 = vpop.eup %2553  ;;  %v293_v49 = vmul.f32 0.5, %v2552_v43 }
 0x12e   :  { %v2556_v50 = vpop.eup %2555  ;;  %v297_v52 = vmul.f32 0.5, %v2554_v45 }
 0x12f   :  { %v294_v53 = vadd.f32 0.5, %v293_v49  ;;  %v2558_v1 = vpop.eup %2557 }
 0x130   :  { %v298_v54 = vadd.f32 0.5, %v297_v52  ;;  %v302_v2 = vmul.f32 0.5, %v2558_v1 }
 0x131   :  { %v305_v55 = vmul.f32 %v2556_v50, %v294_v53  ;;  %v825_v53 = vld [vmem:[#allocation7 + $0x80] sm:$0xff] }
 0x132   :  { %v304_v59 = vmul.f32 0.0, %v298_v54  ;;  %v303_v3 = vadd.f32 0.5, %v302_v2  ;;  %v829_v54 = vld [vmem:[#allocation7 + $0xa0] sm:$0xff] }
 0x133   :  { %v833_v2 = vld [vmem:[#allocation7 + $0xc0] sm:$0xff] }
 0x134   :  { %v2906_v62 = vadd.f32 %v305_v55, %v304_v59  ;;  %v2981_v55 = vpack.c.bf16 %v829_v54, %v825_v53  ;;  %v834_v59 = vld [vmem:[#allocation7 + $0xc8] sm:$0xff] }
 0x136   :  { %2559 = vtanh.f32 %v2906_v62 }
 0x140   :  { %v2560_v5 = vpop.eup %2559 }
 0x141   :  { %v308_v6 = vmul.f32 %v2560_v5, %v303_v3  ;;  %v837_v3 = vld [vmem:[#allocation7 + $0xe0] sm:$0xff] }
 0x142   :  { %v2987_v5 = vpack.c.bf16 %v837_v3, %v833_v2 }
 0x143   :  { %311 = vst [vmem:[#allocation9] sm:$0xff] %v308_v6  ;;  %452 = vmatmul.mubr.f32.vlgmr.msra.gmra.mrb[2].mxu0 %v308_v6  ;;  %523 = vmatmul.mubr.f32.vlgmr.msra.gmra.mrb[2].mxu1 %v308_v6  ;;  %v842_v6 = vld [vmem:[#allocation7 + $0x108] sm:$0xff] }
 0x144   :  { %2162 = vmatpush1.bf16.msra.mxu0 %v2759_v8  ;;  %2194 = vmatpush1.bf16.msra.mxu1 %v2769_v18  ;;  %v315_v8 = vld [vmem:[#allocation4 + $0x20] sm:$0xff] }
 0x145   :  { %2164 = vmatprep.subr.bf16.mxu0 %v2761_v9  ;;  %2196 = vmatprep.subr.bf16.mxu1 %v2775_v26  ;;  %v316_v9 = vld [vmem:[#allocation4 + $0x28] sm:$0xff] }
 0x146   :  { %694 = vmatprep.mubr.f32.mxu0 %v2707_v0  ;;  %765 = vmatprep.mubr.f32.mxu1 %v2707_v0 }
 0x148   :  { %2166 = vmatpush1.bf16.msra.mxu0 %v2765_v16  ;;  %2198 = vmatpush1.bf16.msra.mxu1 %v2778_v30  ;;  %v319_v16 = vadd.f32 %v315_v8, %v2894_v56  ;;  %v846_v8 = vld [vmem:[#allocation7 + $0x128] sm:$0xff] }
 0x149   :  { %2168 = vmatprep.subr.bf16.mxu0 %v2772_v22  ;;  %2200 = vmatprep.subr.bf16.mxu1 %v2787_v39  ;;  %v317_v22 = vld [vmem:[#allocation4 + $0x30] sm:$0xff] }
 0x14c   :  { %2170 = vmatpush1.bf16.msra.mxu0 %v2781_v32  ;;  %2202 = vmatpush1.bf16.msra.mxu1 %v2790_v44  ;;  %v320_v32 = vadd.f32 %v316_v9, %v2896_v61  ;;  %v2991_v9 = vpack.c.bf16 %v846_v8, %v842_v6 }
 0x14d   :  { %2172 = vmatprep.subr.bf16.mxu0 %v2785_v36  ;;  %2204 = vmatprep.subr.bf16.mxu1 %v2796_v48 }
 0x150   :  { %2174 = vmatpush1.bf16.msra.mxu0 %v2793_v46  ;;  %2206 = vmatpush1.bf16.msra.mxu1 %v2802_v57 }
 0x151   :  { %2176 = vmatprep.subr.bf16.mxu0 %v2799_v51  ;;  %2208 = vmatprep.subr.bf16.mxu1 %v2808_v60 }
 0x154   :  { %2178 = vmatpush1.bf16.msra.mxu0 %v2805_v58  ;;  %2210 = vmatpush1.bf16.msra.mxu1 %v2814_v7  ;;  %v321_v58 = vadd.f32 %v317_v22, %v2898_v4  ;;  %v845_v22 = vld [vmem:[#allocation7 + $0x120] sm:$0xff] }
 0x155   :  { %2180 = vmatprep.subr.bf16.mxu0 %v2811_v63  ;;  %2212 = vmatprep.subr.bf16.mxu1 %v2820_v12 }
 0x158   :  { %2182 = vmatpush1.bf16.msra.mxu0 %v2817_v10  ;;  %2214 = vmatpush1.bf16.msra.mxu1 %v2826_v25 }
 0x159   :  { %2184 = vmatprep.subr.bf16.mxu0 %v2823_v15  ;;  %2216 = vmatprep.subr.bf16.mxu1 %v2832_v29 }
 0x15c   :  { %2186 = vmatpush1.bf16.msra.mxu0 %v2829_v27  ;;  %2218 = vmatpush1.bf16.msra.mxu1 %v2838_v40  ;;  %v318_v27 = vld [vmem:[#allocation4 + $0x38] sm:$0xff] }
 0x15d   :  { %2188 = vmatprep.subr.bf16.mxu0 %v2835_v34  ;;  %2220 = vmatprep.subr.bf16.mxu1 %v2844_v42  ;;  %v322_v11 = vadd.f32 %v318_v27, %v2903_v19  ;;  %v862_v27 = vld [vmem:[#allocation7 + $0x1a8] sm:$0xff] }
 0x160   :  { %2190 = vmatpush1.bf16.msra.mxu0 %v2841_v41  ;;  %2222 = vmatpush1.bf16.msra.mxu1 %v2848_v47 }
 0x161   :  { %2256 = vmatprep.subr.bf16.mxu1 %v2767_v17 }
 0x216   :  { %v453_v36 = vpop.f32.mrb[2].mxu0  ;;  %v524_v46 = vpop.f32.mrb[2].mxu1 }
 0x217   :  { %v529_v51 = vadd.f32 %v453_v36, %v319_v16  ;;  %v455_v63 = vpop.f32.mrb[3].mxu0  ;;  %v526_v10 = vpop.f32.mrb[3].mxu1  ;;  %v531_v17 = vadd.f32 %v524_v46, %v321_v58  ;;  %v841_v16 = vld [vmem:[#allocation7 + $0x100] sm:$0xff]  ;;  %v850_v36 = vld [vmem:[#allocation7 + $0x148] sm:$0xff] }
 0x218   :  { %v530_v15 = vadd.f32 %v455_v63, %v320_v32  ;;  %v532_v13 = vadd.f32 %v526_v10, %v322_v11  ;;  %v2993_v32 = vpack.c.bf16 %v845_v22, %v841_v16  ;;  %v854_v46 = vld [vmem:[#allocation7 + $0x168] sm:$0xff]  ;;  %v849_v58 = vld [vmem:[#allocation7 + $0x140] sm:$0xff] }
 0x219   :  { %v533_v34 = vmul.f32 0.5, %v529_v51  ;;  %v2997_v51 = vpack.c.bf16 %v854_v46, %v850_v36  ;;  %v853_v63 = vld [vmem:[#allocation7 + $0x160] sm:$0xff] }
 0x21a   :  { %v537_v41 = vmul.f32 0.5, %v530_v15  ;;  %v542_v14 = vmul.f32 0.5, %v532_v13  ;;  %v2999_v10 = vpack.c.bf16 %v853_v63, %v849_v58  ;;  %v858_v15 = vld [vmem:[#allocation7 + $0x188] sm:$0xff] }
 0x21b   :  { %2561 = vtanh.f32 %v533_v34  ;;  %v3003_v34 = vpack.c.bf16 %v862_v27, %v858_v15  ;;  %v866_v13 = vld [vmem:[#allocation7 + $0x1c8] sm:$0xff]  ;;  %v1059_v15 = vld [vmem:[#allocation7 + $0x38] sm:$0xff] }
 0x21c   :  { %2563 = vtanh.f32 %v537_v41  ;;  %v857_v41 = vld [vmem:[#allocation7 + $0x180] sm:$0xff] }
 0x21d   :  { %2565 = vtanh.f32 %v531_v17  ;;  %v861_v17 = vld [vmem:[#allocation7 + $0x1a0] sm:$0xff] }
 0x21e   :  { %2567 = vtanh.f32 %v542_v14  ;;  %v3005_v11 = vpack.c.bf16 %v861_v17, %v857_v41  ;;  %v870_v14 = vld [vmem:[#allocation7 + $0x1e8] sm:$0xff]  ;;  %v1054_v41 = vld [vmem:[#allocation7 + $0x10] sm:$0xff] }
 0x21f   :  { %v1058_v17 = vld [vmem:[#allocation7 + $0x30] sm:$0xff] }
 0x225   :  { %v2562_v20 = vpop.eup %2561 }
 0x226   :  { %v2564_v21 = vpop.eup %2563  ;;  %v535_v23 = vmul.f32 0.5, %v2562_v20  ;;  %v3009_v20 = vpack.c.bf16 %v870_v14, %v866_v13  ;;  %v3044_v13 = vpack.c.bf16 %v1058_v17, %v1054_v41  ;;  %v1063_v14 = vld [vmem:[#allocation7 + $0x58] sm:$0xff]  ;;  %v1110_v17 = vld [vmem:[#allocation7 + $0x1d0] sm:$0xff] }
 0x227   :  { %v539_v24 = vmul.f32 0.5, %v2564_v21  ;;  %v2566_v31 = vpop.eup %2565  ;;  %v865_v21 = vld [vmem:[#allocation7 + $0x1c0] sm:$0xff] }
 0x228   :  { %v536_v28 = vadd.f32 0.5, %v535_v23  ;;  %v2568_v43 = vpop.eup %2567  ;;  %v869_v23 = vld [vmem:[#allocation7 + $0x1e0] sm:$0xff] }
 0x229   :  { %v540_v33 = vadd.f32 0.5, %v539_v24  ;;  %v544_v45 = vmul.f32 0.5, %v2568_v43  ;;  %v3011_v24 = vpack.c.bf16 %v869_v23, %v865_v21  ;;  %v1067_v21 = vld [vmem:[#allocation7 + $0x78] sm:$0xff] }
 0x22a   :  { %v547_v35 = vmul.f32 %v2566_v31, %v536_v28  ;;  %v558_v28 = vld [vmem:[#allocation4 + $0x40] sm:$0xff]  ;;  %v559_v31 = vld [vmem:[#allocation4 + $0x48] sm:$0xff]  ;;  %v3048_v23 = vpack.c.bf16 %v1067_v21, %v1063_v14  ;;  %v1114_v14 = vld [vmem:[#allocation7 + $0x1f0] sm:$0xff] }
 0x22b   :  { %v546_v37 = vmul.f32 %v540_v33, %v2906_v62  ;;  %v545_v49 = vadd.f32 0.5, %v544_v45  ;;  %v838_v62 = vld [vmem:[#allocation7 + $0xe8] sm:$0xff]  ;;  %v562_v33 = vadd.f32 %v558_v28, %v2894_v56  ;;  %v1062_v28 = vld [vmem:[#allocation7 + $0x50] sm:$0xff]  ;;  %v3086_v21 = vpack.c.bf16 %v1114_v14, %v1110_v17 }
 0x22c   :  { %v2985_v1 = vpack.c.bf16 %v838_v62, %v834_v59 }
 0x22d   :  { %v2947_v38 = vadd.f32 %v547_v35, %v546_v37  ;;  %v560_v35 = vld [vmem:[#allocation4 + $0x50] sm:$0xff]  ;;  %v563_v37 = vadd.f32 %v559_v31, %v2896_v61 }
 0x22e   :  { %v1066_v31 = vld [vmem:[#allocation7 + $0x70] sm:$0xff] }
 0x22f   :  { %2569 = vtanh.f32 %v2947_v38 }
 0x239   :  { %v2570_v50 = vpop.eup %2569 }
 0x23a   :  { %v550_v52 = vmul.f32 %v2570_v50, %v545_v49  ;;  %v564_v50 = vadd.f32 %v560_v35, %v2898_v4  ;;  %v1071_v35 = vld [vmem:[#allocation7 + $0x98] sm:$0xff] }
 0x23c   :  { %554 = vst [vmem:[#allocation9 + $0x8] sm:$0xff] %v550_v52  ;;  %695 = vmatmul.mubr.f32.vlgmr.msra.gmra.mrb[4].mxu0 %v550_v52  ;;  %766 = vmatmul.mubr.f32.vlgmr.msra.gmra.mrb[4].mxu1 %v550_v52 }
 0x23d   :  { %2258 = vmatpush1.bf16.msra.mxu1 %v2769_v18  ;;  %937 = vmatprep.mubr.f32.mxu0 %v2707_v0  ;;  %v810_v18 = vld [vmem:[#allocation7 + $0x8] sm:$0xff] }
 0x23e   :  { %2260 = vmatprep.subr.bf16.mxu1 %v2775_v26  ;;  %1008 = vmatprep.mubr.f32.mxu1 %v2707_v0  ;;  %v814_v26 = vld [vmem:[#allocation7 + $0x28] sm:$0xff] }
 0x241   :  { %2262 = vmatpush1.bf16.msra.mxu1 %v2778_v30  ;;  %v2967_v30 = vpack.c.bf16 %v814_v26, %v810_v18 }
 0x242   :  { %2264 = vmatprep.subr.bf16.mxu1 %v2787_v39  ;;  %v809_v39 = vld [vmem:[#allocation7] sm:$0xff] }
 0x243   :  { %2224 = vmatprep.subr.bf16.mxu0 %v2967_v30 }
 0x245   :  { %2266 = vmatpush1.bf16.msra.mxu1 %v2790_v44  ;;  %v813_v44 = vld [vmem:[#allocation7 + $0x20] sm:$0xff] }
 0x246   :  { %2268 = vmatprep.subr.bf16.mxu1 %v2796_v48  ;;  %v2969_v48 = vpack.c.bf16 %v813_v44, %v809_v39  ;;  %v561_v39 = vld [vmem:[#allocation4 + $0x58] sm:$0xff] }
 0x248   :  { %2226 = vmatpush1.bf16.msra.mxu0 %v2969_v48 }
 0x249   :  { %2270 = vmatpush1.bf16.msra.mxu1 %v2802_v57  ;;  %v818_v57 = vld [vmem:[#allocation7 + $0x48] sm:$0xff] }
 0x24a   :  { %2272 = vmatprep.subr.bf16.mxu1 %v2808_v60  ;;  %v822_v60 = vld [vmem:[#allocation7 + $0x68] sm:$0xff] }
 0x24d   :  { %2274 = vmatpush1.bf16.msra.mxu1 %v2814_v7  ;;  %v2973_v7 = vpack.c.bf16 %v822_v60, %v818_v57 }
 0x24e   :  { %2276 = vmatprep.subr.bf16.mxu1 %v2820_v12  ;;  %v817_v12 = vld [vmem:[#allocation7 + $0x40] sm:$0xff] }
 0x24f   :  { %2228 = vmatprep.subr.bf16.mxu0 %v2973_v7 }
 0x251   :  { %2278 = vmatpush1.bf16.msra.mxu1 %v2826_v25  ;;  %v821_v25 = vld [vmem:[#allocation7 + $0x60] sm:$0xff] }
 0x252   :  { %2280 = vmatprep.subr.bf16.mxu1 %v2832_v29  ;;  %v2975_v29 = vpack.c.bf16 %v821_v25, %v817_v12  ;;  %v565_v12 = vadd.f32 %v561_v39, %v2903_v19  ;;  %v1078_v39 = vld [vmem:[#allocation7 + $0xd0] sm:$0xff] }
 0x254   :  { %2230 = vmatpush1.bf16.msra.mxu0 %v2975_v29 }
 0x255   :  { %2282 = vmatpush1.bf16.msra.mxu1 %v2838_v40  ;;  %v826_v40 = vld [vmem:[#allocation7 + $0x88] sm:$0xff] }
 0x256   :  { %2284 = vmatprep.subr.bf16.mxu1 %v2844_v42  ;;  %v830_v42 = vld [vmem:[#allocation7 + $0xa8] sm:$0xff] }
 0x259   :  { %2286 = vmatpush1.bf16.msra.mxu1 %v2848_v47  ;;  %v2979_v47 = vpack.c.bf16 %v830_v42, %v826_v40 }
 0x25b   :  { %2232 = vmatprep.subr.bf16.mxu0 %v2979_v47 }
 0x25c   :  { %2234 = vmatpush1.bf16.msra.mxu0 %v2981_v55 }
 0x25d   :  { %2236 = vmatprep.subr.bf16.mxu0 %v2985_v1 }
 0x260   :  { %2238 = vmatpush1.bf16.msra.mxu0 %v2987_v5 }
 0x261   :  { %2240 = vmatprep.subr.bf16.mxu0 %v2991_v9 }
 0x264   :  { %2242 = vmatpush1.bf16.msra.mxu0 %v2993_v32 }
 0x265   :  { %2244 = vmatprep.subr.bf16.mxu0 %v2997_v51 }
 0x268   :  { %2246 = vmatpush1.bf16.msra.mxu0 %v2999_v10 }
 0x269   :  { %2248 = vmatprep.subr.bf16.mxu0 %v3003_v34 }
 0x26c   :  { %2250 = vmatpush1.bf16.msra.mxu0 %v3005_v11 }
 0x26d   :  { %2252 = vmatprep.subr.bf16.mxu0 %v3009_v20 }
 0x270   :  { %2254 = vmatpush1.bf16.msra.mxu0 %v3011_v24 }
 0x271   :  { %2288 = vmatprep.subr.bf16.mxu0 %v2967_v30 }
 0x30f   :  { %v696_v43 = vpop.f32.mrb[4].mxu0  ;;  %v767_v45 = vpop.f32.mrb[4].mxu1 }
 0x310   :  { %v772_v49 = vadd.f32 %v696_v43, %v562_v33  ;;  %v698_v52 = vpop.f32.mrb[5].mxu0  ;;  %v769_v18 = vpop.f32.mrb[5].mxu1  ;;  %v774_v60 = vadd.f32 %v767_v45, %v564_v50  ;;  %v3050_v33 = vpack.c.bf16 %v1066_v31, %v1062_v28  ;;  %v1070_v45 = vld [vmem:[#allocation7 + $0x90] sm:$0xff]  ;;  %v801_v28 = vld [vmem:[#allocation4 + $0x60] sm:$0xff]  ;;  %v802_v31 = vld [vmem:[#allocation4 + $0x68] sm:$0xff] }
 0x311   :  { %v773_v26 = vadd.f32 %v698_v52, %v563_v37  ;;  %v775_v25 = vadd.f32 %v769_v18, %v565_v12  ;;  %v1075_v37 = vld [vmem:[#allocation7 + $0xb8] sm:$0xff] }
 0x312   :  { %v776_v44 = vmul.f32 0.5, %v772_v49  ;;  %v3054_v43 = vpack.c.bf16 %v1075_v37, %v1071_v35  ;;  %v1074_v49 = vld [vmem:[#allocation7 + $0xb0] sm:$0xff]  ;;  %v1079_v52 = vld [vmem:[#allocation7 + $0xd8] sm:$0xff]  ;;  %v805_v35 = vadd.f32 %v801_v28, %v2894_v56 }
 0x313   :  { %v780_v57 = vmul.f32 0.5, %v773_v26  ;;  %v785_v40 = vmul.f32 0.5, %v775_v25  ;;  %v3056_v50 = vpack.c.bf16 %v1074_v49, %v1070_v45  ;;  %v1083_v18 = vld [vmem:[#allocation7 + $0xf8] sm:$0xff]  ;;  %v803_v37 = vld [vmem:[#allocation4 + $0x70] sm:$0xff]  ;;  %v806_v45 = vadd.f32 %v802_v31, %v2896_v61 }
 0x314   :  { %2571 = vtanh.f32 %v776_v44  ;;  %v3060_v26 = vpack.c.bf16 %v1083_v18, %v1079_v52  ;;  %v1082_v44 = vld [vmem:[#allocation7 + $0xf0] sm:$0xff]  ;;  %v1091_v12 = vld [vmem:[#allocation7 + $0x138] sm:$0xff] }
 0x315   :  { %2573 = vtanh.f32 %v780_v57  ;;  %v3062_v57 = vpack.c.bf16 %v1082_v44, %v1078_v39  ;;  %v807_v39 = vadd.f32 %v803_v37, %v2898_v4 }
 0x316   :  { %2575 = vtanh.f32 %v774_v60  ;;  %v1087_v60 = vld [vmem:[#allocation7 + $0x118] sm:$0xff] }
 0x317   :  { %2577 = vtanh.f32 %v785_v40  ;;  %v3066_v25 = vpack.c.bf16 %v1091_v12, %v1087_v60  ;;  %v1086_v40 = vld [vmem:[#allocation7 + $0x110] sm:$0xff] }
 0x31e   :  { %v2572_v42 = vpop.eup %2571 }
 0x31f   :  { %v2574_v53 = vpop.eup %2573  ;;  %v778_v54 = vmul.f32 0.5, %v2572_v42  ;;  %v1090_v42 = vld [vmem:[#allocation7 + $0x130] sm:$0xff] }
 0x320   :  { %v782_v59 = vmul.f32 0.5, %v2574_v53  ;;  %v2576_v2 = vpop.eup %2575  ;;  %v3068_v53 = vpack.c.bf16 %v1090_v42, %v1086_v40  ;;  %v804_v40 = vld [vmem:[#allocation4 + $0x78] sm:$0xff] }
 0x321   :  { %v779_v62 = vadd.f32 0.5, %v778_v54  ;;  %v2578_v22 = vpop.eup %2577  ;;  %v1095_v54 = vld [vmem:[#allocation7 + $0x158] sm:$0xff] }
 0x322   :  { %v783_v3 = vadd.f32 0.5, %v782_v59  ;;  %v787_v36 = vmul.f32 0.5, %v2578_v22  ;;  %v1099_v59 = vld [vmem:[#allocation7 + $0x178] sm:$0xff] }
 0x323   :  { %v790_v6 = vmul.f32 %v2576_v2, %v779_v62  ;;  %v3072_v62 = vpack.c.bf16 %v1099_v59, %v1095_v54  ;;  %v1094_v2 = vld [vmem:[#allocation7 + $0x150] sm:$0xff]  ;;  %v1107_v22 = vld [vmem:[#allocation7 + $0x1b8] sm:$0xff] }
 0x324   :  { %v789_v8 = vmul.f32 %v783_v3, %v2947_v38  ;;  %v788_v46 = vadd.f32 0.5, %v787_v36  ;;  %v1055_v38 = vld [vmem:[#allocation7 + $0x18] sm:$0xff]  ;;  %v1098_v3 = vld [vmem:[#allocation7 + $0x170] sm:$0xff] }
 0x325   :  { %v3042_v27 = vpack.c.bf16 %v1059_v15, %v1055_v38  ;;  %v1111_v38 = vld [vmem:[#allocation7 + $0x1d8] sm:$0xff] }
 0x326   :  { %v3021_v16 = vadd.f32 %v790_v6, %v789_v8  ;;  %v3074_v6 = vpack.c.bf16 %v1098_v3, %v1094_v2  ;;  %v1103_v8 = vld [vmem:[#allocation7 + $0x198] sm:$0xff]  ;;  %v808_v2 = vadd.f32 %v804_v40, %v2903_v19 }
 0x327   :  { %2320 = vmatprep.subr.bf16.mxu1 %v3042_v27  ;;  %v3078_v36 = vpack.c.bf16 %v1107_v22, %v1103_v8  ;;  %v1115_v15 = vld [vmem:[#allocation7 + $0x1f8] sm:$0xff] }
 0x328   :  { %2579 = vtanh.f32 %v3021_v16  ;;  %v3084_v41 = vpack.c.bf16 %v1115_v15, %v1111_v38 }
 0x332   :  { %v2580_v58 = vpop.eup %2579 }
 0x333   :  { %v793_v63 = vmul.f32 %v2580_v58, %v788_v46  ;;  %v1102_v46 = vld [vmem:[#allocation7 + $0x190] sm:$0xff] }
 0x334   :  { %v1106_v58 = vld [vmem:[#allocation7 + $0x1b0] sm:$0xff] }
 0x335   :  { %797 = vst [vmem:[#allocation9 + $0x10] sm:$0xff] %v793_v63  ;;  %938 = vmatmul.mubr.f32.vlgmr.msra.gmra.mrb[6].mxu0 %v793_v63  ;;  %1009 = vmatmul.mubr.f32.vlgmr.msra.gmra.mrb[6].mxu1 %v793_v63  ;;  %v3080_v63 = vpack.c.bf16 %v1106_v58, %v1102_v46 }
 0x336   :  { %2290 = vmatpush1.bf16.msra.mxu0 %v2969_v48  ;;  %1180 = vmatprep.mubr.f32.mxu0 %v2707_v0 }
 0x337   :  { %2292 = vmatprep.subr.bf16.mxu0 %v2973_v7  ;;  %1251 = vmatprep.mubr.f32.mxu1 %v2707_v0 }
 0x338   :  { %2322 = vmatpush1.bf16.msra.mxu1 %v3044_v13 }
 0x339   :  { %2324 = vmatprep.subr.bf16.mxu1 %v3048_v23 }
 0x33a   :  { %2294 = vmatpush1.bf16.msra.mxu0 %v2975_v29 }
 0x33b   :  { %2296 = vmatprep.subr.bf16.mxu0 %v2979_v47 }
 0x33c   :  { %2326 = vmatpush1.bf16.msra.mxu1 %v3050_v33 }
 0x33d   :  { %2328 = vmatprep.subr.bf16.mxu1 %v3054_v43 }
 0x33e   :  { %2298 = vmatpush1.bf16.msra.mxu0 %v2981_v55 }
 0x33f   :  { %2300 = vmatprep.subr.bf16.mxu0 %v2985_v1 }
 0x340   :  { %2330 = vmatpush1.bf16.msra.mxu1 %v3056_v50 }
 0x341   :  { %2332 = vmatprep.subr.bf16.mxu1 %v3060_v26 }
 0x342   :  { %2302 = vmatpush1.bf16.msra.mxu0 %v2987_v5 }
 0x343   :  { %2304 = vmatprep.subr.bf16.mxu0 %v2991_v9 }
 0x344   :  { %2334 = vmatpush1.bf16.msra.mxu1 %v3062_v57 }
 0x345   :  { %2336 = vmatprep.subr.bf16.mxu1 %v3066_v25 }
 0x346   :  { %2306 = vmatpush1.bf16.msra.mxu0 %v2993_v32 }
 0x347   :  { %2308 = vmatprep.subr.bf16.mxu0 %v2997_v51 }
 0x348   :  { %2338 = vmatpush1.bf16.msra.mxu1 %v3068_v53 }
 0x349   :  { %2340 = vmatprep.subr.bf16.mxu1 %v3072_v62 }
 0x34a   :  { %2310 = vmatpush1.bf16.msra.mxu0 %v2999_v10 }
 0x34b   :  { %2312 = vmatprep.subr.bf16.mxu0 %v3003_v34 }
 0x34c   :  { %2342 = vmatpush1.bf16.msra.mxu1 %v3074_v6 }
 0x34d   :  { %2344 = vmatprep.subr.bf16.mxu1 %v3078_v36 }
 0x34e   :  { %2314 = vmatpush1.bf16.msra.mxu0 %v3005_v11 }
 0x34f   :  { %2316 = vmatprep.subr.bf16.mxu0 %v3009_v20 }
 0x350   :  { %2346 = vmatpush1.bf16.msra.mxu1 %v3080_v63 }
 0x351   :  { %2348 = vmatprep.subr.bf16.mxu1 %v3084_v41 }
 0x352   :  { %2318 = vmatpush1.bf16.msra.mxu0 %v3011_v24 }
 0x353   :  { %2352 = vmatprep.subr.bf16.mxu0 %v2967_v30 }
 0x354   :  { %2350 = vmatpush1.bf16.msra.mxu1 %v3086_v21 }
 0x355   :  { %2384 = vmatprep.subr.bf16.mxu1 %v3042_v27 }
 0x408   :  { %v939_v49 = vpop.f32.mrb[6].mxu0  ;;  %v1010_v52 = vpop.f32.mrb[6].mxu1 }
 0x409   :  { %v1015_v18 = vadd.f32 %v939_v49, %v805_v35  ;;  %v941_v44 = vpop.f32.mrb[7].mxu0  ;;  %v1012_v60 = vpop.f32.mrb[7].mxu1  ;;  %v1017_v59 = vadd.f32 %v1010_v52, %v807_v39  ;;  %v1045_v39 = vld [vmem:[#allocation4 + $0x88] sm:$0xff] }
 0x40a   :  { %v1016_v12 = vadd.f32 %v941_v44, %v806_v45  ;;  %v1018_v3 = vadd.f32 %v1012_v60, %v808_v2  ;;  %v1046_v60 = vld [vmem:[#allocation4 + $0x90] sm:$0xff] }
 0x40b   :  { %v1019_v42 = vmul.f32 0.5, %v1015_v18 }
 0x40c   :  { %v1023_v54 = vmul.f32 0.5, %v1016_v12  ;;  %v1028_v8 = vmul.f32 0.5, %v1018_v3  ;;  %v1049_v12 = vadd.f32 %v1045_v39, %v2896_v61 }
 0x40d   :  { %2581 = vtanh.f32 %v1019_v42 }
 0x40e   :  { %2583 = vtanh.f32 %v1023_v54 }
 0x40f   :  { %2585 = vtanh.f32 %v1017_v59  ;;  %v1050_v59 = vadd.f32 %v1046_v60, %v2898_v4 }
 0x410   :  { %2587 = vtanh.f32 %v1028_v8 }
 0x417   :  { %v2582_v22 = vpop.eup %2581 }
 0x418   :  { %v2584_v46 = vpop.eup %2583  ;;  %v1021_v58 = vmul.f32 0.5, %v2582_v22  ;;  %v1047_v22 = vld [vmem:[#allocation4 + $0x98] sm:$0xff] }
 0x419   :  { %v1025_v38 = vmul.f32 0.5, %v2584_v46  ;;  %v2586_v17 = vpop.eup %2585 }
 0x41a   :  { %v1022_v15 = vadd.f32 0.5, %v1021_v58  ;;  %v2588_v37 = vpop.eup %2587 }
 0x41b   :  { %v1026_v14 = vadd.f32 0.5, %v1025_v38  ;;  %v1030_v45 = vmul.f32 0.5, %v2588_v37  ;;  %v1051_v38 = vadd.f32 %v1047_v22, %v2903_v19 }
 0x41c   :  { %v1033_v28 = vmul.f32 %v2586_v17, %v1022_v15 }
 0x41d   :  { %v1032_v31 = vmul.f32 %v1026_v14, %v3021_v16  ;;  %v1031_v49 = vadd.f32 0.5, %v1030_v45  ;;  %v1044_v16 = vld [vmem:[#allocation4 + $0x80] sm:$0xff] }
 0x41e   :  { %v1048_v44 = vadd.f32 %v1044_v16, %v2894_v56 }
 0x41f   :  { %v3096_v35 = vadd.f32 %v1033_v28, %v1032_v31 }
 0x421   :  { %2589 = vtanh.f32 %v3096_v35 }
 0x42b   :  { %v2590_v52 = vpop.eup %2589 }
 0x42c   :  { %v1036_v18 = vmul.f32 %v2590_v52, %v1031_v49 }
 0x42e   :  { %1040 = vst [vmem:[#allocation9 + $0x18] sm:$0xff] %v1036_v18  ;;  %1181 = vmatmul.mubr.f32.vlgmr.msra.gmra.mrb[8].mxu0 %v1036_v18  ;;  %1252 = vmatmul.mubr.f32.vlgmr.msra.gmra.mrb[8].mxu1 %v1036_v18 }
 0x42f   :  { %2354 = vmatpush1.bf16.msra.mxu0 %v2969_v48  ;;  %2386 = vmatpush1.bf16.msra.mxu1 %v3044_v13 }
 0x430   :  { %2356 = vmatprep.subr.bf16.mxu0 %v2973_v7  ;;  %2388 = vmatprep.subr.bf16.mxu1 %v3048_v23 }
 0x431   :  { %1423 = vmatprep.mubr.f32.mxu0 %v2707_v0  ;;  %1494 = vmatprep.mubr.f32.mxu1 %v2707_v0 }
 0x433   :  { %2358 = vmatpush1.bf16.msra.mxu0 %v2975_v29  ;;  %2390 = vmatpush1.bf16.msra.mxu1 %v3050_v33 }
 0x434   :  { %2360 = vmatprep.subr.bf16.mxu0 %v2979_v47  ;;  %2392 = vmatprep.subr.bf16.mxu1 %v3054_v43 }
 0x437   :  { %2362 = vmatpush1.bf16.msra.mxu0 %v2981_v55  ;;  %2394 = vmatpush1.bf16.msra.mxu1 %v3056_v50 }
 0x438   :  { %2364 = vmatprep.subr.bf16.mxu0 %v2985_v1  ;;  %2396 = vmatprep.subr.bf16.mxu1 %v3060_v26 }
 0x43b   :  { %2366 = vmatpush1.bf16.msra.mxu0 %v2987_v5  ;;  %2398 = vmatpush1.bf16.msra.mxu1 %v3062_v57 }
 0x43c   :  { %2368 = vmatprep.subr.bf16.mxu0 %v2991_v9  ;;  %2400 = vmatprep.subr.bf16.mxu1 %v3066_v25 }
 0x43f   :  { %2370 = vmatpush1.bf16.msra.mxu0 %v2993_v32  ;;  %2402 = vmatpush1.bf16.msra.mxu1 %v3068_v53 }
 0x440   :  { %2372 = vmatprep.subr.bf16.mxu0 %v2997_v51  ;;  %2404 = vmatprep.subr.bf16.mxu1 %v3072_v62 }
 0x443   :  { %2374 = vmatpush1.bf16.msra.mxu0 %v2999_v10  ;;  %2406 = vmatpush1.bf16.msra.mxu1 %v3074_v6 }
 0x444   :  { %2376 = vmatprep.subr.bf16.mxu0 %v3003_v34  ;;  %2408 = vmatprep.subr.bf16.mxu1 %v3078_v36 }
 0x447   :  { %2378 = vmatpush1.bf16.msra.mxu0 %v3005_v11  ;;  %2410 = vmatpush1.bf16.msra.mxu1 %v3080_v63 }
 0x448   :  { %2380 = vmatprep.subr.bf16.mxu0 %v3009_v20  ;;  %2412 = vmatprep.subr.bf16.mxu1 %v3084_v41 }
 0x44b   :  { %2382 = vmatpush1.bf16.msra.mxu0 %v3011_v24  ;;  %2414 = vmatpush1.bf16.msra.mxu1 %v3086_v21 }
 0x44c   :  { %2416 = vmatprep.subr.bf16.mxu0 %v2967_v30  ;;  %2448 = vmatprep.subr.bf16.mxu1 %v3042_v27 }
 0x501   :  { %v1182_v40 = vpop.f32.mrb[8].mxu0  ;;  %v1253_v42 = vpop.f32.mrb[8].mxu1 }
 0x502   :  { %v1258_v54 = vadd.f32 %v1182_v40, %v1048_v44  ;;  %v1184_v2 = vpop.f32.mrb[9].mxu0  ;;  %v1255_v3 = vpop.f32.mrb[9].mxu1  ;;  %v1260_v58 = vadd.f32 %v1253_v42, %v1050_v59 }
 0x503   :  { %v1259_v8 = vadd.f32 %v1184_v2, %v1049_v12  ;;  %v1261_v15 = vadd.f32 %v1255_v3, %v1051_v38 }
 0x504   :  { %v1262_v46 = vmul.f32 0.5, %v1258_v54 }
 0x505   :  { %v1266_v30 = vmul.f32 0.5, %v1259_v8  ;;  %v1271_v17 = vmul.f32 0.5, %v1261_v15 }
 0x506   :  { %2591 = vtanh.f32 %v1262_v46 }
 0x507   :  { %2593 = vtanh.f32 %v1266_v30 }
 0x508   :  { %2595 = vtanh.f32 %v1260_v58 }
 0x509   :  { %2597 = vtanh.f32 %v1271_v17 }
 0x510   :  { %v2592_v14 = vpop.eup %2591 }
 0x511   :  { %v2594_v28 = vpop.eup %2593  ;;  %v1264_v31 = vmul.f32 0.5, %v2592_v14 }
 0x512   :  { %v1268_v37 = vmul.f32 0.5, %v2594_v28  ;;  %v2596_v49 = vpop.eup %2595 }
 0x513   :  { %v1265_v45 = vadd.f32 0.5, %v1264_v31  ;;  %v2598_v44 = vpop.eup %2597 }
 0x514   :  { %v1269_v52 = vadd.f32 0.5, %v1268_v37  ;;  %v1273_v60 = vmul.f32 0.5, %v2598_v44  ;;  %v1805_v44 = vld [vmem:[#allocation7 + $0xc0] sm:$0xff] }
 0x515   :  { %v1276_v18 = vmul.f32 %v2596_v49, %v1265_v45  ;;  %v1801_v49 = vld [vmem:[#allocation7 + $0xa0] sm:$0xff] }
 0x516   :  { %v1275_v16 = vmul.f32 %v1269_v52, %v3096_v35  ;;  %v1274_v12 = vadd.f32 0.5, %v1273_v60  ;;  %v1809_v60 = vld [vmem:[#allocation7 + $0xe0] sm:$0xff] }
 0x518   :  { %v3138_v39 = vadd.f32 %v1276_v18, %v1275_v16  ;;  %v1806_v18 = vld [vmem:[#allocation7 + $0xc8] sm:$0xff] }
 0x519   :  { %v1810_v16 = vld [vmem:[#allocation7 + $0xe8] sm:$0xff] }
 0x51a   :  { %2599 = vtanh.f32 %v3138_v39 }
 0x524   :  { %v2600_v40 = vpop.eup %2599 }
 0x525   :  { %v1279_v42 = vmul.f32 %v2600_v40, %v1274_v12  ;;  %v2493_v12 = vpack.c.bf16 %v1809_v60, %v1805_v44  ;;  %v1814_v40 = vld [vmem:[#allocation7 + $0x108] sm:$0xff] }
 0x527   :  { %1283 = vst [vmem:[#allocation9 + $0x20] sm:$0xff] %v1279_v42  ;;  %1424 = vmatmul.mubr.f32.vlgmr.msra.gmra.mrb[10].mxu0 %v1279_v42  ;;  %1495 = vmatmul.mubr.f32.vlgmr.msra.gmra.mrb[10].mxu1 %v1279_v42  ;;  %v1818_v42 = vld [vmem:[#allocation7 + $0x128] sm:$0xff] }
 0x528   :  { %2418 = vmatpush1.bf16.msra.mxu0 %v2969_v48  ;;  %2450 = vmatpush1.bf16.msra.mxu1 %v3044_v13  ;;  %v1287_v48 = vld [vmem:[#allocation4 + $0xa0] sm:$0xff] }
 0x529   :  { %2420 = vmatprep.subr.bf16.mxu0 %v2973_v7  ;;  %2452 = vmatprep.subr.bf16.mxu1 %v3048_v23  ;;  %v1288_v7 = vld [vmem:[#allocation4 + $0xa8] sm:$0xff] }
 0x52a   :  { %1666 = vmatprep.mubr.f32.mxu0 %v2707_v0  ;;  %1737 = vmatprep.mubr.f32.mxu1 %v2707_v0 }
 0x52c   :  { %2422 = vmatpush1.bf16.msra.mxu0 %v2975_v29  ;;  %2454 = vmatpush1.bf16.msra.mxu1 %v3050_v33  ;;  %v1291_v29 = vadd.f32 %v1287_v48, %v2894_v56  ;;  %v2495_v48 = vpack.c.bf16 %v1818_v42, %v1814_v40  ;;  %v1774_v40 = vld [vmem:[#allocation4 + $0xe8] sm:$0xff] }
 0x52d   :  { %2424 = vmatprep.subr.bf16.mxu0 %v2979_v47  ;;  %2456 = vmatprep.subr.bf16.mxu1 %v3054_v43  ;;  %v1289_v47 = vld [vmem:[#allocation4 + $0xb0] sm:$0xff] }
 0x530   :  { %2426 = vmatpush1.bf16.msra.mxu0 %v2981_v55  ;;  %2458 = vmatpush1.bf16.msra.mxu1 %v3056_v50  ;;  %v1292_v55 = vadd.f32 %v1288_v7, %v2896_v61  ;;  %v1813_v7 = vld [vmem:[#allocation7 + $0x100] sm:$0xff] }
 0x531   :  { %2428 = vmatprep.subr.bf16.mxu0 %v2985_v1  ;;  %2460 = vmatprep.subr.bf16.mxu1 %v3060_v26 }
 0x534   :  { %2430 = vmatpush1.bf16.msra.mxu0 %v2987_v5  ;;  %2462 = vmatpush1.bf16.msra.mxu1 %v3062_v57 }
 0x535   :  { %2432 = vmatprep.subr.bf16.mxu0 %v2991_v9  ;;  %2464 = vmatprep.subr.bf16.mxu1 %v3066_v25 }
 0x538   :  { %2434 = vmatpush1.bf16.msra.mxu0 %v2993_v32  ;;  %2466 = vmatpush1.bf16.msra.mxu1 %v3068_v53  ;;  %v1293_v32 = vadd.f32 %v1289_v47, %v2898_v4 }
 0x539   :  { %2436 = vmatprep.subr.bf16.mxu0 %v2997_v51  ;;  %2468 = vmatprep.subr.bf16.mxu1 %v3072_v62 }
 0x53c   :  { %2438 = vmatpush1.bf16.msra.mxu0 %v2999_v10  ;;  %2470 = vmatpush1.bf16.msra.mxu1 %v3074_v6 }
 0x53d   :  { %2440 = vmatprep.subr.bf16.mxu0 %v3003_v34  ;;  %2472 = vmatprep.subr.bf16.mxu1 %v3078_v36 }
 0x540   :  { %2442 = vmatpush1.bf16.msra.mxu0 %v3005_v11  ;;  %2474 = vmatpush1.bf16.msra.mxu1 %v3080_v63  ;;  %v1290_v11 = vld [vmem:[#allocation4 + $0xb8] sm:$0xff] }
 0x541   :  { %2444 = vmatprep.subr.bf16.mxu0 %v3009_v20  ;;  %2476 = vmatprep.subr.bf16.mxu1 %v3084_v41  ;;  %v1294_v35 = vadd.f32 %v1290_v11, %v2903_v19 }
 0x544   :  { %2446 = vmatpush1.bf16.msra.mxu0 %v3011_v24  ;;  %2478 = vmatpush1.bf16.msra.mxu1 %v3086_v21 }
 0x545   :  { %2512 = vmatprep.subr.bf16.mxu1 %v3042_v27 }
 0x5fa   :  { %v1425_v1 = vpop.f32.mrb[10].mxu0  ;;  %v1496_v5 = vpop.f32.mrb[10].mxu1 }
 0x5fb   :  { %v1501_v9 = vadd.f32 %v1425_v1, %v1291_v29  ;;  %v1427_v51 = vpop.f32.mrb[11].mxu0  ;;  %v1498_v10 = vpop.f32.mrb[11].mxu1  ;;  %v1503_v27 = vadd.f32 %v1496_v5, %v1293_v32  ;;  %v1817_v29 = vld [vmem:[#allocation7 + $0x120] sm:$0xff]  ;;  %v1826_v1 = vld [vmem:[#allocation7 + $0x168] sm:$0xff] }
 0x5fc   :  { %v1502_v34 = vadd.f32 %v1427_v51, %v1292_v55  ;;  %v1504_v54 = vadd.f32 %v1498_v10, %v1294_v35  ;;  %v2497_v47 = vpack.c.bf16 %v1817_v29, %v1813_v7  ;;  %v1822_v55 = vld [vmem:[#allocation7 + $0x148] sm:$0xff]  ;;  %v1825_v32 = vld [vmem:[#allocation7 + $0x160] sm:$0xff]  ;;  %v1778_v7 = vadd.f32 %v1774_v40, %v2896_v61 }
 0x5fd   :  { %v1505_v20 = vmul.f32 0.5, %v1501_v9  ;;  %v2499_v5 = vpack.c.bf16 %v1826_v1, %v1822_v55  ;;  %v1821_v9 = vld [vmem:[#allocation7 + $0x140] sm:$0xff]  ;;  %v1830_v10 = vld [vmem:[#allocation7 + $0x188] sm:$0xff] }
 0x5fe   :  { %v1509_v24 = vmul.f32 0.5, %v1502_v34  ;;  %v1514_v59 = vmul.f32 0.5, %v1504_v54  ;;  %v2501_v51 = vpack.c.bf16 %v1825_v32, %v1821_v9  ;;  %v1834_v34 = vld [vmem:[#allocation7 + $0x1a8] sm:$0xff]  ;;  %v1776_v32 = vld [vmem:[#allocation4 + $0xf8] sm:$0xff] }
 0x5ff   :  { %2601 = vtanh.f32 %v1505_v20  ;;  %v2503_v11 = vpack.c.bf16 %v1834_v34, %v1830_v10  ;;  %v1829_v20 = vld [vmem:[#allocation7 + $0x180] sm:$0xff]  ;;  %v1838_v35 = vld [vmem:[#allocation7 + $0x1c8] sm:$0xff] }
 0x600   :  { %2603 = vtanh.f32 %v1509_v24  ;;  %v1833_v24 = vld [vmem:[#allocation7 + $0x1a0] sm:$0xff]  ;;  %v1842_v54 = vld [vmem:[#allocation7 + $0x1e8] sm:$0xff] }
 0x601   :  { %2605 = vtanh.f32 %v1503_v27  ;;  %v2505_v27 = vpack.c.bf16 %v1833_v24, %v1829_v20 }
 0x602   :  { %2607 = vtanh.f32 %v1514_v59  ;;  %v2507_v59 = vpack.c.bf16 %v1842_v54, %v1838_v35 }
 0x609   :  { %v2602_v2 = vpop.eup %2601 }
 0x60a   :  { %v2604_v3 = vpop.eup %2603  ;;  %v1507_v8 = vmul.f32 0.5, %v2602_v2  ;;  %v1837_v2 = vld [vmem:[#allocation7 + $0x1c0] sm:$0xff] }
 0x60b   :  { %v1511_v22 = vmul.f32 0.5, %v2604_v3  ;;  %v2606_v30 = vpop.eup %2605  ;;  %v1841_v3 = vld [vmem:[#allocation7 + $0x1e0] sm:$0xff] }
 0x60c   :  { %v1508_v46 = vadd.f32 0.5, %v1507_v8  ;;  %v2608_v14 = vpop.eup %2607  ;;  %v2509_v8 = vpack.c.bf16 %v1841_v3, %v1837_v2 }
 0x60d   :  { %v1512_v58 = vadd.f32 0.5, %v1511_v22  ;;  %v1516_v28 = vmul.f32 0.5, %v2608_v14  ;;  %v1530_v22 = vld [vmem:[#allocation4 + $0xc0] sm:$0xff] }
 0x60e   :  { %v1519_v38 = vmul.f32 %v2606_v30, %v1508_v46  ;;  %v1531_v46 = vld [vmem:[#allocation4 + $0xc8] sm:$0xff]  ;;  %v1534_v30 = vadd.f32 %v1530_v22, %v2894_v56 }
 0x60f   :  { %v1518_v15 = vmul.f32 %v1512_v58, %v3138_v39  ;;  %v1517_v31 = vadd.f32 0.5, %v1516_v28  ;;  %v2491_v39 = vpack.c.bf16 %v1810_v16, %v1806_v18  ;;  %v1532_v58 = vld [vmem:[#allocation4 + $0xd0] sm:$0xff] }
 0x611   :  { %v3179_v17 = vadd.f32 %v1519_v38, %v1518_v15  ;;  %v1535_v38 = vadd.f32 %v1531_v46, %v2896_v61 }
 0x613   :  { %2609 = vtanh.f32 %v3179_v17 }
 0x61d   :  { %v2610_v37 = vpop.eup %2609 }
 0x61e   :  { %v1522_v45 = vmul.f32 %v2610_v37, %v1517_v31  ;;  %v1536_v31 = vadd.f32 %v1532_v58, %v2898_v4 }
 0x620   :  { %1526 = vst [vmem:[#allocation9 + $0x28] sm:$0xff] %v1522_v45  ;;  %1667 = vmatmul.mubr.f32.vlgmr.msra.gmra.mrb[12].mxu0 %v1522_v45  ;;  %1738 = vmatmul.mubr.f32.vlgmr.msra.gmra.mrb[12].mxu1 %v1522_v45 }
 0x621   :  { %2514 = vmatpush1.bf16.msra.mxu1 %v3044_v13  ;;  %1909 = vmatprep.mubr.f32.mxu0 %v2707_v0  ;;  %v1786_v13 = vld [vmem:[#allocation7 + $0x28] sm:$0xff] }
 0x622   :  { %2516 = vmatprep.subr.bf16.mxu1 %v3048_v23  ;;  %1980 = vmatprep.mubr.f32.mxu1 %v2707_v0  ;;  %v1782_v0 = vld [vmem:[#allocation7 + $0x8] sm:$0xff] }
 0x623   :  { %v2479_v23 = vpack.c.bf16 %v1786_v13, %v1782_v0  ;;  %v1533_v13 = vld [vmem:[#allocation4 + $0xd8] sm:$0xff] }
 0x625   :  { %2518 = vmatpush1.bf16.msra.mxu1 %v3050_v33  ;;  %v1781_v33 = vld [vmem:[#allocation7] sm:$0xff]  ;;  %2480 = vmatprep.subr.bf16.mxu0 %v2479_v23 }
 0x626   :  { %2520 = vmatprep.subr.bf16.mxu1 %v3054_v43  ;;  %v1785_v43 = vld [vmem:[#allocation7 + $0x20] sm:$0xff] }
 0x629   :  { %2522 = vmatpush1.bf16.msra.mxu1 %v3056_v50  ;;  %v2481_v50 = vpack.c.bf16 %v1785_v43, %v1781_v33 }
 0x62a   :  { %2524 = vmatprep.subr.bf16.mxu1 %v3060_v26  ;;  %v1790_v26 = vld [vmem:[#allocation7 + $0x48] sm:$0xff] }
 0x62b   :  { %2482 = vmatpush1.bf16.msra.mxu0 %v2481_v50  ;;  %v1537_v50 = vadd.f32 %v1533_v13, %v2903_v19 }
 0x62d   :  { %2526 = vmatpush1.bf16.msra.mxu1 %v3062_v57  ;;  %v1794_v57 = vld [vmem:[#allocation7 + $0x68] sm:$0xff] }
 0x62e   :  { %2528 = vmatprep.subr.bf16.mxu1 %v3066_v25  ;;  %v2483_v25 = vpack.c.bf16 %v1794_v57, %v1790_v26 }
 0x630   :  { %2484 = vmatprep.subr.bf16.mxu0 %v2483_v25 }
 0x631   :  { %2530 = vmatpush1.bf16.msra.mxu1 %v3068_v53  ;;  %v1789_v53 = vld [vmem:[#allocation7 + $0x40] sm:$0xff] }
 0x632   :  { %2532 = vmatprep.subr.bf16.mxu1 %v3072_v62  ;;  %v1793_v62 = vld [vmem:[#allocation7 + $0x60] sm:$0xff] }
 0x635   :  { %2534 = vmatpush1.bf16.msra.mxu1 %v3074_v6  ;;  %v2485_v6 = vpack.c.bf16 %v1793_v62, %v1789_v53 }
 0x636   :  { %2536 = vmatprep.subr.bf16.mxu1 %v3078_v36  ;;  %v1798_v36 = vld [vmem:[#allocation7 + $0x88] sm:$0xff] }
 0x637   :  { %2486 = vmatpush1.bf16.msra.mxu0 %v2485_v6 }
 0x639   :  { %2538 = vmatpush1.bf16.msra.mxu1 %v3080_v63  ;;  %v1802_v63 = vld [vmem:[#allocation7 + $0xa8] sm:$0xff] }
 0x63a   :  { %2540 = vmatprep.subr.bf16.mxu1 %v3084_v41  ;;  %v2487_v41 = vpack.c.bf16 %v1802_v63, %v1798_v36 }
 0x63c   :  { %2488 = vmatprep.subr.bf16.mxu0 %v2487_v41 }
 0x63d   :  { %2542 = vmatpush1.bf16.msra.mxu1 %v3086_v21  ;;  %v1797_v21 = vld [vmem:[#allocation7 + $0x80] sm:$0xff] }
 0x63e   :  { %v2489_v52 = vpack.c.bf16 %v1801_v49, %v1797_v21 }
 0x640   :  { %2490 = vmatpush1.bf16.msra.mxu0 %v2489_v52 }
 0x641   :  { %2492 = vmatprep.subr.bf16.mxu0 %v2491_v39 }
 0x644   :  { %2494 = vmatpush1.bf16.msra.mxu0 %v2493_v12  ;;  %v1773_v12 = vld [vmem:[#allocation4 + $0xe0] sm:$0xff] }
 0x645   :  { %2496 = vmatprep.subr.bf16.mxu0 %v2495_v48  ;;  %v1777_v42 = vadd.f32 %v1773_v12, %v2894_v56  ;;  %v1775_v48 = vld [vmem:[#allocation4 + $0xf0] sm:$0xff] }
 0x646   :  { %v1779_v55 = vadd.f32 %v1775_v48, %v2898_v4 }
 0x648   :  { %2498 = vmatpush1.bf16.msra.mxu0 %v2497_v47 }
 0x649   :  { %2500 = vmatprep.subr.bf16.mxu0 %v2499_v5 }
 0x64c   :  { %2502 = vmatpush1.bf16.msra.mxu0 %v2501_v51 }
 0x64d   :  { %2504 = vmatprep.subr.bf16.mxu0 %v2503_v11  ;;  %v1780_v11 = vadd.f32 %v1776_v32, %v2903_v19 }
 0x650   :  { %2506 = vmatpush1.bf16.msra.mxu0 %v2505_v27 }
 0x651   :  { %2508 = vmatprep.subr.bf16.mxu0 %v2507_v59 }
 0x654   :  { %2510 = vmatpush1.bf16.msra.mxu0 %v2509_v8 }
 0x6f3   :  { %v1668_v15 = vpop.f32.mrb[12].mxu0  ;;  %v1739_v14 = vpop.f32.mrb[12].mxu1 }
 0x6f4   :  { %v1744_v28 = vadd.f32 %v1668_v15, %v1534_v30  ;;  %v1670_v37 = vpop.f32.mrb[13].mxu0  ;;  %v1741_v45 = vpop.f32.mrb[13].mxu1  ;;  %v1746_v43 = vadd.f32 %v1739_v14, %v1536_v31 }
 0x6f5   :  { %v1745_v0 = vadd.f32 %v1670_v37, %v1535_v38  ;;  %v1747_v26 = vadd.f32 %v1741_v45, %v1537_v50 }
 0x6f6   :  { %v1748_v23 = vmul.f32 0.5, %v1744_v28 }
 0x6f7   :  { %v1752_v33 = vmul.f32 0.5, %v1745_v0  ;;  %v1757_v57 = vmul.f32 0.5, %v1747_v26 }
 0x6f8   :  { %2611 = vtanh.f32 %v1748_v23 }
 0x6f9   :  { %2613 = vtanh.f32 %v1752_v33 }
 0x6fa   :  { %2615 = vtanh.f32 %v1746_v43 }
 0x6fb   :  { %2617 = vtanh.f32 %v1757_v57 }
 0x702   :  { %v2612_v25 = vpop.eup %2611 }
 0x703   :  { %v2614_v53 = vpop.eup %2613  ;;  %v1750_v62 = vmul.f32 0.5, %v2612_v25 }
 0x704   :  { %v1754_v6 = vmul.f32 0.5, %v2614_v53  ;;  %v2616_v63 = vpop.eup %2615 }
 0x705   :  { %v1751_v36 = vadd.f32 0.5, %v1750_v62  ;;  %v2618_v18 = vpop.eup %2617 }
 0x706   :  { %v1755_v41 = vadd.f32 0.5, %v1754_v6  ;;  %v1759_v16 = vmul.f32 0.5, %v2618_v18 }
 0x707   :  { %v1762_v21 = vmul.f32 %v2616_v63, %v1751_v36 }
 0x708   :  { %v1761_v49 = vmul.f32 %v1755_v41, %v3179_v17  ;;  %v1760_v39 = vadd.f32 0.5, %v1759_v16 }
 0x70a   :  { %v1763_v52 = vadd.f32 %v1762_v21, %v1761_v49 }
 0x70c   :  { %2619 = vtanh.f32 %v1763_v52 }
 0x716   :  { %v2620_v44 = vpop.eup %2619 }
 0x717   :  { %v1765_v60 = vmul.f32 %v2620_v44, %v1760_v39 }
 0x719   :  { %1769 = vst [vmem:[#allocation9 + $0x30] sm:$0xff] %v1765_v60  ;;  %1910 = vmatmul.mubr.f32.vlgmr.msra.gmra.mrb[14].mxu0 %v1765_v60  ;;  %1981 = vmatmul.mubr.f32.vlgmr.msra.gmra.mrb[14].mxu1 %v1765_v60 }
 0x7ec   :  { %v1911_v29 = vpop.f32.mrb[14].mxu0  ;;  %v1982_v47 = vpop.f32.mrb[14].mxu1 }
 0x7ed   :  { %v1987_v17 = vadd.f32 %v1911_v29, %v1777_v42  ;;  %v1913_v1 = vpop.f32.mrb[15].mxu0  ;;  %v1984_v5 = vpop.f32.mrb[15].mxu1  ;;  %v1989_v34 = vadd.f32 %v1982_v47, %v1779_v55 }
 0x7ee   :  { %v1988_v9 = vadd.f32 %v1913_v1, %v1778_v7  ;;  %v1990_v56 = vadd.f32 %v1984_v5, %v1780_v11 }
 0x7ef   :  { %v1991_v51 = vmul.f32 0.5, %v1987_v17 }
 0x7f0   :  { %v1995_v10 = vmul.f32 0.5, %v1988_v9  ;;  %v2000_v20 = vmul.f32 0.5, %v1990_v56 }
 0x7f1   :  { %2621 = vtanh.f32 %v1991_v51 }
 0x7f2   :  { %2623 = vtanh.f32 %v1995_v10 }
 0x7f3   :  { %2625 = vtanh.f32 %v1989_v34 }
 0x7f4   :  { %2627 = vtanh.f32 %v2000_v20 }
 0x7fb   :  { %v2622_v61 = vpop.eup %2621 }
 0x7fc   :  { %v2624_v24 = vpop.eup %2623  ;;  %v1993_v27 = vmul.f32 0.5, %v2622_v61 }
 0x7fd   :  { %v1997_v35 = vmul.f32 0.5, %v2624_v24  ;;  %v2626_v54 = vpop.eup %2625 }
 0x7fe   :  { %v1994_v4 = vadd.f32 0.5, %v1993_v27  ;;  %v2628_v22 = vpop.eup %2627 }
 0x7ff   :  { %v1998_v59 = vadd.f32 0.5, %v1997_v35  ;;  %v2002_v46 = vmul.f32 0.5, %v2628_v22 }
 0x800   :  { %v2005_v2 = vmul.f32 %v2626_v54, %v1994_v4 }
 0x801   :  { %v2004_v3 = vmul.f32 %v1998_v59, %v1763_v52  ;;  %v2003_v19 = vadd.f32 0.5, %v2002_v46 }
 0x803   :  { %v2006_v8 = vadd.f32 %v2005_v2, %v2004_v3 }
 0x805   :  { %2629 = vtanh.f32 %v2006_v8 }
 0x80f   :  { %v2630_v30 = vpop.eup %2629 }
 0x810   :  { %v2008_v58 = vmul.f32 %v2630_v30, %v2003_v19 }
 0x812   :  { %2012 = vst [vmem:[#allocation9 + $0x38] sm:$0xff] %v2008_v58 }
 0x813   :  { %2686 = shalt.err (!%p2683_p6)
}
 0x814   :  { %s2687_s15 = scalar_lea.hbm %s3223_s3, 1024 }
 0x815   :  { %p2688_p7 = scmp.ne.s32.totalorder %s3223_s3, %s2687_s15  ;;  %p2691_p8 = scmp.lt.u32.totalorder %s2687_s15, %s3223_s3 }
 0x817   :  { %p2693_p9 = pnand %p2691_p8, %p2688_p7 }
 0x819   :  { %2696 = shalt.err (!%p2693_p9)
}
 0x81a   :  { %s2709_s20 = smov 128   ;;  %s2710_s21 = smov 8  }
 0x81b   :  { %2024 = dma.vmem_to_hbm [thread:$0]  %s2019_s11, 1024, %s3223_s3, [#allocation6], %s2709_s20, %s2709_s20, %s2710_s21  }
 0x81c   :  { %2701 = dma.done.wait [#allocation6], 1024  }
 0x81d   :  { %2702 = vsyncadd [#allocation6], 4294966272 }
 0x81e   :  { %2028 = vsyncpa [#allocation5], 1 }
 0x81f   :  { %2029 = vsyncpa [#allocation8], 1 }
 0x820   :  { %2030 = vsyncpa [#allocation6], 1 }

// kernel: tpu_custom_call.1
= control target key start
LH: loop header
LB: loop body
LE: loop exit
PB: predicated region body
PF: predicated region fallthrough
CT: control target
= control target key end

     0   :  { %8 = vsyncpa [#allocation5], 0  ;;  %s3220_s0 = inlined_call_operand.hbm [shape: f32[8,8,512], index: 0, kind: input, shape index: {}]   ;;  %s3221_s1 = inlined_call_operand.hbm [shape: f32[128,512], index: 1, kind: input, shape index: {}]   ;;  %s3222_s2 = inlined_call_operand.vmem [shape: f32[1,512], index: 2, kind: input, shape index: {}]   ;;  %s3223_s3 = inlined_call_operand.hbm [shape: f32[8,8,128], index: 3, kind: output, shape index: {}]  }
   0x1   :  { %9 = vsyncpa [#allocation8], 0 }
   0x2   :  { %10 = vsyncpa [#allocation6], 0  ;;  %s2703_s12 = smov [#allocation4]   ;;  %s2631_s16 = scalar_lea.hbm %s3220_s0, 4096 }
   0x3   :  { %s16_s13 = sshll.u32 %s2703_s12, 4  ;;  %p2632_p0 = scmp.ne.s32.totalorder %s3220_s0, %s2631_s16  ;;  %s17_s13 = int_to_ptr.vmem [resolvable:$true] %s16_s13 }
   0x4   :  { %p2635_p1 = scmp.lt.u32.totalorder %s2631_s16, %s3220_s0 }
   0x6   :  { %p2637_p2 = pnand %p2635_p1, %p2632_p0 }
   0x8   :  { %2640 = shalt.err (!%p2637_p2)
}
   0x9   :  { %s2641_s21 = scalar_lea.vmem %s17_s13, 4096  ;;  %p2646_p4 = scmp.lt.s32.totalorder %s17_s13, %s17_s13 }
   0xa   :  { %p2642_p3 = scmp.ne.s32.totalorder %s17_s13, %s2641_s21  ;;  %p2647_p5 = scmp.lt.s32.totalorder %s2641_s21, %s2641_s21 }
   0xc   :  { %p2648_p6 = por %p2647_p5, %p2646_p4 }
   0xe   :  { %p2649_p7 = pnand %p2648_p6, %p2642_p3 }
  0x10   :  { %2652 = shalt.err (!%p2649_p7)
}
  0x11   :  { %s2704_s22 = smov 512   ;;  %s2705_s23 = smov 32  }
  0x12   :  { %22 = dma.hbm_to_vmem [thread:$0]  %s3220_s0, 4096, %s17_s13, [#allocation5], %s2704_s22, %s2704_s22, %s2705_s23  }
  0x13   :  { %s2706_s26 = smov [#allocation7]   ;;  %s2653_s30 = scalar_lea.hbm %s3221_s1, 8192 }
  0x14   :  { %s28_s27 = sshll.u32 %s2706_s26, 4  ;;  %p2654_p8 = scmp.ne.s32.totalorder %s3221_s1, %s2653_s30  ;;  %s29_s27 = int_to_ptr.vmem [resolvable:$true] %s28_s27 }
  0x15   :  { %p2657_p9 = scmp.lt.u32.totalorder %s2653_s30, %s3221_s1 }
  0x17   :  { %p2659_p10 = pnand %p2657_p9, %p2654_p8 }
  0x19   :  { %2662 = shalt.err (!%p2659_p10)
}
  0x1a   :  { %s2663_s8 = scalar_lea.vmem %s29_s27, 8192  ;;  %p2668_p12 = scmp.lt.s32.totalorder %s29_s27, %s29_s27 }
  0x1b   :  { %p2664_p11 = scmp.ne.s32.totalorder %s29_s27, %s2663_s8  ;;  %p2669_p13 = scmp.lt.s32.totalorder %s2663_s8, %s2663_s8 }
  0x1d   :  { %p2670_p0 = por %p2669_p13, %p2668_p12 }
  0x1f   :  { %p2671_p1 = pnand %p2670_p0, %p2664_p11 }
  0x21   :  { %2674 = shalt.err (!%p2671_p1)
}
  0x22   :  { %34 = dma.hbm_to_vmem [thread:$0]  %s3221_s1, 8192, %s29_s27, [#allocation8], %s2704_s22, %s2704_s22, %s2705_s23  }
  0x23   :  { %2697 = dma.done.wait [#allocation5], 4096  }
  0x24   :  { %2698 = vsyncadd [#allocation5], 4294963200 }
  0x25   :  { %2699 = dma.done.wait [#allocation8], 8192  }
  0x26   :  { %2700 = vsyncadd [#allocation8], 4294959104  ;;  %v2707_v0 = vmov 0.0   ;;  %v82_v1 = vld [vmem:[#allocation7 + $0x8] sm:$0xff]  ;;  %v81_v3 = vld [vmem:[#allocation7] sm:$0xff] }
  0x27   :  { %209 = vmatprep.mubr.f32.mxu0 %v2707_v0  ;;  %280 = vmatprep.mubr.f32.mxu1 %v2707_v0  ;;  %v86_v2 = vld [vmem:[#allocation7 + $0x28] sm:$0xff]  ;;  %v85_v5 = vld [vmem:[#allocation7 + $0x20] sm:$0xff]  ;;  %v84_v12 = vld [vmem:[#allocation7 + $0x18] sm:$0xff] }
  0x28   :  { %v2757_v4 = vpack.c.bf16 %v86_v2, %v82_v1  ;;  %v90_v6 = vld [vmem:[#allocation7 + $0x48] sm:$0xff]  ;;  %v2759_v8 = vpack.c.bf16 %v85_v5, %v81_v3  ;;  %v89_v10 = vld [vmem:[#allocation7 + $0x40] sm:$0xff]  ;;  %v88_v13 = vld [vmem:[#allocation7 + $0x38] sm:$0xff] }
  0x29   :  { %v94_v7 = vld [vmem:[#allocation7 + $0x68] sm:$0xff]  ;;  %v93_v11 = vld [vmem:[#allocation7 + $0x60] sm:$0xff]  ;;  %v83_v14 = vld [vmem:[#allocation7 + $0x10] sm:$0xff]  ;;  %v2767_v17 = vpack.c.bf16 %v88_v13, %v84_v12 }
  0x2a   :  { %v2761_v9 = vpack.c.bf16 %v94_v7, %v90_v6  ;;  %2032 = vmatprep.subr.bf16.mxu0 %v2757_v4  ;;  %v87_v15 = vld [vmem:[#allocation7 + $0x30] sm:$0xff]  ;;  %v2765_v16 = vpack.c.bf16 %v93_v11, %v89_v10  ;;  %v98_v19 = vld [vmem:[#allocation7 + $0x88] sm:$0xff]  ;;  %v97_v21 = vld [vmem:[#allocation7 + $0x80] sm:$0xff] }
  0x2b   :  { %2034 = vmatpush1.bf16.msra.mxu0 %v2759_v8  ;;  %v2769_v18 = vpack.c.bf16 %v87_v15, %v83_v14  ;;  %v102_v20 = vld [vmem:[#allocation7 + $0xa8] sm:$0xff]  ;;  %v101_v23 = vld [vmem:[#allocation7 + $0xa0] sm:$0xff]  ;;  %v92_v24 = vld [vmem:[#allocation7 + $0x58] sm:$0xff]  ;;  %2064 = vmatprep.subr.bf16.mxu1 %v2767_v17 }
  0x2c   :  { %2036 = vmatprep.subr.bf16.mxu0 %v2761_v9  ;;  %v2772_v22 = vpack.c.bf16 %v102_v20, %v98_v19  ;;  %v96_v25 = vld [vmem:[#allocation7 + $0x78] sm:$0xff]  ;;  %v91_v27 = vld [vmem:[#allocation7 + $0x50] sm:$0xff]  ;;  %v106_v29 = vld [vmem:[#allocation7 + $0xc8] sm:$0xff]  ;;  %v2781_v32 = vpack.c.bf16 %v101_v23, %v97_v21 }
  0x2d   :  { %v2775_v26 = vpack.c.bf16 %v96_v25, %v92_v24  ;;  %v95_v28 = vld [vmem:[#allocation7 + $0x70] sm:$0xff]  ;;  %2066 = vmatpush1.bf16.msra.mxu1 %v2769_v18  ;;  %v110_v31 = vld [vmem:[#allocation7 + $0xe8] sm:$0xff]  ;;  %v100_v33 = vld [vmem:[#allocation7 + $0x98] sm:$0xff] }
  0x2e   :  { %v2778_v30 = vpack.c.bf16 %v95_v28, %v91_v27  ;;  %v104_v34 = vld [vmem:[#allocation7 + $0xb8] sm:$0xff]  ;;  %v99_v35 = vld [vmem:[#allocation7 + $0x90] sm:$0xff]  ;;  %v2785_v36 = vpack.c.bf16 %v110_v31, %v106_v29  ;;  %v105_v37 = vld [vmem:[#allocation7 + $0xc0] sm:$0xff] }
  0x2f   :  { %2038 = vmatpush1.bf16.msra.mxu0 %v2765_v16  ;;  %2068 = vmatprep.subr.bf16.mxu1 %v2775_v26  ;;  %v109_v38 = vld [vmem:[#allocation7 + $0xe0] sm:$0xff]  ;;  %v2787_v39 = vpack.c.bf16 %v104_v34, %v100_v33  ;;  %v103_v40 = vld [vmem:[#allocation7 + $0xb0] sm:$0xff]  ;;  %v114_v41 = vld [vmem:[#allocation7 + $0x108] sm:$0xff] }
  0x30   :  { %2040 = vmatprep.subr.bf16.mxu0 %v2772_v22  ;;  %v118_v42 = vld [vmem:[#allocation7 + $0x128] sm:$0xff]  ;;  %v108_v43 = vld [vmem:[#allocation7 + $0xd8] sm:$0xff]  ;;  %v2790_v44 = vpack.c.bf16 %v103_v40, %v99_v35  ;;  %v2793_v46 = vpack.c.bf16 %v109_v38, %v105_v37  ;;  %v113_v47 = vld [vmem:[#allocation7 + $0x100] sm:$0xff] }
  0x31   :  { %2070 = vmatpush1.bf16.msra.mxu1 %v2778_v30  ;;  %v112_v45 = vld [vmem:[#allocation7 + $0xf8] sm:$0xff]  ;;  %v107_v49 = vld [vmem:[#allocation7 + $0xd0] sm:$0xff]  ;;  %v2799_v51 = vpack.c.bf16 %v118_v42, %v114_v41  ;;  %v117_v52 = vld [vmem:[#allocation7 + $0x120] sm:$0xff] }
  0x32   :  { %2072 = vmatprep.subr.bf16.mxu1 %v2787_v39  ;;  %v2796_v48 = vpack.c.bf16 %v112_v45, %v108_v43  ;;  %v111_v50 = vld [vmem:[#allocation7 + $0xf0] sm:$0xff]  ;;  %v116_v53 = vld [vmem:[#allocation7 + $0x118] sm:$0xff]  ;;  %v122_v55 = vld [vmem:[#allocation7 + $0x148] sm:$0xff]  ;;  %v2805_v58 = vpack.c.bf16 %v117_v52, %v113_v47 }
  0x33   :  { %2042 = vmatpush1.bf16.msra.mxu0 %v2781_v32  ;;  %v120_v54 = vld [vmem:[#allocation7 + $0x138] sm:$0xff]  ;;  %v126_v56 = vld [vmem:[#allocation7 + $0x168] sm:$0xff]  ;;  %v2802_v57 = vpack.c.bf16 %v111_v50, %v107_v49  ;;  %v121_v59 = vld [vmem:[#allocation7 + $0x140] sm:$0xff]  ;;  %v57_v49 = vlaneseq }
  0x34   :  { %2044 = vmatprep.subr.bf16.mxu0 %v2785_v36  ;;  %v2808_v60 = vpack.c.bf16 %v120_v54, %v116_v53  ;;  %v115_v61 = vld [vmem:[#allocation7 + $0x110] sm:$0xff]  ;;  %v2811_v63 = vpack.c.bf16 %v126_v56, %v122_v55  ;;  %v125_v1 = vld [vmem:[#allocation7 + $0x160] sm:$0xff]  ;;  %v124_v2 = vld [vmem:[#allocation7 + $0x158] sm:$0xff] }
  0x35   :  { %2074 = vmatpush1.bf16.msra.mxu1 %v2790_v44  ;;  %v119_v62 = vld [vmem:[#allocation7 + $0x130] sm:$0xff]  ;;  %v128_v3 = vld [vmem:[#allocation7 + $0x178] sm:$0xff]  ;;  %v130_v5 = vld [vmem:[#allocation7 + $0x188] sm:$0xff]  ;;  %v2817_v10 = vpack.c.bf16 %v125_v1, %v121_v59  ;;  %v58_v50 = vshrl.u32 %v57_v49, 7 }
  0x36   :  { %2076 = vmatprep.subr.bf16.mxu1 %v2796_v48  ;;  %v134_v6 = vld [vmem:[#allocation7 + $0x1a8] sm:$0xff]  ;;  %v2814_v7 = vpack.c.bf16 %v119_v62, %v115_v61  ;;  %v129_v11 = vld [vmem:[#allocation7 + $0x180] sm:$0xff]  ;;  %v2820_v12 = vpack.c.bf16 %v128_v3, %v124_v2  ;;  %v123_v13 = vld [vmem:[#allocation7 + $0x150] sm:$0xff] }
  0x37   :  { %2046 = vmatpush1.bf16.msra.mxu0 %v2793_v46  ;;  %v127_v14 = vld [vmem:[#allocation7 + $0x170] sm:$0xff]  ;;  %v2823_v15 = vpack.c.bf16 %v134_v6, %v130_v5  ;;  %v133_v19 = vld [vmem:[#allocation7 + $0x1a0] sm:$0xff]  ;;  %v132_v20 = vld [vmem:[#allocation7 + $0x198] sm:$0xff]  ;;  %v59_v52 = vsub.s32 0, %v58_v50  ;;  %v63_v54 = vsub.s32 1, %v58_v50  ;;  %v67_v55 = vsub.s32 2, %v58_v50 }
  0x38   :  { %2048 = vmatprep.subr.bf16.mxu0 %v2799_v51  ;;  %v136_v21 = vld [vmem:[#allocation7 + $0x1b8] sm:$0xff]  ;;  %v138_v23 = vld [vmem:[#allocation7 + $0x1c8] sm:$0xff]  ;;  %v2826_v25 = vpack.c.bf16 %v127_v14, %v123_v13  ;;  %v2829_v27 = vpack.c.bf16 %v133_v19, %v129_v11  ;;  %v137_v28 = vld [vmem:[#allocation7 + $0x1c0] sm:$0xff]  ;;  %v71_v3 = vsub.s32 3, %v58_v50 }
  0x39   :  { %2078 = vmatpush1.bf16.msra.mxu1 %v2802_v57  ;;  %v142_v24 = vld [vmem:[#allocation7 + $0x1e8] sm:$0xff]  ;;  %v2832_v29 = vpack.c.bf16 %v136_v21, %v132_v20  ;;  %v131_v31 = vld [vmem:[#allocation7 + $0x190] sm:$0xff]  ;;  %v141_v35 = vld [vmem:[#allocation7 + $0x1e0] sm:$0xff] }
  0x3a   :  { %2080 = vmatprep.subr.bf16.mxu1 %v2808_v60  ;;  %v135_v33 = vld [vmem:[#allocation7 + $0x1b0] sm:$0xff]  ;;  %v2835_v34 = vpack.c.bf16 %v142_v24, %v138_v23  ;;  %v140_v37 = vld [vmem:[#allocation7 + $0x1d8] sm:$0xff]  ;;  %v2841_v41 = vpack.c.bf16 %v141_v35, %v137_v28  ;;  %v49_v53 = vld [vmem:[%s3222_s2] sm:$0xf]  ;;  %s2708_s2 = smov [#allocation9]  }
  0x3b   :  { %2050 = vmatpush1.bf16.msra.mxu0 %v2805_v58  ;;  %v144_v38 = vld [vmem:[#allocation7 + $0x1f8] sm:$0xff]  ;;  %v2838_v40 = vpack.c.bf16 %v135_v33, %v131_v31  ;;  %v139_v43 = vld [vmem:[#allocation7 + $0x1d0] sm:$0xff]  ;;  %v2894_v56 = vrot.slane %v49_v53, %v59_v52  ;;  %v52_v59 = vld [vmem:[#allocation4] sm:$0xff]  ;;  %v2896_v61 = vrot.slane %v49_v53, %v63_v54  ;;  %v2903_v19 = vrot.slane %v49_v53, %v71_v3  ;;  %s2018_s11 = sshll.u32 %s2708_s2, 4  ;;  %s2019_s11 = int_to_ptr.vmem [resolvable:$true] %s2018_s11 }
  0x3c   :  { %2052 = vmatprep.subr.bf16.mxu0 %v2811_v63  ;;  %v2844_v42 = vpack.c.bf16 %v144_v38, %v140_v37  ;;  %v143_v45 = vld [vmem:[#allocation7 + $0x1f0] sm:$0xff]  ;;  %v53_v62 = vld [vmem:[#allocation4 + $0x8] sm:$0xff]  ;;  %v55_v21 = vld [vmem:[#allocation4 + $0x18] sm:$0xff]  ;;  %s2675_s12 = scalar_lea.vmem %s2019_s11, 1024  ;;  %p2680_p3 = scmp.lt.s32.totalorder %s2019_s11, %s2019_s11 }
  0x3d   :  { %2082 = vmatpush1.bf16.msra.mxu1 %v2814_v7  ;;  %v2848_v47 = vpack.c.bf16 %v143_v45, %v139_v43  ;;  %v77_v1 = vadd.f32 %v2894_v56, %v52_v59  ;;  %v54_v2 = vld [vmem:[#allocation4 + $0x10] sm:$0xff]  ;;  %v78_v5 = vadd.f32 %v2896_v61, %v53_v62  ;;  %v80_v35 = vadd.f32 %v2903_v19, %v55_v21  ;;  %p2676_p2 = scmp.ne.s32.totalorder %s2019_s11, %s2675_s12  ;;  %p2681_p4 = scmp.lt.s32.totalorder %s2675_s12, %s2675_s12 }
  0x3e   :  { %2084 = vmatprep.subr.bf16.mxu1 %v2820_v12 }
  0x3f   :  { %2054 = vmatpush1.bf16.msra.mxu0 %v2817_v10  ;;  %p2682_p5 = por %p2681_p4, %p2680_p3 }
  0x40   :  { %2056 = vmatprep.subr.bf16.mxu0 %v2823_v15 }
  0x41   :  { %2086 = vmatpush1.bf16.msra.mxu1 %v2826_v25  ;;  %p2683_p6 = pnand %p2682_p5, %p2676_p2 }
  0x42   :  { %2088 = vmatprep.subr.bf16.mxu1 %v2832_v29 }
  0x43   :  { %2058 = vmatpush1.bf16.msra.mxu0 %v2829_v27 }
  0x44   :  { %2060 = vmatprep.subr.bf16.mxu0 %v2835_v34 }
  0x45   :  { %2090 = vmatpush1.bf16.msra.mxu1 %v2838_v40 }
  0x46   :  { %2092 = vmatprep.subr.bf16.mxu1 %v2844_v42 }
  0x47   :  { %2062 = vmatpush1.bf16.msra.mxu0 %v2841_v41 }
  0x48   :  { %2096 = vmatprep.subr.bf16.mxu0 %v2757_v4 }
  0x49   :  { %2094 = vmatpush1.bf16.msra.mxu1 %v2848_v47 }
  0x4a   :  { %210 = vmatmul.mubr.f32.vlgmr.msra.gmra.mrb[0].mxu0 %v2707_v0  ;;  %2128 = vmatprep.subr.bf16.mxu1 %v2767_v17 }
  0x4b   :  { %2098 = vmatpush1.bf16.msra.mxu0 %v2759_v8  ;;  %451 = vmatprep.mubr.f32.mxu0 %v2707_v0 }
  0x4c   :  { %2100 = vmatprep.subr.bf16.mxu0 %v2761_v9  ;;  %281 = vmatmul.mubr.f32.vlgmr.msra.gmra.mrb[0].mxu1 %v2707_v0 }
  0x4d   :  { %2130 = vmatpush1.bf16.msra.mxu1 %v2769_v18  ;;  %522 = vmatprep.mubr.f32.mxu1 %v2707_v0 }
  0x4e   :  { %2132 = vmatprep.subr.bf16.mxu1 %v2775_v26 }
  0x4f   :  { %2102 = vmatpush1.bf16.msra.mxu0 %v2765_v16 }
  0x50   :  { %2104 = vmatprep.subr.bf16.mxu0 %v2772_v22 }
  0x51   :  { %2134 = vmatpush1.bf16.msra.mxu1 %v2778_v30 }
  0x52   :  { %2136 = vmatprep.subr.bf16.mxu1 %v2787_v39 }
  0x53   :  { %2106 = vmatpush1.bf16.msra.mxu0 %v2781_v32 }
  0x54   :  { %2108 = vmatprep.subr.bf16.mxu0 %v2785_v36 }
  0x55   :  { %2138 = vmatpush1.bf16.msra.mxu1 %v2790_v44 }
  0x56   :  { %2140 = vmatprep.subr.bf16.mxu1 %v2796_v48 }
  0x57   :  { %2110 = vmatpush1.bf16.msra.mxu0 %v2793_v46 }
  0x58   :  { %2112 = vmatprep.subr.bf16.mxu0 %v2799_v51 }
  0x59   :  { %2142 = vmatpush1.bf16.msra.mxu1 %v2802_v57 }
  0x5a   :  { %2144 = vmatprep.subr.bf16.mxu1 %v2808_v60 }
  0x5b   :  { %2114 = vmatpush1.bf16.msra.mxu0 %v2805_v58 }
  0x5c   :  { %2116 = vmatprep.subr.bf16.mxu0 %v2811_v63 }
  0x5d   :  { %2146 = vmatpush1.bf16.msra.mxu1 %v2814_v7 }
  0x5e   :  { %2148 = vmatprep.subr.bf16.mxu1 %v2820_v12 }
  0x5f   :  { %2118 = vmatpush1.bf16.msra.mxu0 %v2817_v10 }
  0x60   :  { %2120 = vmatprep.subr.bf16.mxu0 %v2823_v15 }
  0x61   :  { %2150 = vmatpush1.bf16.msra.mxu1 %v2826_v25 }
  0x62   :  { %2152 = vmatprep.subr.bf16.mxu1 %v2832_v29 }
  0x63   :  { %2122 = vmatpush1.bf16.msra.mxu0 %v2829_v27 }
  0x64   :  { %2124 = vmatprep.subr.bf16.mxu0 %v2835_v34 }
  0x65   :  { %2154 = vmatpush1.bf16.msra.mxu1 %v2838_v40 }
  0x66   :  { %2156 = vmatprep.subr.bf16.mxu1 %v2844_v42 }
  0x67   :  { %2126 = vmatpush1.bf16.msra.mxu0 %v2841_v41 }
  0x68   :  { %2160 = vmatprep.subr.bf16.mxu0 %v2757_v4  ;;  %v2898_v4 = vrot.slane %v49_v53, %v67_v55 }
  0x69   :  { %2158 = vmatpush1.bf16.msra.mxu1 %v2848_v47 }
  0x6a   :  { %2192 = vmatprep.subr.bf16.mxu1 %v2767_v17  ;;  %v79_v11 = vadd.f32 %v2898_v4, %v54_v2 }
 0x11d   :  { %v211_v6 = vpop.f32.mrb[0].mxu0 }
 0x11e   :  { %v287_v13 = vadd.f32 %v211_v6, %v77_v1  ;;  %v213_v14 = vpop.f32.mrb[1].mxu0 }
 0x11f   :  { %v288_v20 = vadd.f32 %v213_v14, %v78_v5  ;;  %v282_v24 = vpop.f32.mrb[0].mxu1 }
 0x120   :  { %v291_v23 = vmul.f32 0.5, %v287_v13  ;;  %v289_v31 = vadd.f32 %v282_v24, %v79_v11  ;;  %v284_v33 = vpop.f32.mrb[1].mxu1 }
 0x121   :  { %v295_v28 = vmul.f32 0.5, %v288_v20  ;;  %v290_v37 = vadd.f32 %v284_v33, %v80_v35 }
 0x122   :  { %2551 = vtanh.f32 %v291_v23 }
 0x123   :  { %2553 = vtanh.f32 %v295_v28  ;;  %v300_v38 = vmul.f32 0.5, %v290_v37 }
 0x124   :  { %2555 = vtanh.f32 %v289_v31 }
 0x125   :  { %2557 = vtanh.f32 %v300_v38 }
 0x12c   :  { %v2552_v43 = vpop.eup %2551 }
 0x12d   :  { %v2554_v45 = vpop.eup %2553  ;;  %v293_v49 = vmul.f32 0.5, %v2552_v43 }
 0x12e   :  { %v2556_v50 = vpop.eup %2555  ;;  %v297_v52 = vmul.f32 0.5, %v2554_v45 }
 0x12f   :  { %v294_v53 = vadd.f32 0.5, %v293_v49  ;;  %v2558_v1 = vpop.eup %2557 }
 0x130   :  { %v298_v54 = vadd.f32 0.5, %v297_v52  ;;  %v302_v2 = vmul.f32 0.5, %v2558_v1 }
 0x131   :  { %v305_v55 = vmul.f32 %v2556_v50, %v294_v53  ;;  %v825_v53 = vld [vmem:[#allocation7 + $0x80] sm:$0xff] }
 0x132   :  { %v304_v59 = vmul.f32 0.0, %v298_v54  ;;  %v303_v3 = vadd.f32 0.5, %v302_v2  ;;  %v829_v54 = vld [vmem:[#allocation7 + $0xa0] sm:$0xff] }
 0x133   :  { %v833_v2 = vld [vmem:[#allocation7 + $0xc0] sm:$0xff] }
 0x134   :  { %v2906_v62 = vadd.f32 %v305_v55, %v304_v59  ;;  %v2981_v55 = vpack.c.bf16 %v829_v54, %v825_v53  ;;  %v834_v59 = vld [vmem:[#allocation7 + $0xc8] sm:$0xff] }
 0x136   :  { %2559 = vtanh.f32 %v2906_v62 }
 0x140   :  { %v2560_v5 = vpop.eup %2559 }
 0x141   :  { %v308_v6 = vmul.f32 %v2560_v5, %v303_v3  ;;  %v837_v3 = vld [vmem:[#allocation7 + $0xe0] sm:$0xff] }
 0x142   :  { %v2987_v5 = vpack.c.bf16 %v837_v3, %v833_v2 }
 0x143   :  { %311 = vst [vmem:[#allocation9] sm:$0xff] %v308_v6  ;;  %452 = vmatmul.mubr.f32.vlgmr.msra.gmra.mrb[2].mxu0 %v308_v6  ;;  %523 = vmatmul.mubr.f32.vlgmr.msra.gmra.mrb[2].mxu1 %v308_v6  ;;  %v842_v6 = vld [vmem:[#allocation7 + $0x108] sm:$0xff] }
 0x144   :  { %2162 = vmatpush1.bf16.msra.mxu0 %v2759_v8  ;;  %2194 = vmatpush1.bf16.msra.mxu1 %v2769_v18  ;;  %v315_v8 = vld [vmem:[#allocation4 + $0x20] sm:$0xff] }
 0x145   :  { %2164 = vmatprep.subr.bf16.mxu0 %v2761_v9  ;;  %2196 = vmatprep.subr.bf16.mxu1 %v2775_v26  ;;  %v316_v9 = vld [vmem:[#allocation4 + $0x28] sm:$0xff] }
 0x146   :  { %694 = vmatprep.mubr.f32.mxu0 %v2707_v0  ;;  %765 = vmatprep.mubr.f32.mxu1 %v2707_v0 }
 0x148   :  { %2166 = vmatpush1.bf16.msra.mxu0 %v2765_v16  ;;  %2198 = vmatpush1.bf16.msra.mxu1 %v2778_v30  ;;  %v319_v16 = vadd.f32 %v315_v8, %v2894_v56  ;;  %v846_v8 = vld [vmem:[#allocation7 + $0x128] sm:$0xff] }
 0x149   :  { %2168 = vmatprep.subr.bf16.mxu0 %v2772_v22  ;;  %2200 = vmatprep.subr.bf16.mxu1 %v2787_v39  ;;  %v317_v22 = vld [vmem:[#allocation4 + $0x30] sm:$0xff] }
 0x14c   :  { %2170 = vmatpush1.bf16.msra.mxu0 %v2781_v32  ;;  %2202 = vmatpush1.bf16.msra.mxu1 %v2790_v44  ;;  %v320_v32 = vadd.f32 %v316_v9, %v2896_v61  ;;  %v2991_v9 = vpack.c.bf16 %v846_v8, %v842_v6 }
 0x14d   :  { %2172 = vmatprep.subr.bf16.mxu0 %v2785_v36  ;;  %2204 = vmatprep.subr.bf16.mxu1 %v2796_v48 }
 0x150   :  { %2174 = vmatpush1.bf16.msra.mxu0 %v2793_v46  ;;  %2206 = vmatpush1.bf16.msra.mxu1 %v2802_v57 }
 0x151   :  { %2176 = vmatprep.subr.bf16.mxu0 %v2799_v51  ;;  %2208 = vmatprep.subr.bf16.mxu1 %v2808_v60 }
 0x154   :  { %2178 = vmatpush1.bf16.msra.mxu0 %v2805_v58  ;;  %2210 = vmatpush1.bf16.msra.mxu1 %v2814_v7  ;;  %v321_v58 = vadd.f32 %v317_v22, %v2898_v4  ;;  %v845_v22 = vld [vmem:[#allocation7 + $0x120] sm:$0xff] }
 0x155   :  { %2180 = vmatprep.subr.bf16.mxu0 %v2811_v63  ;;  %2212 = vmatprep.subr.bf16.mxu1 %v2820_v12 }
 0x158   :  { %2182 = vmatpush1.bf16.msra.mxu0 %v2817_v10  ;;  %2214 = vmatpush1.bf16.msra.mxu1 %v2826_v25 }
 0x159   :  { %2184 = vmatprep.subr.bf16.mxu0 %v2823_v15  ;;  %2216 = vmatprep.subr.bf16.mxu1 %v2832_v29 }
 0x15c   :  { %2186 = vmatpush1.bf16.msra.mxu0 %v2829_v27  ;;  %2218 = vmatpush1.bf16.msra.mxu1 %v2838_v40  ;;  %v318_v27 = vld [vmem:[#allocation4 + $0x38] sm:$0xff] }
 0x15d   :  { %2188 = vmatprep.subr.bf16.mxu0 %v2835_v34  ;;  %2220 = vmatprep.subr.bf16.mxu1 %v2844_v42  ;;  %v322_v11 = vadd.f32 %v318_v27, %v2903_v19  ;;  %v862_v27 = vld [vmem:[#allocation7 + $0x1a8] sm:$0xff] }
 0x160   :  { %2190 = vmatpush1.bf16.msra.mxu0 %v2841_v41  ;;  %2222 = vmatpush1.bf16.msra.mxu1 %v2848_v47 }
 0x161   :  { %2256 = vmatprep.subr.bf16.mxu1 %v2767_v17 }
 0x216   :  { %v453_v36 = vpop.f32.mrb[2].mxu0  ;;  %v524_v46 = vpop.f32.mrb[2].mxu1 }
 0x217   :  { %v529_v51 = vadd.f32 %v453_v36, %v319_v16  ;;  %v455_v63 = vpop.f32.mrb[3].mxu0  ;;  %v526_v10 = vpop.f32.mrb[3].mxu1  ;;  %v531_v17 = vadd.f32 %v524_v46, %v321_v58  ;;  %v841_v16 = vld [vmem:[#allocation7 + $0x100] sm:$0xff]  ;;  %v850_v36 = vld [vmem:[#allocation7 + $0x148] sm:$0xff] }
 0x218   :  { %v530_v15 = vadd.f32 %v455_v63, %v320_v32  ;;  %v532_v13 = vadd.f32 %v526_v10, %v322_v11  ;;  %v2993_v32 = vpack.c.bf16 %v845_v22, %v841_v16  ;;  %v854_v46 = vld [vmem:[#allocation7 + $0x168] sm:$0xff]  ;;  %v849_v58 = vld [vmem:[#allocation7 + $0x140] sm:$0xff] }
 0x219   :  { %v533_v34 = vmul.f32 0.5, %v529_v51  ;;  %v2997_v51 = vpack.c.bf16 %v854_v46, %v850_v36  ;;  %v853_v63 = vld [vmem:[#allocation7 + $0x160] sm:$0xff] }
 0x21a   :  { %v537_v41 = vmul.f32 0.5, %v530_v15  ;;  %v542_v14 = vmul.f32 0.5, %v532_v13  ;;  %v2999_v10 = vpack.c.bf16 %v853_v63, %v849_v58  ;;  %v858_v15 = vld [vmem:[#allocation7 + $0x188] sm:$0xff] }
 0x21b   :  { %2561 = vtanh.f32 %v533_v34  ;;  %v3003_v34 = vpack.c.bf16 %v862_v27, %v858_v15  ;;  %v866_v13 = vld [vmem:[#allocation7 + $0x1c8] sm:$0xff]  ;;  %v1059_v15 = vld [vmem:[#allocation7 + $0x38] sm:$0xff] }
 0x21c   :  { %2563 = vtanh.f32 %v537_v41  ;;  %v857_v41 = vld [vmem:[#allocation7 + $0x180] sm:$0xff] }
 0x21d   :  { %2565 = vtanh.f32 %v531_v17  ;;  %v861_v17 = vld [vmem:[#allocation7 + $0x1a0] sm:$0xff] }
 0x21e   :  { %2567 = vtanh.f32 %v542_v14  ;;  %v3005_v11 = vpack.c.bf16 %v861_v17, %v857_v41  ;;  %v870_v14 = vld [vmem:[#allocation7 + $0x1e8] sm:$0xff]  ;;  %v1054_v41 = vld [vmem:[#allocation7 + $0x10] sm:$0xff] }
 0x21f   :  { %v1058_v17 = vld [vmem:[#allocation7 + $0x30] sm:$0xff] }
 0x225   :  { %v2562_v20 = vpop.eup %2561 }
 0x226   :  { %v2564_v21 = vpop.eup %2563  ;;  %v535_v23 = vmul.f32 0.5, %v2562_v20  ;;  %v3009_v20 = vpack.c.bf16 %v870_v14, %v866_v13  ;;  %v3044_v13 = vpack.c.bf16 %v1058_v17, %v1054_v41  ;;  %v1063_v14 = vld [vmem:[#allocation7 + $0x58] sm:$0xff]  ;;  %v1110_v17 = vld [vmem:[#allocation7 + $0x1d0] sm:$0xff] }
 0x227   :  { %v539_v24 = vmul.f32 0.5, %v2564_v21  ;;  %v2566_v31 = vpop.eup %2565  ;;  %v865_v21 = vld [vmem:[#allocation7 + $0x1c0] sm:$0xff] }
 0x228   :  { %v536_v28 = vadd.f32 0.5, %v535_v23  ;;  %v2568_v43 = vpop.eup %2567  ;;  %v869_v23 = vld [vmem:[#allocation7 + $0x1e0] sm:$0xff] }
 0x229   :  { %v540_v33 = vadd.f32 0.5, %v539_v24  ;;  %v544_v45 = vmul.f32 0.5, %v2568_v43  ;;  %v3011_v24 = vpack.c.bf16 %v869_v23, %v865_v21  ;;  %v1067_v21 = vld [vmem:[#allocation7 + $0x78] sm:$0xff] }
 0x22a   :  { %v547_v35 = vmul.f32 %v2566_v31, %v536_v28  ;;  %v558_v28 = vld [vmem:[#allocation4 + $0x40] sm:$0xff]  ;;  %v559_v31 = vld [vmem:[#allocation4 + $0x48] sm:$0xff]  ;;  %v3048_v23 = vpack.c.bf16 %v1067_v21, %v1063_v14  ;;  %v1114_v14 = vld [vmem:[#allocation7 + $0x1f0] sm:$0xff] }
 0x22b   :  { %v546_v37 = vmul.f32 %v540_v33, %v2906_v62  ;;  %v545_v49 = vadd.f32 0.5, %v544_v45  ;;  %v838_v62 = vld [vmem:[#allocation7 + $0xe8] sm:$0xff]  ;;  %v562_v33 = vadd.f32 %v558_v28, %v2894_v56  ;;  %v1062_v28 = vld [vmem:[#allocation7 + $0x50] sm:$0xff]  ;;  %v3086_v21 = vpack.c.bf16 %v1114_v14, %v1110_v17 }
 0x22c   :  { %v2985_v1 = vpack.c.bf16 %v838_v62, %v834_v59 }
 0x22d   :  { %v2947_v38 = vadd.f32 %v547_v35, %v546_v37  ;;  %v560_v35 = vld [vmem:[#allocation4 + $0x50] sm:$0xff]  ;;  %v563_v37 = vadd.f32 %v559_v31, %v2896_v61 }
 0x22e   :  { %v1066_v31 = vld [vmem:[#allocation7 + $0x70] sm:$0xff] }
 0x22f   :  { %2569 = vtanh.f32 %v2947_v38 }
 0x239   :  { %v2570_v50 = vpop.eup %2569 }
 0x23a   :  { %v550_v52 = vmul.f32 %v2570_v50, %v545_v49  ;;  %v564_v50 = vadd.f32 %v560_v35, %v2898_v4  ;;  %v1071_v35 = vld [vmem:[#allocation7 + $0x98] sm:$0xff] }
 0x23c   :  { %554 = vst [vmem:[#allocation9 + $0x8] sm:$0xff] %v550_v52  ;;  %695 = vmatmul.mubr.f32.vlgmr.msra.gmra.mrb[4].mxu0 %v550_v52  ;;  %766 = vmatmul.mubr.f32.vlgmr.msra.gmra.mrb[4].mxu1 %v550_v52 }
 0x23d   :  { %2258 = vmatpush1.bf16.msra.mxu1 %v2769_v18  ;;  %937 = vmatprep.mubr.f32.mxu0 %v2707_v0  ;;  %v810_v18 = vld [vmem:[#allocation7 + $0x8] sm:$0xff] }
 0x23e   :  { %2260 = vmatprep.subr.bf16.mxu1 %v2775_v26  ;;  %1008 = vmatprep.mubr.f32.mxu1 %v2707_v0  ;;  %v814_v26 = vld [vmem:[#allocation7 + $0x28] sm:$0xff] }
 0x241   :  { %2262 = vmatpush1.bf16.msra.mxu1 %v2778_v30  ;;  %v2967_v30 = vpack.c.bf16 %v814_v26, %v810_v18 }
 0x242   :  { %2264 = vmatprep.subr.bf16.mxu1 %v2787_v39  ;;  %v809_v39 = vld [vmem:[#allocation7] sm:$0xff] }
 0x243   :  { %2224 = vmatprep.subr.bf16.mxu0 %v2967_v30 }
 0x245   :  { %2266 = vmatpush1.bf16.msra.mxu1 %v2790_v44  ;;  %v813_v44 = vld [vmem:[#allocation7 + $0x20] sm:$0xff] }
 0x246   :  { %2268 = vmatprep.subr.bf16.mxu1 %v2796_v48  ;;  %v2969_v48 = vpack.c.bf16 %v813_v44, %v809_v39  ;;  %v561_v39 = vld [vmem:[#allocation4 + $0x58] sm:$0xff] }
 0x248   :  { %2226 = vmatpush1.bf16.msra.mxu0 %v2969_v48 }
 0x249   :  { %2270 = vmatpush1.bf16.msra.mxu1 %v2802_v57  ;;  %v818_v57 = vld [vmem:[#allocation7 + $0x48] sm:$0xff] }
 0x24a   :  { %2272 = vmatprep.subr.bf16.mxu1 %v2808_v60  ;;  %v822_v60 = vld [vmem:[#allocation7 + $0x68] sm:$0xff] }
 0x24d   :  { %2274 = vmatpush1.bf16.msra.mxu1 %v2814_v7  ;;  %v2973_v7 = vpack.c.bf16 %v822_v60, %v818_v57 }
 0x24e   :  { %2276 = vmatprep.subr.bf16.mxu1 %v2820_v12  ;;  %v817_v12 = vld [vmem:[#allocation7 + $0x40] sm:$0xff] }
 0x24f   :  { %2228 = vmatprep.subr.bf16.mxu0 %v2973_v7 }
 0x251   :  { %2278 = vmatpush1.bf16.msra.mxu1 %v2826_v25  ;;  %v821_v25 = vld [vmem:[#allocation7 + $0x60] sm:$0xff] }
 0x252   :  { %2280 = vmatprep.subr.bf16.mxu1 %v2832_v29  ;;  %v2975_v29 = vpack.c.bf16 %v821_v25, %v817_v12  ;;  %v565_v12 = vadd.f32 %v561_v39, %v2903_v19  ;;  %v1078_v39 = vld [vmem:[#allocation7 + $0xd0] sm:$0xff] }
 0x254   :  { %2230 = vmatpush1.bf16.msra.mxu0 %v2975_v29 }
 0x255   :  { %2282 = vmatpush1.bf16.msra.mxu1 %v2838_v40  ;;  %v826_v40 = vld [vmem:[#allocation7 + $0x88] sm:$0xff] }
 0x256   :  { %2284 = vmatprep.subr.bf16.mxu1 %v2844_v42  ;;  %v830_v42 = vld [vmem:[#allocation7 + $0xa8] sm:$0xff] }
 0x259   :  { %2286 = vmatpush1.bf16.msra.mxu1 %v2848_v47  ;;  %v2979_v47 = vpack.c.bf16 %v830_v42, %v826_v40 }
 0x25b   :  { %2232 = vmatprep.subr.bf16.mxu0 %v2979_v47 }
 0x25c   :  { %2234 = vmatpush1.bf16.msra.mxu0 %v2981_v55 }
 0x25d   :  { %2236 = vmatprep.subr.bf16.mxu0 %v2985_v1 }
 0x260   :  { %2238 = vmatpush1.bf16.msra.mxu0 %v2987_v5 }
 0x261   :  { %2240 = vmatprep.subr.bf16.mxu0 %v2991_v9 }
 0x264   :  { %2242 = vmatpush1.bf16.msra.mxu0 %v2993_v32 }
 0x265   :  { %2244 = vmatprep.subr.bf16.mxu0 %v2997_v51 }
 0x268   :  { %2246 = vmatpush1.bf16.msra.mxu0 %v2999_v10 }
 0x269   :  { %2248 = vmatprep.subr.bf16.mxu0 %v3003_v34 }
 0x26c   :  { %2250 = vmatpush1.bf16.msra.mxu0 %v3005_v11 }
 0x26d   :  { %2252 = vmatprep.subr.bf16.mxu0 %v3009_v20 }
 0x270   :  { %2254 = vmatpush1.bf16.msra.mxu0 %v3011_v24 }
 0x271   :  { %2288 = vmatprep.subr.bf16.mxu0 %v2967_v30 }
 0x30f   :  { %v696_v43 = vpop.f32.mrb[4].mxu0  ;;  %v767_v45 = vpop.f32.mrb[4].mxu1 }
 0x310   :  { %v772_v49 = vadd.f32 %v696_v43, %v562_v33  ;;  %v698_v52 = vpop.f32.mrb[5].mxu0  ;;  %v769_v18 = vpop.f32.mrb[5].mxu1  ;;  %v774_v60 = vadd.f32 %v767_v45, %v564_v50  ;;  %v3050_v33 = vpack.c.bf16 %v1066_v31, %v1062_v28  ;;  %v1070_v45 = vld [vmem:[#allocation7 + $0x90] sm:$0xff]  ;;  %v801_v28 = vld [vmem:[#allocation4 + $0x60] sm:$0xff]  ;;  %v802_v31 = vld [vmem:[#allocation4 + $0x68] sm:$0xff] }
 0x311   :  { %v773_v26 = vadd.f32 %v698_v52, %v563_v37  ;;  %v775_v25 = vadd.f32 %v769_v18, %v565_v12  ;;  %v1075_v37 = vld [vmem:[#allocation7 + $0xb8] sm:$0xff] }
 0x312   :  { %v776_v44 = vmul.f32 0.5, %v772_v49  ;;  %v3054_v43 = vpack.c.bf16 %v1075_v37, %v1071_v35  ;;  %v1074_v49 = vld [vmem:[#allocation7 + $0xb0] sm:$0xff]  ;;  %v1079_v52 = vld [vmem:[#allocation7 + $0xd8] sm:$0xff]  ;;  %v805_v35 = vadd.f32 %v801_v28, %v2894_v56 }
 0x313   :  { %v780_v57 = vmul.f32 0.5, %v773_v26  ;;  %v785_v40 = vmul.f32 0.5, %v775_v25  ;;  %v3056_v50 = vpack.c.bf16 %v1074_v49, %v1070_v45  ;;  %v1083_v18 = vld [vmem:[#allocation7 + $0xf8] sm:$0xff]  ;;  %v803_v37 = vld [vmem:[#allocation4 + $0x70] sm:$0xff]  ;;  %v806_v45 = vadd.f32 %v802_v31, %v2896_v61 }
 0x314   :  { %2571 = vtanh.f32 %v776_v44  ;;  %v3060_v26 = vpack.c.bf16 %v1083_v18, %v1079_v52  ;;  %v1082_v44 = vld [vmem:[#allocation7 + $0xf0] sm:$0xff]  ;;  %v1091_v12 = vld [vmem:[#allocation7 + $0x138] sm:$0xff] }
 0x315   :  { %2573 = vtanh.f32 %v780_v57  ;;  %v3062_v57 = vpack.c.bf16 %v1082_v44, %v1078_v39  ;;  %v807_v39 = vadd.f32 %v803_v37, %v2898_v4 }
 0x316   :  { %2575 = vtanh.f32 %v774_v60  ;;  %v1087_v60 = vld [vmem:[#allocation7 + $0x118] sm:$0xff] }
 0x317   :  { %2577 = vtanh.f32 %v785_v40  ;;  %v3066_v25 = vpack.c.bf16 %v1091_v12, %v1087_v60  ;;  %v1086_v40 = vld [vmem:[#allocation7 + $0x110] sm:$0xff] }
 0x31e   :  { %v2572_v42 = vpop.eup %2571 }
 0x31f   :  { %v2574_v53 = vpop.eup %2573  ;;  %v778_v54 = vmul.f32 0.5, %v2572_v42  ;;  %v1090_v42 = vld [vmem:[#allocation7 + $0x130] sm:$0xff] }
 0x320   :  { %v782_v59 = vmul.f32 0.5, %v2574_v53  ;;  %v2576_v2 = vpop.eup %2575  ;;  %v3068_v53 = vpack.c.bf16 %v1090_v42, %v1086_v40  ;;  %v804_v40 = vld [vmem:[#allocation4 + $0x78] sm:$0xff] }
 0x321   :  { %v779_v62 = vadd.f32 0.5, %v778_v54  ;;  %v2578_v22 = vpop.eup %2577  ;;  %v1095_v54 = vld [vmem:[#allocation7 + $0x158] sm:$0xff] }
 0x322   :  { %v783_v3 = vadd.f32 0.5, %v782_v59  ;;  %v787_v36 = vmul.f32 0.5, %v2578_v22  ;;  %v1099_v59 = vld [vmem:[#allocation7 + $0x178] sm:$0xff] }
 0x323   :  { %v790_v6 = vmul.f32 %v2576_v2, %v779_v62  ;;  %v3072_v62 = vpack.c.bf16 %v1099_v59, %v1095_v54  ;;  %v1094_v2 = vld [vmem:[#allocation7 + $0x150] sm:$0xff]  ;;  %v1107_v22 = vld [vmem:[#allocation7 + $0x1b8] sm:$0xff] }
 0x324   :  { %v789_v8 = vmul.f32 %v783_v3, %v2947_v38  ;;  %v788_v46 = vadd.f32 0.5, %v787_v36  ;;  %v1055_v38 = vld [vmem:[#allocation7 + $0x18] sm:$0xff]  ;;  %v1098_v3 = vld [vmem:[#allocation7 + $0x170] sm:$0xff] }
 0x325   :  { %v3042_v27 = vpack.c.bf16 %v1059_v15, %v1055_v38  ;;  %v1111_v38 = vld [vmem:[#allocation7 + $0x1d8] sm:$0xff] }
 0x326   :  { %v3021_v16 = vadd.f32 %v790_v6, %v789_v8  ;;  %v3074_v6 = vpack.c.bf16 %v1098_v3, %v1094_v2  ;;  %v1103_v8 = vld [vmem:[#allocation7 + $0x198] sm:$0xff]  ;;  %v808_v2 = vadd.f32 %v804_v40, %v2903_v19 }
 0x327   :  { %2320 = vmatprep.subr.bf16.mxu1 %v3042_v27  ;;  %v3078_v36 = vpack.c.bf16 %v1107_v22, %v1103_v8  ;;  %v1115_v15 = vld [vmem:[#allocation7 + $0x1f8] sm:$0xff] }
 0x328   :  { %2579 = vtanh.f32 %v3021_v16  ;;  %v3084_v41 = vpack.c.bf16 %v1115_v15, %v1111_v38 }
 0x332   :  { %v2580_v58 = vpop.eup %2579 }
 0x333   :  { %v793_v63 = vmul.f32 %v2580_v58, %v788_v46  ;;  %v1102_v46 = vld [vmem:[#allocation7 + $0x190] sm:$0xff] }
 0x334   :  { %v1106_v58 = vld [vmem:[#allocation7 + $0x1b0] sm:$0xff] }
 0x335   :  { %797 = vst [vmem:[#allocation9 + $0x10] sm:$0xff] %v793_v63  ;;  %938 = vmatmul.mubr.f32.vlgmr.msra.gmra.mrb[6].mxu0 %v793_v63  ;;  %1009 = vmatmul.mubr.f32.vlgmr.msra.gmra.mrb[6].mxu1 %v793_v63  ;;  %v3080_v63 = vpack.c.bf16 %v1106_v58, %v1102_v46 }
 0x336   :  { %2290 = vmatpush1.bf16.msra.mxu0 %v2969_v48  ;;  %1180 = vmatprep.mubr.f32.mxu0 %v2707_v0 }
 0x337   :  { %2292 = vmatprep.subr.bf16.mxu0 %v2973_v7  ;;  %1251 = vmatprep.mubr.f32.mxu1 %v2707_v0 }
 0x338   :  { %2322 = vmatpush1.bf16.msra.mxu1 %v3044_v13 }
 0x339   :  { %2324 = vmatprep.subr.bf16.mxu1 %v3048_v23 }
 0x33a   :  { %2294 = vmatpush1.bf16.msra.mxu0 %v2975_v29 }
 0x33b   :  { %2296 = vmatprep.subr.bf16.mxu0 %v2979_v47 }
 0x33c   :  { %2326 = vmatpush1.bf16.msra.mxu1 %v3050_v33 }
 0x33d   :  { %2328 = vmatprep.subr.bf16.mxu1 %v3054_v43 }
 0x33e   :  { %2298 = vmatpush1.bf16.msra.mxu0 %v2981_v55 }
 0x33f   :  { %2300 = vmatprep.subr.bf16.mxu0 %v2985_v1 }
 0x340   :  { %2330 = vmatpush1.bf16.msra.mxu1 %v3056_v50 }
 0x341   :  { %2332 = vmatprep.subr.bf16.mxu1 %v3060_v26 }
 0x342   :  { %2302 = vmatpush1.bf16.msra.mxu0 %v2987_v5 }
 0x343   :  { %2304 = vmatprep.subr.bf16.mxu0 %v2991_v9 }
 0x344   :  { %2334 = vmatpush1.bf16.msra.mxu1 %v3062_v57 }
 0x345   :  { %2336 = vmatprep.subr.bf16.mxu1 %v3066_v25 }
 0x346   :  { %2306 = vmatpush1.bf16.msra.mxu0 %v2993_v32 }
 0x347   :  { %2308 = vmatprep.subr.bf16.mxu0 %v2997_v51 }
 0x348   :  { %2338 = vmatpush1.bf16.msra.mxu1 %v3068_v53 }
 0x349   :  { %2340 = vmatprep.subr.bf16.mxu1 %v3072_v62 }
 0x34a   :  { %2310 = vmatpush1.bf16.msra.mxu0 %v2999_v10 }
 0x34b   :  { %2312 = vmatprep.subr.bf16.mxu0 %v3003_v34 }
 0x34c   :  { %2342 = vmatpush1.bf16.msra.mxu1 %v3074_v6 }
 0x34d   :  { %2344 = vmatprep.subr.bf16.mxu1 %v3078_v36 }
 0x34e   :  { %2314 = vmatpush1.bf16.msra.mxu0 %v3005_v11 }
 0x34f   :  { %2316 = vmatprep.subr.bf16.mxu0 %v3009_v20 }
 0x350   :  { %2346 = vmatpush1.bf16.msra.mxu1 %v3080_v63 }
 0x351   :  { %2348 = vmatprep.subr.bf16.mxu1 %v3084_v41 }
 0x352   :  { %2318 = vmatpush1.bf16.msra.mxu0 %v3011_v24 }
 0x353   :  { %2352 = vmatprep.subr.bf16.mxu0 %v2967_v30 }
 0x354   :  { %2350 = vmatpush1.bf16.msra.mxu1 %v3086_v21 }
 0x355   :  { %2384 = vmatprep.subr.bf16.mxu1 %v3042_v27 }
 0x408   :  { %v939_v49 = vpop.f32.mrb[6].mxu0  ;;  %v1010_v52 = vpop.f32.mrb[6].mxu1 }
 0x409   :  { %v1015_v18 = vadd.f32 %v939_v49, %v805_v35  ;;  %v941_v44 = vpop.f32.mrb[7].mxu0  ;;  %v1012_v60 = vpop.f32.mrb[7].mxu1  ;;  %v1017_v59 = vadd.f32 %v1010_v52, %v807_v39  ;;  %v1045_v39 = vld [vmem:[#allocation4 + $0x88] sm:$0xff] }
 0x40a   :  { %v1016_v12 = vadd.f32 %v941_v44, %v806_v45  ;;  %v1018_v3 = vadd.f32 %v1012_v60, %v808_v2  ;;  %v1046_v60 = vld [vmem:[#allocation4 + $0x90] sm:$0xff] }
 0x40b   :  { %v1019_v42 = vmul.f32 0.5, %v1015_v18 }
 0x40c   :  { %v1023_v54 = vmul.f32 0.5, %v1016_v12  ;;  %v1028_v8 = vmul.f32 0.5, %v1018_v3  ;;  %v1049_v12 = vadd.f32 %v1045_v39, %v2896_v61 }
 0x40d   :  { %2581 = vtanh.f32 %v1019_v42 }
 0x40e   :  { %2583 = vtanh.f32 %v1023_v54 }
 0x40f   :  { %2585 = vtanh.f32 %v1017_v59  ;;  %v1050_v59 = vadd.f32 %v1046_v60, %v2898_v4 }
 0x410   :  { %2587 = vtanh.f32 %v1028_v8 }
 0x417   :  { %v2582_v22 = vpop.eup %2581 }
 0x418   :  { %v2584_v46 = vpop.eup %2583  ;;  %v1021_v58 = vmul.f32 0.5, %v2582_v22  ;;  %v1047_v22 = vld [vmem:[#allocation4 + $0x98] sm:$0xff] }
 0x419   :  { %v1025_v38 = vmul.f32 0.5, %v2584_v46  ;;  %v2586_v17 = vpop.eup %2585 }
 0x41a   :  { %v1022_v15 = vadd.f32 0.5, %v1021_v58  ;;  %v2588_v37 = vpop.eup %2587 }
 0x41b   :  { %v1026_v14 = vadd.f32 0.5, %v1025_v38  ;;  %v1030_v45 = vmul.f32 0.5, %v2588_v37  ;;  %v1051_v38 = vadd.f32 %v1047_v22, %v2903_v19 }
 0x41c   :  { %v1033_v28 = vmul.f32 %v2586_v17, %v1022_v15 }
 0x41d   :  { %v1032_v31 = vmul.f32 %v1026_v14, %v3021_v16  ;;  %v1031_v49 = vadd.f32 0.5, %v1030_v45  ;;  %v1044_v16 = vld [vmem:[#allocation4 + $0x80] sm:$0xff] }
 0x41e   :  { %v1048_v44 = vadd.f32 %v1044_v16, %v2894_v56 }
 0x41f   :  { %v3096_v35 = vadd.f32 %v1033_v28, %v1032_v31 }
 0x421   :  { %2589 = vtanh.f32 %v3096_v35 }
 0x42b   :  { %v2590_v52 = vpop.eup %2589 }
 0x42c   :  { %v1036_v18 = vmul.f32 %v2590_v52, %v1031_v49 }
 0x42e   :  { %1040 = vst [vmem:[#allocation9 + $0x18] sm:$0xff] %v1036_v18  ;;  %1181 = vmatmul.mubr.f32.vlgmr.msra.gmra.mrb[8].mxu0 %v1036_v18  ;;  %1252 = vmatmul.mubr.f32.vlgmr.msra.gmra.mrb[8].mxu1 %v1036_v18 }
 0x42f   :  { %2354 = vmatpush1.bf16.msra.mxu0 %v2969_v48  ;;  %2386 = vmatpush1.bf16.msra.mxu1 %v3044_v13 }
 0x430   :  { %2356 = vmatprep.subr.bf16.mxu0 %v2973_v7  ;;  %2388 = vmatprep.subr.bf16.mxu1 %v3048_v23 }
 0x431   :  { %1423 = vmatprep.mubr.f32.mxu0 %v2707_v0  ;;  %1494 = vmatprep.mubr.f32.mxu1 %v2707_v0 }
 0x433   :  { %2358 = vmatpush1.bf16.msra.mxu0 %v2975_v29  ;;  %2390 = vmatpush1.bf16.msra.mxu1 %v3050_v33 }
 0x434   :  { %2360 = vmatprep.subr.bf16.mxu0 %v2979_v47  ;;  %2392 = vmatprep.subr.bf16.mxu1 %v3054_v43 }
 0x437   :  { %2362 = vmatpush1.bf16.msra.mxu0 %v2981_v55  ;;  %2394 = vmatpush1.bf16.msra.mxu1 %v3056_v50 }
 0x438   :  { %2364 = vmatprep.subr.bf16.mxu0 %v2985_v1  ;;  %2396 = vmatprep.subr.bf16.mxu1 %v3060_v26 }
 0x43b   :  { %2366 = vmatpush1.bf16.msra.mxu0 %v2987_v5  ;;  %2398 = vmatpush1.bf16.msra.mxu1 %v3062_v57 }
 0x43c   :  { %2368 = vmatprep.subr.bf16.mxu0 %v2991_v9  ;;  %2400 = vmatprep.subr.bf16.mxu1 %v3066_v25 }
 0x43f   :  { %2370 = vmatpush1.bf16.msra.mxu0 %v2993_v32  ;;  %2402 = vmatpush1.bf16.msra.mxu1 %v3068_v53 }
 0x440   :  { %2372 = vmatprep.subr.bf16.mxu0 %v2997_v51  ;;  %2404 = vmatprep.subr.bf16.mxu1 %v3072_v62 }
 0x443   :  { %2374 = vmatpush1.bf16.msra.mxu0 %v2999_v10  ;;  %2406 = vmatpush1.bf16.msra.mxu1 %v3074_v6 }
 0x444   :  { %2376 = vmatprep.subr.bf16.mxu0 %v3003_v34  ;;  %2408 = vmatprep.subr.bf16.mxu1 %v3078_v36 }
 0x447   :  { %2378 = vmatpush1.bf16.msra.mxu0 %v3005_v11  ;;  %2410 = vmatpush1.bf16.msra.mxu1 %v3080_v63 }
 0x448   :  { %2380 = vmatprep.subr.bf16.mxu0 %v3009_v20  ;;  %2412 = vmatprep.subr.bf16.mxu1 %v3084_v41 }
 0x44b   :  { %2382 = vmatpush1.bf16.msra.mxu0 %v3011_v24  ;;  %2414 = vmatpush1.bf16.msra.mxu1 %v3086_v21 }
 0x44c   :  { %2416 = vmatprep.subr.bf16.mxu0 %v2967_v30  ;;  %2448 = vmatprep.subr.bf16.mxu1 %v3042_v27 }
 0x501   :  { %v1182_v40 = vpop.f32.mrb[8].mxu0  ;;  %v1253_v42 = vpop.f32.mrb[8].mxu1 }
 0x502   :  { %v1258_v54 = vadd.f32 %v1182_v40, %v1048_v44  ;;  %v1184_v2 = vpop.f32.mrb[9].mxu0  ;;  %v1255_v3 = vpop.f32.mrb[9].mxu1  ;;  %v1260_v58 = vadd.f32 %v1253_v42, %v1050_v59 }
 0x503   :  { %v1259_v8 = vadd.f32 %v1184_v2, %v1049_v12  ;;  %v1261_v15 = vadd.f32 %v1255_v3, %v1051_v38 }
 0x504   :  { %v1262_v46 = vmul.f32 0.5, %v1258_v54 }
 0x505   :  { %v1266_v30 = vmul.f32 0.5, %v1259_v8  ;;  %v1271_v17 = vmul.f32 0.5, %v1261_v15 }
 0x506   :  { %2591 = vtanh.f32 %v1262_v46 }
 0x507   :  { %2593 = vtanh.f32 %v1266_v30 }
 0x508   :  { %2595 = vtanh.f32 %v1260_v58 }
 0x509   :  { %2597 = vtanh.f32 %v1271_v17 }
 0x510   :  { %v2592_v14 = vpop.eup %2591 }
 0x511   :  { %v2594_v28 = vpop.eup %2593  ;;  %v1264_v31 = vmul.f32 0.5, %v2592_v14 }
 0x512   :  { %v1268_v37 = vmul.f32 0.5, %v2594_v28  ;;  %v2596_v49 = vpop.eup %2595 }
 0x513   :  { %v1265_v45 = vadd.f32 0.5, %v1264_v31  ;;  %v2598_v44 = vpop.eup %2597 }
 0x514   :  { %v1269_v52 = vadd.f32 0.5, %v1268_v37  ;;  %v1273_v60 = vmul.f32 0.5, %v2598_v44  ;;  %v1805_v44 = vld [vmem:[#allocation7 + $0xc0] sm:$0xff] }
 0x515   :  { %v1276_v18 = vmul.f32 %v2596_v49, %v1265_v45  ;;  %v1801_v49 = vld [vmem:[#allocation7 + $0xa0] sm:$0xff] }
 0x516   :  { %v1275_v16 = vmul.f32 %v1269_v52, %v3096_v35  ;;  %v1274_v12 = vadd.f32 0.5, %v1273_v60  ;;  %v1809_v60 = vld [vmem:[#allocation7 + $0xe0] sm:$0xff] }
 0x518   :  { %v3138_v39 = vadd.f32 %v1276_v18, %v1275_v16  ;;  %v1806_v18 = vld [vmem:[#allocation7 + $0xc8] sm:$0xff] }
 0x519   :  { %v1810_v16 = vld [vmem:[#allocation7 + $0xe8] sm:$0xff] }
 0x51a   :  { %2599 = vtanh.f32 %v3138_v39 }
 0x524   :  { %v2600_v40 = vpop.eup %2599 }
 0x525   :  { %v1279_v42 = vmul.f32 %v2600_v40, %v1274_v12  ;;  %v2493_v12 = vpack.c.bf16 %v1809_v60, %v1805_v44  ;;  %v1814_v40 = vld [vmem:[#allocation7 + $0x108] sm:$0xff] }
 0x527   :  { %1283 = vst [vmem:[#allocation9 + $0x20] sm:$0xff] %v1279_v42  ;;  %1424 = vmatmul.mubr.f32.vlgmr.msra.gmra.mrb[10].mxu0 %v1279_v42  ;;  %1495 = vmatmul.mubr.f32.vlgmr.msra.gmra.mrb[10].mxu1 %v1279_v42  ;;  %v1818_v42 = vld [vmem:[#allocation7 + $0x128] sm:$0xff] }
 0x528   :  { %2418 = vmatpush1.bf16.msra.mxu0 %v2969_v48  ;;  %2450 = vmatpush1.bf16.msra.mxu1 %v3044_v13  ;;  %v1287_v48 = vld [vmem:[#allocation4 + $0xa0] sm:$0xff] }
 0x529   :  { %2420 = vmatprep.subr.bf16.mxu0 %v2973_v7  ;;  %2452 = vmatprep.subr.bf16.mxu1 %v3048_v23  ;;  %v1288_v7 = vld [vmem:[#allocation4 + $0xa8] sm:$0xff] }
 0x52a   :  { %1666 = vmatprep.mubr.f32.mxu0 %v2707_v0  ;;  %1737 = vmatprep.mubr.f32.mxu1 %v2707_v0 }
 0x52c   :  { %2422 = vmatpush1.bf16.msra.mxu0 %v2975_v29  ;;  %2454 = vmatpush1.bf16.msra.mxu1 %v3050_v33  ;;  %v1291_v29 = vadd.f32 %v1287_v48, %v2894_v56  ;;  %v2495_v48 = vpack.c.bf16 %v1818_v42, %v1814_v40  ;;  %v1774_v40 = vld [vmem:[#allocation4 + $0xe8] sm:$0xff] }
 0x52d   :  { %2424 = vmatprep.subr.bf16.mxu0 %v2979_v47  ;;  %2456 = vmatprep.subr.bf16.mxu1 %v3054_v43  ;;  %v1289_v47 = vld [vmem:[#allocation4 + $0xb0] sm:$0xff] }
 0x530   :  { %2426 = vmatpush1.bf16.msra.mxu0 %v2981_v55  ;;  %2458 = vmatpush1.bf16.msra.mxu1 %v3056_v50  ;;  %v1292_v55 = vadd.f32 %v1288_v7, %v2896_v61  ;;  %v1813_v7 = vld [vmem:[#allocation7 + $0x100] sm:$0xff] }
 0x531   :  { %2428 = vmatprep.subr.bf16.mxu0 %v2985_v1  ;;  %2460 = vmatprep.subr.bf16.mxu1 %v3060_v26 }
 0x534   :  { %2430 = vmatpush1.bf16.msra.mxu0 %v2987_v5  ;;  %2462 = vmatpush1.bf16.msra.mxu1 %v3062_v57 }
 0x535   :  { %2432 = vmatprep.subr.bf16.mxu0 %v2991_v9  ;;  %2464 = vmatprep.subr.bf16.mxu1 %v3066_v25 }
 0x538   :  { %2434 = vmatpush1.bf16.msra.mxu0 %v2993_v32  ;;  %2466 = vmatpush1.bf16.msra.mxu1 %v3068_v53  ;;  %v1293_v32 = vadd.f32 %v1289_v47, %v2898_v4 }
 0x539   :  { %2436 = vmatprep.subr.bf16.mxu0 %v2997_v51  ;;  %2468 = vmatprep.subr.bf16.mxu1 %v3072_v62 }
 0x53c   :  { %2438 = vmatpush1.bf16.msra.mxu0 %v2999_v10  ;;  %2470 = vmatpush1.bf16.msra.mxu1 %v3074_v6 }
 0x53d   :  { %2440 = vmatprep.subr.bf16.mxu0 %v3003_v34  ;;  %2472 = vmatprep.subr.bf16.mxu1 %v3078_v36 }
 0x540   :  { %2442 = vmatpush1.bf16.msra.mxu0 %v3005_v11  ;;  %2474 = vmatpush1.bf16.msra.mxu1 %v3080_v63  ;;  %v1290_v11 = vld [vmem:[#allocation4 + $0xb8] sm:$0xff] }
 0x541   :  { %2444 = vmatprep.subr.bf16.mxu0 %v3009_v20  ;;  %2476 = vmatprep.subr.bf16.mxu1 %v3084_v41  ;;  %v1294_v35 = vadd.f32 %v1290_v11, %v2903_v19 }
 0x544   :  { %2446 = vmatpush1.bf16.msra.mxu0 %v3011_v24  ;;  %2478 = vmatpush1.bf16.msra.mxu1 %v3086_v21 }
 0x545   :  { %2512 = vmatprep.subr.bf16.mxu1 %v3042_v27 }
 0x5fa   :  { %v1425_v1 = vpop.f32.mrb[10].mxu0  ;;  %v1496_v5 = vpop.f32.mrb[10].mxu1 }
 0x5fb   :  { %v1501_v9 = vadd.f32 %v1425_v1, %v1291_v29  ;;  %v1427_v51 = vpop.f32.mrb[11].mxu0  ;;  %v1498_v10 = vpop.f32.mrb[11].mxu1  ;;  %v1503_v27 = vadd.f32 %v1496_v5, %v1293_v32  ;;  %v1817_v29 = vld [vmem:[#allocation7 + $0x120] sm:$0xff]  ;;  %v1826_v1 = vld [vmem:[#allocation7 + $0x168] sm:$0xff] }
 0x5fc   :  { %v1502_v34 = vadd.f32 %v1427_v51, %v1292_v55  ;;  %v1504_v54 = vadd.f32 %v1498_v10, %v1294_v35  ;;  %v2497_v47 = vpack.c.bf16 %v1817_v29, %v1813_v7  ;;  %v1822_v55 = vld [vmem:[#allocation7 + $0x148] sm:$0xff]  ;;  %v1825_v32 = vld [vmem:[#allocation7 + $0x160] sm:$0xff]  ;;  %v1778_v7 = vadd.f32 %v1774_v40, %v2896_v61 }
 0x5fd   :  { %v1505_v20 = vmul.f32 0.5, %v1501_v9  ;;  %v2499_v5 = vpack.c.bf16 %v1826_v1, %v1822_v55  ;;  %v1821_v9 = vld [vmem:[#allocation7 + $0x140] sm:$0xff]  ;;  %v1830_v10 = vld [vmem:[#allocation7 + $0x188] sm:$0xff] }
 0x5fe   :  { %v1509_v24 = vmul.f32 0.5, %v1502_v34  ;;  %v1514_v59 = vmul.f32 0.5, %v1504_v54  ;;  %v2501_v51 = vpack.c.bf16 %v1825_v32, %v1821_v9  ;;  %v1834_v34 = vld [vmem:[#allocation7 + $0x1a8] sm:$0xff]  ;;  %v1776_v32 = vld [vmem:[#allocation4 + $0xf8] sm:$0xff] }
 0x5ff   :  { %2601 = vtanh.f32 %v1505_v20  ;;  %v2503_v11 = vpack.c.bf16 %v1834_v34, %v1830_v10  ;;  %v1829_v20 = vld [vmem:[#allocation7 + $0x180] sm:$0xff]  ;;  %v1838_v35 = vld [vmem:[#allocation7 + $0x1c8] sm:$0xff] }
 0x600   :  { %2603 = vtanh.f32 %v1509_v24  ;;  %v1833_v24 = vld [vmem:[#allocation7 + $0x1a0] sm:$0xff]  ;;  %v1842_v54 = vld [vmem:[#allocation7 + $0x1e8] sm:$0xff] }
 0x601   :  { %2605 = vtanh.f32 %v1503_v27  ;;  %v2505_v27 = vpack.c.bf16 %v1833_v24, %v1829_v20 }
 0x602   :  { %2607 = vtanh.f32 %v1514_v59  ;;  %v2507_v59 = vpack.c.bf16 %v1842_v54, %v1838_v35 }
 0x609   :  { %v2602_v2 = vpop.eup %2601 }
 0x60a   :  { %v2604_v3 = vpop.eup %2603  ;;  %v1507_v8 = vmul.f32 0.5, %v2602_v2  ;;  %v1837_v2 = vld [vmem:[#allocation7 + $0x1c0] sm:$0xff] }
 0x60b   :  { %v1511_v22 = vmul.f32 0.5, %v2604_v3  ;;  %v2606_v30 = vpop.eup %2605  ;;  %v1841_v3 = vld [vmem:[#allocation7 + $0x1e0] sm:$0xff] }
 0x60c   :  { %v1508_v46 = vadd.f32 0.5, %v1507_v8  ;;  %v2608_v14 = vpop.eup %2607  ;;  %v2509_v8 = vpack.c.bf16 %v1841_v3, %v1837_v2 }
 0x60d   :  { %v1512_v58 = vadd.f32 0.5, %v1511_v22  ;;  %v1516_v28 = vmul.f32 0.5, %v2608_v14  ;;  %v1530_v22 = vld [vmem:[#allocation4 + $0xc0] sm:$0xff] }
 0x60e   :  { %v1519_v38 = vmul.f32 %v2606_v30, %v1508_v46  ;;  %v1531_v46 = vld [vmem:[#allocation4 + $0xc8] sm:$0xff]  ;;  %v1534_v30 = vadd.f32 %v1530_v22, %v2894_v56 }
 0x60f   :  { %v1518_v15 = vmul.f32 %v1512_v58, %v3138_v39  ;;  %v1517_v31 = vadd.f32 0.5, %v1516_v28  ;;  %v2491_v39 = vpack.c.bf16 %v1810_v16, %v1806_v18  ;;  %v1532_v58 = vld [vmem:[#allocation4 + $0xd0] sm:$0xff] }
 0x611   :  { %v3179_v17 = vadd.f32 %v1519_v38, %v1518_v15  ;;  %v1535_v38 = vadd.f32 %v1531_v46, %v2896_v61 }
 0x613   :  { %2609 = vtanh.f32 %v3179_v17 }
 0x61d   :  { %v2610_v37 = vpop.eup %2609 }
 0x61e   :  { %v1522_v45 = vmul.f32 %v2610_v37, %v1517_v31  ;;  %v1536_v31 = vadd.f32 %v1532_v58, %v2898_v4 }
 0x620   :  { %1526 = vst [vmem:[#allocation9 + $0x28] sm:$0xff] %v1522_v45  ;;  %1667 = vmatmul.mubr.f32.vlgmr.msra.gmra.mrb[12].mxu0 %v1522_v45  ;;  %1738 = vmatmul.mubr.f32.vlgmr.msra.gmra.mrb[12].mxu1 %v1522_v45 }
 0x621   :  { %2514 = vmatpush1.bf16.msra.mxu1 %v3044_v13  ;;  %1909 = vmatprep.mubr.f32.mxu0 %v2707_v0  ;;  %v1786_v13 = vld [vmem:[#allocation7 + $0x28] sm:$0xff] }
 0x622   :  { %2516 = vmatprep.subr.bf16.mxu1 %v3048_v23  ;;  %1980 = vmatprep.mubr.f32.mxu1 %v2707_v0  ;;  %v1782_v0 = vld [vmem:[#allocation7 + $0x8] sm:$0xff] }
 0x623   :  { %v2479_v23 = vpack.c.bf16 %v1786_v13, %v1782_v0  ;;  %v1533_v13 = vld [vmem:[#allocation4 + $0xd8] sm:$0xff] }
 0x625   :  { %2518 = vmatpush1.bf16.msra.mxu1 %v3050_v33  ;;  %v1781_v33 = vld [vmem:[#allocation7] sm:$0xff]  ;;  %2480 = vmatprep.subr.bf16.mxu0 %v2479_v23 }
 0x626   :  { %2520 = vmatprep.subr.bf16.mxu1 %v3054_v43  ;;  %v1785_v43 = vld [vmem:[#allocation7 + $0x20] sm:$0xff] }
 0x629   :  { %2522 = vmatpush1.bf16.msra.mxu1 %v3056_v50  ;;  %v2481_v50 = vpack.c.bf16 %v1785_v43, %v1781_v33 }
 0x62a   :  { %2524 = vmatprep.subr.bf16.mxu1 %v3060_v26  ;;  %v1790_v26 = vld [vmem:[#allocation7 + $0x48] sm:$0xff] }
 0x62b   :  { %2482 = vmatpush1.bf16.msra.mxu0 %v2481_v50  ;;  %v1537_v50 = vadd.f32 %v1533_v13, %v2903_v19 }
 0x62d   :  { %2526 = vmatpush1.bf16.msra.mxu1 %v3062_v57  ;;  %v1794_v57 = vld [vmem:[#allocation7 + $0x68] sm:$0xff] }
 0x62e   :  { %2528 = vmatprep.subr.bf16.mxu1 %v3066_v25  ;;  %v2483_v25 = vpack.c.bf16 %v1794_v57, %v1790_v26 }
 0x630   :  { %2484 = vmatprep.subr.bf16.mxu0 %v2483_v25 }
 0x631   :  { %2530 = vmatpush1.bf16.msra.mxu1 %v3068_v53  ;;  %v1789_v53 = vld [vmem:[#allocation7 + $0x40] sm:$0xff] }
 0x632   :  { %2532 = vmatprep.subr.bf16.mxu1 %v3072_v62  ;;  %v1793_v62 = vld [vmem:[#allocation7 + $0x60] sm:$0xff] }
 0x635   :  { %2534 = vmatpush1.bf16.msra.mxu1 %v3074_v6  ;;  %v2485_v6 = vpack.c.bf16 %v1793_v62, %v1789_v53 }
 0x636   :  { %2536 = vmatprep.subr.bf16.mxu1 %v3078_v36  ;;  %v1798_v36 = vld [vmem:[#allocation7 + $0x88] sm:$0xff] }
 0x637   :  { %2486 = vmatpush1.bf16.msra.mxu0 %v2485_v6 }
 0x639   :  { %2538 = vmatpush1.bf16.msra.mxu1 %v3080_v63  ;;  %v1802_v63 = vld [vmem:[#allocation7 + $0xa8] sm:$0xff] }
 0x63a   :  { %2540 = vmatprep.subr.bf16.mxu1 %v3084_v41  ;;  %v2487_v41 = vpack.c.bf16 %v1802_v63, %v1798_v36 }
 0x63c   :  { %2488 = vmatprep.subr.bf16.mxu0 %v2487_v41 }
 0x63d   :  { %2542 = vmatpush1.bf16.msra.mxu1 %v3086_v21  ;;  %v1797_v21 = vld [vmem:[#allocation7 + $0x80] sm:$0xff] }
 0x63e   :  { %v2489_v52 = vpack.c.bf16 %v1801_v49, %v1797_v21 }
 0x640   :  { %2490 = vmatpush1.bf16.msra.mxu0 %v2489_v52 }
 0x641   :  { %2492 = vmatprep.subr.bf16.mxu0 %v2491_v39 }
 0x644   :  { %2494 = vmatpush1.bf16.msra.mxu0 %v2493_v12  ;;  %v1773_v12 = vld [vmem:[#allocation4 + $0xe0] sm:$0xff] }
 0x645   :  { %2496 = vmatprep.subr.bf16.mxu0 %v2495_v48  ;;  %v1777_v42 = vadd.f32 %v1773_v12, %v2894_v56  ;;  %v1775_v48 = vld [vmem:[#allocation4 + $0xf0] sm:$0xff] }
 0x646   :  { %v1779_v55 = vadd.f32 %v1775_v48, %v2898_v4 }
 0x648   :  { %2498 = vmatpush1.bf16.msra.mxu0 %v2497_v47 }
 0x649   :  { %2500 = vmatprep.subr.bf16.mxu0 %v2499_v5 }
 0x64c   :  { %2502 = vmatpush1.bf16.msra.mxu0 %v2501_v51 }
 0x64d   :  { %2504 = vmatprep.subr.bf16.mxu0 %v2503_v11  ;;  %v1780_v11 = vadd.f32 %v1776_v32, %v2903_v19 }
 0x650   :  { %2506 = vmatpush1.bf16.msra.mxu0 %v2505_v27 }
 0x651   :  { %2508 = vmatprep.subr.bf16.mxu0 %v2507_v59 }
 0x654   :  { %2510 = vmatpush1.bf16.msra.mxu0 %v2509_v8 }
 0x6f3   :  { %v1668_v15 = vpop.f32.mrb[12].mxu0  ;;  %v1739_v14 = vpop.f32.mrb[12].mxu1 }
 0x6f4   :  { %v1744_v28 = vadd.f32 %v1668_v15, %v1534_v30  ;;  %v1670_v37 = vpop.f32.mrb[13].mxu0  ;;  %v1741_v45 = vpop.f32.mrb[13].mxu1  ;;  %v1746_v43 = vadd.f32 %v1739_v14, %v1536_v31 }
 0x6f5   :  { %v1745_v0 = vadd.f32 %v1670_v37, %v1535_v38  ;;  %v1747_v26 = vadd.f32 %v1741_v45, %v1537_v50 }
 0x6f6   :  { %v1748_v23 = vmul.f32 0.5, %v1744_v28 }
 0x6f7   :  { %v1752_v33 = vmul.f32 0.5, %v1745_v0  ;;  %v1757_v57 = vmul.f32 0.5, %v1747_v26 }
 0x6f8   :  { %2611 = vtanh.f32 %v1748_v23 }
 0x6f9   :  { %2613 = vtanh.f32 %v1752_v33 }
 0x6fa   :  { %2615 = vtanh.f32 %v1746_v43 }
 0x6fb   :  { %2617 = vtanh.f32 %v1757_v57 }
 0x702   :  { %v2612_v25 = vpop.eup %2611 }
 0x703   :  { %v2614_v53 = vpop.eup %2613  ;;  %v1750_v62 = vmul.f32 0.5, %v2612_v25 }
 0x704   :  { %v1754_v6 = vmul.f32 0.5, %v2614_v53  ;;  %v2616_v63 = vpop.eup %2615 }
 0x705   :  { %v1751_v36 = vadd.f32 0.5, %v1750_v62  ;;  %v2618_v18 = vpop.eup %2617 }
 0x706   :  { %v1755_v41 = vadd.f32 0.5, %v1754_v6  ;;  %v1759_v16 = vmul.f32 0.5, %v2618_v18 }
 0x707   :  { %v1762_v21 = vmul.f32 %v2616_v63, %v1751_v36 }
 0x708   :  { %v1761_v49 = vmul.f32 %v1755_v41, %v3179_v17  ;;  %v1760_v39 = vadd.f32 0.5, %v1759_v16 }
 0x70a   :  { %v1763_v52 = vadd.f32 %v1762_v21, %v1761_v49 }
 0x70c   :  { %2619 = vtanh.f32 %v1763_v52 }
 0x716   :  { %v2620_v44 = vpop.eup %2619 }
 0x717   :  { %v1765_v60 = vmul.f32 %v2620_v44, %v1760_v39 }
 0x719   :  { %1769 = vst [vmem:[#allocation9 + $0x30] sm:$0xff] %v1765_v60  ;;  %1910 = vmatmul.mubr.f32.vlgmr.msra.gmra.mrb[14].mxu0 %v1765_v60  ;;  %1981 = vmatmul.mubr.f32.vlgmr.msra.gmra.mrb[14].mxu1 %v1765_v60 }
 0x7ec   :  { %v1911_v29 = vpop.f32.mrb[14].mxu0  ;;  %v1982_v47 = vpop.f32.mrb[14].mxu1 }
 0x7ed   :  { %v1987_v17 = vadd.f32 %v1911_v29, %v1777_v42  ;;  %v1913_v1 = vpop.f32.mrb[15].mxu0  ;;  %v1984_v5 = vpop.f32.mrb[15].mxu1  ;;  %v1989_v34 = vadd.f32 %v1982_v47, %v1779_v55 }
 0x7ee   :  { %v1988_v9 = vadd.f32 %v1913_v1, %v1778_v7  ;;  %v1990_v56 = vadd.f32 %v1984_v5, %v1780_v11 }
 0x7ef   :  { %v1991_v51 = vmul.f32 0.5, %v1987_v17 }
 0x7f0   :  { %v1995_v10 = vmul.f32 0.5, %v1988_v9  ;;  %v2000_v20 = vmul.f32 0.5, %v1990_v56 }
 0x7f1   :  { %2621 = vtanh.f32 %v1991_v51 }
 0x7f2   :  { %2623 = vtanh.f32 %v1995_v10 }
 0x7f3   :  { %2625 = vtanh.f32 %v1989_v34 }
 0x7f4   :  { %2627 = vtanh.f32 %v2000_v20 }
 0x7fb   :  { %v2622_v61 = vpop.eup %2621 }
 0x7fc   :  { %v2624_v24 = vpop.eup %2623  ;;  %v1993_v27 = vmul.f32 0.5, %v2622_v61 }
 0x7fd   :  { %v1997_v35 = vmul.f32 0.5, %v2624_v24  ;;  %v2626_v54 = vpop.eup %2625 }
 0x7fe   :  { %v1994_v4 = vadd.f32 0.5, %v1993_v27  ;;  %v2628_v22 = vpop.eup %2627 }
 0x7ff   :  { %v1998_v59 = vadd.f32 0.5, %v1997_v35  ;;  %v2002_v46 = vmul.f32 0.5, %v2628_v22 }
 0x800   :  { %v2005_v2 = vmul.f32 %v2626_v54, %v1994_v4 }
 0x801   :  { %v2004_v3 = vmul.f32 %v1998_v59, %v1763_v52  ;;  %v2003_v19 = vadd.f32 0.5, %v2002_v46 }
 0x803   :  { %v2006_v8 = vadd.f32 %v2005_v2, %v2004_v3 }
 0x805   :  { %2629 = vtanh.f32 %v2006_v8 }
 0x80f   :  { %v2630_v30 = vpop.eup %2629 }
 0x810   :  { %v2008_v58 = vmul.f32 %v2630_v30, %v2003_v19 }
 0x812   :  { %2012 = vst [vmem:[#allocation9 + $0x38] sm:$0xff] %v2008_v58 }
 0x813   :  { %2686 = shalt.err (!%p2683_p6)
}
 0x814   :  { %s2687_s15 = scalar_lea.hbm %s3223_s3, 1024 }
 0x815   :  { %p2688_p7 = scmp.ne.s32.totalorder %s3223_s3, %s2687_s15  ;;  %p2691_p8 = scmp.lt.u32.totalorder %s2687_s15, %s3223_s3 }
 0x817   :  { %p2693_p9 = pnand %p2691_p8, %p2688_p7 }
 0x819   :  { %2696 = shalt.err (!%p2693_p9)
}
 0x81a   :  { %s2709_s20 = smov 128   ;;  %s2710_s21 = smov 8  }
 0x81b   :  { %2024 = dma.vmem_to_hbm [thread:$0]  %s2019_s11, 1024, %s3223_s3, [#allocation6], %s2709_s20, %s2709_s20, %s2710_s21  }
 0x81c   :  { %2701 = dma.done.wait [#allocation6], 1024  }
 0x81d   :  { %2702 = vsyncadd [#allocation6], 4294966272 }
 0x81e   :  { %2028 = vsyncpa [#allocation5], 1 }
 0x81f   :  { %2029 = vsyncpa [#allocation8], 1 }
 0x820   :  { %2030 = vsyncpa [#allocation6], 1 }

</bundles_post_ra>
